<compile_context>
chip_gen: v7x
topology: tpu7x:2x2x1
jax: 0.10.0
libtpu: 0.0.40
codegen_flags: <defaults>
</compile_context>

<pallas_src>
import jax
import jax.numpy as jnp
import numpy as np
from jax.experimental import pallas as pl
from jax.experimental.pallas import tpu as pltpu


def cnn_block_kernel(x_ref, w_ref, shift_ref, o_ref):
    """Fused Conv3x3(pad=1) + bias/BatchNorm(eval) + ReLU + MaxPool2d(2), Nb images/step.

    x_ref:     (Nb, H, W, Cin)   bf16  unpadded NHWC images
    w_ref:     (9*Cin, Cp)       bf16  conv weights, BN scale folded, Cout padded to Cp
    shift_ref: (1, Cp)           f32   beta + (conv_bias - running_mean) * scale (padded)
    o_ref:     (Nb, Ho*Wo, Cp)         pooled output (row index = i*Wo + j)
    """
    Nb, H, W, Cin = x_ref.shape
    Ho, Wo = H // 2, W // 2
    Cp = o_ref.shape[-1]

    x = x_ref[...]                                            # (Nb, H, W, Cin) bf16

    # pad=1 halo built in-register (no HBM pad pass).
    zrow = jnp.zeros((Nb, 1, W, Cin), x.dtype)
    x = jnp.concatenate([zrow, x, zrow], axis=1)              # (Nb, H+2, W, Cin)
    zcol = jnp.zeros((Nb, H + 2, 1, Cin), x.dtype)
    x = jnp.concatenate([zcol, x, zcol], axis=2)              # (Nb, H+2, W+2, Cin)

    # In-VMEM im2col along the contraction dim: K = 9*Cin (tap-major, matching w_ref).
    cols = [x[:, dy:dy + H, dx:dx + W, :] for dy in range(3) for dx in range(3)]
    lhs = jnp.concatenate(cols, axis=-1).reshape(Nb * H * W, 9 * Cin)

    # Single MXU dot, f32 accumulation (accumulation lives in the MXU, not the VPU).
    acc = jnp.dot(lhs, w_ref[...], preferred_element_type=jnp.float32)   # (Nb*H*W, Cp)

    # conv bias + BatchNorm (folded) + ReLU; Dropout(0.1) is identity in eval mode.
    y = jnp.maximum(acc + shift_ref[...], 0.0)                # f32 VPU math

    # 2x2 max-pool, stride 2. Row index within an image is h*W + w.
    y = y.reshape(Nb, Ho, 2 * W, Cp)                          # t: h = 2i + t//W, w = t%W
    y = jnp.maximum(y[:, :, :W, :], y[:, :, W:, :])           # pool over h -> (Nb, Ho, W, Cp)
    y = y.reshape(Nb, Ho * Wo, 2, Cp)                         # [i*Wo+j, p]: w = 2j + p
    y = jnp.maximum(y[:, :, 0, :], y[:, :, 1, :])             # pool over w -> (Nb, Ho*Wo, Cp)

    o_ref[...] = y.astype(o_ref.dtype)


def cnn_block_forward(x_nchw, w, b, gamma, beta, running_mean, running_var,
                      eps=1e-5, block_n=8):
    """Eval-mode CNNBlock forward. Takes / returns NCHW (PyTorch convention)."""
    N, Cin, H, W = x_nchw.shape
    Cout = w.shape[0]
    assert H % 2 == 0 and W % 2 == 0
    Ho, Wo = H // 2, W // 2
    M = Ho * Wo
    K = 9 * Cin
    Cp = ((Cout + 127) // 128) * 128          # lane-dense padded output channels
    out_dtype = x_nchw.dtype

    # Fold conv bias + BatchNorm (running stats) into per-channel scale/shift, fold the
    # scale into the conv weights, and zero-pad the Cout axis up to Cp lanes.
    scale = gamma / jnp.sqrt(running_var + eps)                          # (Cout,)
    shift = (beta + (b - running_mean) * scale).astype(jnp.float32)      # (Cout,)
    shift = jnp.pad(shift, (0, Cp - Cout)).reshape(1, Cp)
    w9 = jnp.transpose(w, (2, 3, 1, 0)) * scale                          # (3,3,Cin,Cout)
    w9 = w9.reshape(K, Cout)                                             # k = (dy*3+dx)*Cin+ci
    w9 = jnp.pad(w9, ((0, 0), (0, Cp - Cout))).astype(jnp.bfloat16)      # (K, Cp)

    # Glue: NCHW -> NHWC (bf16). (Accepting/returning NHWC would drop the two XLA
    # transposes entirely; kept for PyTorch API parity.) No HBM pad: halo is in-kernel.
    x = jnp.transpose(x_nchw.astype(jnp.bfloat16), (0, 2, 3, 1))         # (N, H, W, Cin)

    # Batch Nb images per grid step (fold Nb into the matmul M).
    Nb = min(N, block_n)
    Ng = pl.cdiv(N, Nb)
    N_pad = Ng * Nb
    if N_pad != N:
        x = jnp.pad(x, ((0, N_pad - N), (0, 0), (0, 0), (0, 0)))

    out = pl.pallas_call(
        cnn_block_kernel,
        out_shape=jax.ShapeDtypeStruct((N_pad, M, Cp), out_dtype),
        grid=(Ng,),
        in_specs=[
            pl.BlockSpec((Nb, H, W, Cin), lambda n: (n, 0, 0, 0)),
            pl.BlockSpec((K, Cp), lambda n: (0, 0)),       # resident weights
            pl.BlockSpec((1, Cp), lambda n: (0, 0)),       # resident shift
        ],
        out_specs=pl.BlockSpec((Nb, M, Cp), lambda n: (n, 0, 0)),
        compiler_params=pltpu.CompilerParams(dimension_semantics=("parallel",)),
    )(x, w9, shift)

    out = out[:N, :, :Cout].reshape(N, Ho, Wo, Cout)
    return jnp.transpose(out, (0, 3, 1, 2))                              # back to NCHW


def cnn_block_reference(x, w, b, gamma, beta, mean, var, eps=1e-5):
    """Pure-JAX (f32) reference matching PyTorch eval-mode CNNBlock."""
    y = jax.lax.conv_general_dilated(
        x, w, window_strides=(1, 1), padding=((1, 1), (1, 1)),
        dimension_numbers=("NCHW", "OIHW", "NCHW"))
    y = y + b.reshape(1, -1, 1, 1)
    y = (y - mean.reshape(1, -1, 1, 1)) / jnp.sqrt(var.reshape(1, -1, 1, 1) + eps)
    y = y * gamma.reshape(1, -1, 1, 1) + beta.reshape(1, -1, 1, 1)
    y = jnp.maximum(y, 0.0)
    y = jax.lax.reduce_window(y, -jnp.inf, jax.lax.max,
                              (1, 1, 2, 2), (1, 1, 2, 2), "VALID")
    return y


if __name__ == "__main__":
    key = jax.random.PRNGKey(0)
    N, dim_in, dim_out, H, W = 2, 4, 8, 16, 16
    kx, kw, kb, kg, kbt, km, kv = jax.random.split(key, 7)

    x = jax.random.normal(kx, (N, dim_in, H, W), jnp.float32)
    w = 0.1 * jax.random.normal(kw, (dim_out, dim_in, 3, 3), jnp.float32)
    b = 0.1 * jax.random.normal(kb, (dim_out,), jnp.float32)
    gamma = 1.0 + 0.1 * jax.random.normal(kg, (dim_out,), jnp.float32)
    beta = 0.05 * jax.random.normal(kbt, (dim_out,), jnp.float32)
    running_mean = 0.1 * jax.random.normal(km, (dim_out,), jnp.float32)
    running_var = jax.random.uniform(kv, (dim_out,), jnp.float32, 0.5, 1.5)

    out = jax.jit(cnn_block_forward)(x, w, b, gamma, beta, running_mean, running_var)
    out = jax.block_until_ready(out)

    ref = cnn_block_reference(x, w, b, gamma, beta, running_mean, running_var)
    assert out.shape == (N, dim_out, H // 2, W // 2)
    # bf16 activations/weights on the MXU (f32 accumulation) -> loosen tolerance vs f32 ref.
    np.testing.assert_allclose(np.asarray(out), np.asarray(ref), rtol=3e-2, atol=3e-2)
    print("KERNEL_OK")
</pallas_src>

<mosaic_0001>
module attributes {stable_mosaic.version = 11 : i64} {
  func.func @cnn_block_kernel(%arg0: i32, %arg1: memref<2x16x16x4xbf16, #tpu.memory_space<vmem>>, %arg2: memref<36x128xbf16, #tpu.memory_space<vmem>>, %arg3: memref<1x128xf32, #tpu.memory_space<vmem>>, %arg4: memref<2x64x128xf32, #tpu.memory_space<vmem>>) attributes {dimension_semantics = [#tpu.dimension_semantics<parallel>], iteration_bounds = array<i64: 1>, scalar_prefetch = 0 : i64, scratch_operands = 0 : i64, tpu.core_type = #tpu.core_type<tc>, window_params = [{transform_indices = @transform_0, window_bounds = array<i64: 2, 16, 16, 4>}, {pipeline_mode = #tpu.pipeline_mode<synchronous>, transform_indices = @transform_1, window_bounds = array<i64: 36, 128>}, {pipeline_mode = #tpu.pipeline_mode<synchronous>, transform_indices = @transform_2, window_bounds = array<i64: 1, 128>}, {transform_indices = @transform_3, window_bounds = array<i64: 2, 64, 128>}]} {
    %c0 = arith.constant 0 : index
    %c0_0 = arith.constant 0 : index
    %c0_1 = arith.constant 0 : index
    %c0_2 = arith.constant 0 : index
    %0 = vector.load %arg1[%c0, %c0_0, %c0_1, %c0_2] : memref<2x16x16x4xbf16, #tpu.memory_space<vmem>>, vector<2x16x16x4xbf16>
    %cst = arith.constant 0.000000e+00 : bf16
    %1 = vector.broadcast %cst : bf16 to vector<2x1x16x4xbf16>
    %2 = tpu.concatenate %1, %0, %1 in 1 : vector<2x1x16x4xbf16>, vector<2x16x16x4xbf16>, vector<2x1x16x4xbf16> -> vector<2x18x16x4xbf16>
    %cst_3 = arith.constant 0.000000e+00 : bf16
    %3 = vector.broadcast %cst_3 : bf16 to vector<2x18x1x4xbf16>
    %4 = tpu.concatenate %3, %2, %3 in 2 : vector<2x18x1x4xbf16>, vector<2x18x16x4xbf16>, vector<2x18x1x4xbf16> -> vector<2x18x18x4xbf16>
    %5 = vector.extract_strided_slice %4 {offsets = [0, 0, 0, 0], sizes = [2, 16, 16, 4], strides = [1, 1, 1, 1]} : vector<2x18x18x4xbf16> to vector<2x16x16x4xbf16>
    %6 = vector.extract_strided_slice %4 {offsets = [0, 0, 1, 0], sizes = [2, 16, 16, 4], strides = [1, 1, 1, 1]} : vector<2x18x18x4xbf16> to vector<2x16x16x4xbf16>
    %7 = vector.extract_strided_slice %4 {offsets = [0, 0, 2, 0], sizes = [2, 16, 16, 4], strides = [1, 1, 1, 1]} : vector<2x18x18x4xbf16> to vector<2x16x16x4xbf16>
    %8 = vector.extract_strided_slice %4 {offsets = [0, 1, 0, 0], sizes = [2, 16, 16, 4], strides = [1, 1, 1, 1]} : vector<2x18x18x4xbf16> to vector<2x16x16x4xbf16>
    %9 = vector.extract_strided_slice %4 {offsets = [0, 1, 1, 0], sizes = [2, 16, 16, 4], strides = [1, 1, 1, 1]} : vector<2x18x18x4xbf16> to vector<2x16x16x4xbf16>
    %10 = vector.extract_strided_slice %4 {offsets = [0, 1, 2, 0], sizes = [2, 16, 16, 4], strides = [1, 1, 1, 1]} : vector<2x18x18x4xbf16> to vector<2x16x16x4xbf16>
    %11 = vector.extract_strided_slice %4 {offsets = [0, 2, 0, 0], sizes = [2, 16, 16, 4], strides = [1, 1, 1, 1]} : vector<2x18x18x4xbf16> to vector<2x16x16x4xbf16>
    %12 = vector.extract_strided_slice %4 {offsets = [0, 2, 1, 0], sizes = [2, 16, 16, 4], strides = [1, 1, 1, 1]} : vector<2x18x18x4xbf16> to vector<2x16x16x4xbf16>
    %13 = vector.extract_strided_slice %4 {offsets = [0, 2, 2, 0], sizes = [2, 16, 16, 4], strides = [1, 1, 1, 1]} : vector<2x18x18x4xbf16> to vector<2x16x16x4xbf16>
    %14 = tpu.concatenate %5, %6, %7, %8, %9, %10, %11, %12, %13 in 3 : vector<2x16x16x4xbf16>, vector<2x16x16x4xbf16>, vector<2x16x16x4xbf16>, vector<2x16x16x4xbf16>, vector<2x16x16x4xbf16>, vector<2x16x16x4xbf16>, vector<2x16x16x4xbf16>, vector<2x16x16x4xbf16>, vector<2x16x16x4xbf16> -> vector<2x16x16x36xbf16>
    %15 = vector.shape_cast %14 : vector<2x16x16x36xbf16> to vector<512x36xbf16>
    %c0_4 = arith.constant 0 : index
    %c0_5 = arith.constant 0 : index
    %16 = vector.load %arg2[%c0_4, %c0_5] : memref<36x128xbf16, #tpu.memory_space<vmem>>, vector<36x128xbf16>
    %cst_6 = arith.constant dense<0.000000e+00> : vector<512x128xf32>
    %17 = tpu.matmul %15, %16, %cst_6 {dimension_numbers = #tpu.dot_dimension_numbers<[1], [0], [0], [1], [0, 0, 1, 1], [], []>} : vector<512x36xbf16>, vector<36x128xbf16>, vector<512x128xf32> -> vector<512x128xf32>
    %c0_7 = arith.constant 0 : index
    %c0_8 = arith.constant 0 : index
    %18 = vector.load %arg3[%c0_7, %c0_8] : memref<1x128xf32, #tpu.memory_space<vmem>>, vector<1x128xf32>
    %19 = vector.broadcast %18 : vector<1x128xf32> to vector<512x128xf32>
    %20 = arith.addf %17, %19 : vector<512x128xf32>
    %cst_9 = arith.constant 0.000000e+00 : f32
    %21 = vector.broadcast %cst_9 : f32 to vector<512x128xf32>
    %22 = arith.maximumf %20, %21 : vector<512x128xf32>
    %23 = vector.shape_cast %22 : vector<512x128xf32> to vector<2x8x32x128xf32>
    %24 = vector.extract_strided_slice %23 {offsets = [0, 0, 0, 0], sizes = [2, 8, 16, 128], strides = [1, 1, 1, 1]} : vector<2x8x32x128xf32> to vector<2x8x16x128xf32>
    %25 = vector.extract_strided_slice %23 {offsets = [0, 0, 16, 0], sizes = [2, 8, 16, 128], strides = [1, 1, 1, 1]} : vector<2x8x32x128xf32> to vector<2x8x16x128xf32>
    %26 = arith.maximumf %24, %25 : vector<2x8x16x128xf32>
    %27 = vector.shape_cast %26 : vector<2x8x16x128xf32> to vector<2x64x2x128xf32>
    %28 = vector.extract_strided_slice %27 {offsets = [0, 0, 0, 0], sizes = [2, 64, 1, 128], strides = [1, 1, 1, 1]} : vector<2x64x2x128xf32> to vector<2x64x1x128xf32>
    %29 = vector.shape_cast %28 : vector<2x64x1x128xf32> to vector<2x64x128xf32>
    %30 = vector.extract_strided_slice %27 {offsets = [0, 0, 1, 0], sizes = [2, 64, 1, 128], strides = [1, 1, 1, 1]} : vector<2x64x2x128xf32> to vector<2x64x1x128xf32>
    %31 = vector.shape_cast %30 : vector<2x64x1x128xf32> to vector<2x64x128xf32>
    %32 = arith.maximumf %29, %31 : vector<2x64x128xf32>
    %c0_10 = arith.constant 0 : index
    %c0_11 = arith.constant 0 : index
    %c0_12 = arith.constant 0 : index
    %33 = vector.load %arg4[%c0_10, %c0_11, %c0_12] : memref<2x64x128xf32, #tpu.memory_space<vmem>>, vector<2x64x128xf32>
    tpu.vector_store %arg4[%c0_10, %c0_11, %c0_12], %32 {strides = array<i32>} : memref<2x64x128xf32, #tpu.memory_space<vmem>>, vector<2x64x128xf32>,
    return
  }
  func.func @transform_0(%arg0: i32) -> (i32, i32, i32, i32) {
    %c0_i32 = arith.constant 0 : i32
    %c0_i32_0 = arith.constant 0 : i32
    %c0_i32_1 = arith.constant 0 : i32
    %c0_i32_2 = arith.constant 0 : i32
    return %arg0, %c0_i32, %c0_i32_0, %c0_i32_1 : i32, i32, i32, i32
  }
  func.func @transform_1(%arg0: i32) -> (i32, i32) {
    %c0_i32 = arith.constant 0 : i32
    %c0_i32_0 = arith.constant 0 : i32
    %c0_i32_1 = arith.constant 0 : i32
    return %c0_i32, %c0_i32_0 : i32, i32
  }
  func.func @transform_2(%arg0: i32) -> (i32, i32) {
    %c0_i32 = arith.constant 0 : i32
    %c0_i32_0 = arith.constant 0 : i32
    %c0_i32_1 = arith.constant 0 : i32
    return %c0_i32, %c0_i32_0 : i32, i32
  }
  func.func @transform_3(%arg0: i32) -> (i32, i32, i32) {
    %c0_i32 = arith.constant 0 : i32
    %c0_i32_0 = arith.constant 0 : i32
    %c0_i32_1 = arith.constant 0 : i32
    return %arg0, %c0_i32, %c0_i32_0 : i32, i32, i32
  }
}

</mosaic_0001>

<bundles_post_ra>
// kernel: cnn_block_forward.1
= control target key start
LH: loop header
LB: loop body
LE: loop exit
PB: predicated region body
PF: predicated region fallthrough
CT: control target
= control target key end

     0   :  { %vm536_vm0 = vcmask 1040384   ;;  %vm537_vm1 = vsmask.f32 256  ;;  %vm605_vm2 = vsmask.f32 7424  ;;  %v5030_v0 = vmov 0   ;;  %s7344_s0 = inlined_call_operand.vmem [shape: bf16[2,16,16,4], index: 0, kind: input, shape index: {}]   ;;  %s7345_s1 = inlined_call_operand.vmem [shape: bf16[36,128], index: 1, kind: input, shape index: {}]   ;;  %s7346_s2 = inlined_call_operand.vmem [shape: f32[1,128], index: 2, kind: input, shape index: {}]   ;;  %s7347_s3 = inlined_call_operand.vmem [shape: f32[2,64,128], index: 3, kind: output, shape index: {}]  }
   0x1   :  { %v242_v1 = vrot.slane %v5030_v0, 7  ;;  %vm5060_vm3 = vmand %vm536_vm0, %vm537_vm1  ;;  %v7473_v2 = vmov 0  ;;  %v4994_v3 = vld [vmem:[%s7344_s0 + $0x8] sm:$0xff]   ;;  %v4995_v6 = vld [vmem:[%s7344_s0] sm:$0xff]   ;;  %s5031_s24 = smov 4   ;;  %vm1102_vm4 = vcmask 1046528  }
   0x2   :  { %v7474_v2 = vsel %vm5060_vm3, 4294967295, %v7473_v2  ;;  %v4996_v7 = vld [vmem:[%s7344_s0 + $0x10] sm:$0xff]   ;;  %v254_v11 = vshrl.u32 %v4994_v3, 16  ;;  %v257_v12 = vshll.u32 %v4994_v3, 16  ;;  %v247_v13 = vshrl.u32 %v4995_v6, 16  ;;  %v4997_v25 = vld [vmem:[%s7344_s0 + $0x18] sm:$0xff]  }
   0x3   :  { %7475 = vst [vmem:[#allocation2_spill] sm:$0xff] %v7474_v2  ;;  %v5069_v4 = vsel %vm5060_vm3, 0, %v242_v1  ;;  %v5073_v5 = vsel %vm5060_vm3, %v242_v1, 0  ;;  %v250_v14 = vshll.u32 %v4995_v6, 16  ;;  %v261_v15 = vshrl.u32 %v4996_v7, 16  ;;  %v4998_v26 = vld [vmem:[%s7344_s0 + $0x20] sm:$0xff]  }
   0x4   :  { %7476 = vst [vmem:[#allocation3_spill] sm:$0xff] %v5069_v4  ;;  %v607_v8 = vshrl.u32 %v5069_v4, 16  ;;  %v609_v9 = vshll.u32 %v5069_v4, 16  ;;  %v614_v10 = vshll.u32 %v5073_v5, 16  ;;  %v256_v18 = vrot.slane %v254_v11, 7  ;;  %v4999_v35 = vld [vmem:[%s7344_s0 + $0x28] sm:$0xff]  }
   0x5   :  { %v264_v19 = vshll.u32 %v4996_v7, 16  ;;  %v249_v20 = vrot.slane %v247_v13, 7  ;;  %v263_v21 = vrot.slane %v261_v15, 7  ;;  %v5000_v48 = vld [vmem:[%s7344_s0 + $0x30] sm:$0xff]   ;;  %v268_v50 = vshrl.u32 %v4997_v25, 16  ;;  %s5032_s20 = smov 8  }
   0x6   :  { %v611_v16 = vrot.slane %v609_v9, 1  ;;  %v616_v17 = vrot.slane %v614_v10, 1  ;;  %v259_v23 = vor.u32 %v257_v12, %v256_v18  ;;  %v5086_v24 = vsel %vm5060_vm3, %v256_v18, 0  ;;  %v5001_v12 = vld [vmem:[%s7344_s0 + $0x38] sm:$0xff]   ;;  %s5034_s21 = smov 16   ;;  %s5035_s22 = smov 20  }
   0x7   :  { %v638_v27 = vshll.u32 %v5086_v24, 16  ;;  %v252_v28 = vor.u32 %v250_v14, %v249_v20  ;;  %v5097_v29 = vsel %vm5060_vm3, %v249_v20, 0  ;;  %v266_v30 = vor.u32 %v264_v19, %v263_v21  ;;  %s5036_s26 = smov 24   ;;  %s5037_s4 = smov 28  }
   0x8   :  { %v612_v22 = vor.u32 %v611_v16, %v607_v8  ;;  %v5104_v32 = vsel %vm5060_vm3, 0, %v259_v23  ;;  %v626_v33 = vshll.u32 %v5097_v29, 16  ;;  %v5109_v34 = vsel %vm5060_vm3, %v263_v21, 0 }
   0x9   :  { %v631_v36 = vshrl.u32 %v5104_v32, 16  ;;  %v633_v37 = vshll.u32 %v5104_v32, 16  ;;  %v640_v38 = vrot.slane %v638_v27, 1  ;;  %v5120_v39 = vsel %vm5060_vm3, 0, %v252_v28 }
   0xa   :  { %v5100_v31 = vsel %vm605_vm2, %v612_v22, %v616_v17  ;;  %v619_v40 = vshrl.u32 %v5120_v39, 16  ;;  %v621_v41 = vshll.u32 %v5120_v39, 16  ;;  %v628_v42 = vrot.slane %v626_v33, 1 }
   0xb   :  { %7477 = vst [vmem:[#allocation4_spill] sm:$0xff] %v5100_v31  ;;  %978 = vrot.lane.b32.xlu0 %v5100_v31, %s5031_s24  ;;  %v5126_v43 = vsel %vm5060_vm3, 0, %v266_v30  ;;  %v635_v44 = vrot.slane %v633_v37, 1  ;;  %v650_v47 = vshll.u32 %v5109_v34, 16  ;;  %v271_v51 = vshll.u32 %v4997_v25, 16 }
   0xc   :  { %v643_v45 = vshrl.u32 %v5126_v43, 16  ;;  %v645_v46 = vshll.u32 %v5126_v43, 16  ;;  %v623_v49 = vrot.slane %v621_v41, 1  ;;  %v275_v52 = vshrl.u32 %v4998_v26, 16 }
   0xd   :  { %v636_v53 = vor.u32 %v635_v44, %v631_v36  ;;  %v652_v55 = vrot.slane %v650_v47, 1  ;;  %v278_v56 = vshll.u32 %v4998_v26, 16  ;;  %v270_v58 = vrot.slane %v268_v50, 7  ;;  %v5002_v26 = vld [vmem:[%s7344_s0 + $0x40] sm:$0xff]  }
   0xe   :  { %v647_v54 = vrot.slane %v645_v46, 1  ;;  %v624_v57 = vor.u32 %v623_v49, %v619_v40  ;;  %v277_v59 = vrot.slane %v275_v52, 7  ;;  %v282_v60 = vshrl.u32 %v4999_v35, 16 }
   0xf   :  { %v5135_v61 = vsel %vm605_vm2, %v636_v53, %v640_v38  ;;  %v285_v63 = vshll.u32 %v4999_v35, 16  ;;  %v289_v0 = vshrl.u32 %v5000_v48, 16  ;;  %v273_v3 = vor.u32 %v271_v51, %v270_v58 }
  0x10   :  { %7478 = vst [vmem:[#allocation5_spill] sm:$0xff] %v5135_v61  ;;  %v648_v62 = vor.u32 %v647_v54, %v643_v45  ;;  %982 = vrot.lane.b32.xlu1 %v5135_v61, %s5031_s24  ;;  %v5140_v1 = vsel %vm605_vm2, %v624_v57, %v628_v42  ;;  %v5144_v6 = vsel %vm5060_vm3, %v270_v58, 0  ;;  %v280_v7 = vor.u32 %v278_v56, %v277_v59  ;;  %v5003_v45 = vld [vmem:[%s7344_s0 + $0x48] sm:$0xff]   ;;  %v5004_v54 = vld [vmem:[%s7344_s0 + $0x50] sm:$0xff]  }
  0x11   :  { %7479 = vst [vmem:[#allocation6_spill] sm:$0xff] %v5140_v1  ;;  %980 = vrot.lane.b32.xlu0 %v5140_v1, %s5031_s24  ;;  %v662_v9 = vshll.u32 %v5144_v6, 16  ;;  %v5154_v10 = vsel %vm5060_vm3, %v277_v59, 0  ;;  %v284_v11 = vrot.slane %v282_v60, 7  ;;  %v5161_v13 = vsel %vm5060_vm3, 0, %v273_v3 }
  0x12   :  { %v5149_v8 = vsel %vm605_vm2, %v648_v62, %v652_v55  ;;  %7481 = vst [vmem:[#allocation8_spill] sm:$0xff] %v5161_v13  ;;  %v5165_v14 = vsel %vm5060_vm3, 0, %v280_v7  ;;  %v674_v15 = vshll.u32 %v5154_v10, 16  ;;  %v291_v16 = vrot.slane %v289_v0, 7 }
  0x13   :  { %7480 = vst [vmem:[#allocation7_spill] sm:$0xff] %v5149_v8  ;;  %7482 = vst [vmem:[#allocation9_spill] sm:$0xff] %v5165_v14  ;;  %v655_v17 = vshrl.u32 %v5161_v13, 16  ;;  %v657_v18 = vshll.u32 %v5161_v13, 16  ;;  %v664_v19 = vrot.slane %v662_v9, 1  ;;  %v667_v20 = vshrl.u32 %v5165_v14, 16 }
  0x14   :  { %984 = vrot.lane.b32.xlu1 %v5149_v8, %s5031_s24  ;;  %v669_v21 = vshll.u32 %v5165_v14, 16  ;;  %v676_v22 = vrot.slane %v674_v15, 1  ;;  %v287_v23 = vor.u32 %v285_v63, %v284_v11  ;;  %v5176_v25 = vsel %vm5060_vm3, %v284_v11, 0 }
  0x15   :  { %v659_v27 = vrot.slane %v657_v18, 1  ;;  %v686_v28 = vshll.u32 %v5176_v25, 16  ;;  %v292_v30 = vshll.u32 %v5000_v48, 16  ;;  %v5184_v33 = vsel %vm5060_vm3, %v291_v16, 0 }
  0x16   :  { %v671_v35 = vrot.slane %v669_v21, 1  ;;  %v5188_v36 = vsel %vm5060_vm3, 0, %v287_v23  ;;  %v698_v37 = vshll.u32 %v5184_v33, 16  ;;  %v296_v38 = vshrl.u32 %v5001_v12, 16 }
  0x17   :  { %7483 = vst [vmem:[#allocation10_spill] sm:$0xff] %v5188_v36  ;;  %v660_v40 = vor.u32 %v659_v27, %v655_v17  ;;  %v679_v41 = vshrl.u32 %v5188_v36, 16  ;;  %v681_v42 = vshll.u32 %v5188_v36, 16  ;;  %v688_v44 = vrot.slane %v686_v28, 1 }
  0x18   :  { %v672_v46 = vor.u32 %v671_v35, %v667_v20  ;;  %v294_v47 = vor.u32 %v292_v30, %v291_v16  ;;  %v700_v48 = vrot.slane %v698_v37, 1  ;;  %v298_v49 = vrot.slane %v296_v38, 7  ;;  %v5005_v37 = vld [vmem:[%s7344_s0 + $0x58] sm:$0xff]  }
  0x19   :  { %v5197_v50 = vsel %vm605_vm2, %v660_v40, %v664_v19  ;;  %v683_v51 = vrot.slane %v681_v42, 1  ;;  %v299_v52 = vshll.u32 %v5001_v12, 16  ;;  %v303_v53 = vshrl.u32 %v5002_v26, 16 }
  0x1a   :  { %7484 = vst [vmem:[#allocation11_spill] sm:$0xff] %v5197_v50  ;;  %986 = vrot.lane.b32.xlu0 %v5197_v50, %s5031_s24  ;;  %v5205_v55 = vsel %vm605_vm2, %v672_v46, %v676_v22  ;;  %v5209_v56 = vsel %vm5060_vm3, 0, %v294_v47  ;;  %v5213_v57 = vsel %vm5060_vm3, %v298_v49, 0  ;;  %v306_v58 = vshll.u32 %v5002_v26, 16 }
  0x1b   :  { %7485 = vst [vmem:[#allocation12_spill] sm:$0xff] %v5205_v55  ;;  %7486 = vst [vmem:[#allocation13_spill] sm:$0xff] %v5209_v56  ;;  %988 = vrot.lane.b32.xlu1 %v5205_v55, %s5031_s24  ;;  %v684_v59 = vor.u32 %v683_v51, %v679_v41  ;;  %v691_v60 = vshrl.u32 %v5209_v56, 16  ;;  %v693_v62 = vshll.u32 %v5209_v56, 16  ;;  %v301_v63 = vor.u32 %v299_v52, %v298_v49 }
  0x1c   :  { %v710_v0 = vshll.u32 %v5213_v57, 16  ;;  %v305_v3 = vrot.slane %v303_v53, 7  ;;  %v310_v7 = vshrl.u32 %v5003_v45, 16  ;;  %v313_v9 = vshll.u32 %v5003_v45, 16 }
  0x1d   :  { %v5221_v11 = vsel %vm605_vm2, %v684_v59, %v688_v44  ;;  %v695_v12 = vrot.slane %v693_v62, 1  ;;  %v5225_v15 = vsel %vm5060_vm3, 0, %v301_v63  ;;  %v317_v16 = vshrl.u32 %v5004_v54, 16  ;;  %v5006_v44 = vld [vmem:[%s7344_s0 + $0x60] sm:$0xff]   ;;  %v5007_v62 = vld [vmem:[%s7344_s0 + $0x68] sm:$0xff]  }
  0x1e   :  { %7487 = vst [vmem:[#allocation14_spill] sm:$0xff] %v5221_v11  ;;  %990 = vrot.lane.b32.xlu0 %v5221_v11, %s5031_s24  ;;  %v703_v17 = vshrl.u32 %v5225_v15, 16  ;;  %v705_v18 = vshll.u32 %v5225_v15, 16  ;;  %v712_v19 = vrot.slane %v710_v0, 1  ;;  %v308_v20 = vor.u32 %v306_v58, %v305_v3 }
  0x1f   :  { %v696_v21 = vor.u32 %v695_v12, %v691_v60  ;;  %v5233_v22 = vsel %vm5060_vm3, %v305_v3, 0  ;;  %v312_v23 = vrot.slane %v310_v7, 7  ;;  %v319_v26 = vrot.slane %v317_v16, 7 }
  0x20   :  { %v707_v27 = vrot.slane %v705_v18, 1  ;;  %v5237_v28 = vsel %vm5060_vm3, 0, %v308_v20  ;;  %v722_v30 = vshll.u32 %v5233_v22, 16  ;;  %v320_v35 = vshll.u32 %v5004_v54, 16 }
  0x21   :  { %v5244_v38 = vsel %vm605_vm2, %v696_v21, %v700_v48  ;;  %v715_v40 = vshrl.u32 %v5237_v28, 16  ;;  %v717_v41 = vshll.u32 %v5237_v28, 16  ;;  %v315_v42 = vor.u32 %v313_v9, %v312_v23  ;;  %v5008_v9 = vld [vmem:[%s7344_s0 + $0x70] sm:$0xff]  }
  0x22   :  { %7488 = vst [vmem:[#allocation15_spill] sm:$0xff] %v5244_v38  ;;  %992 = vrot.lane.b32.xlu1 %v5244_v38, %s5031_s24  ;;  %v708_v45 = vor.u32 %v707_v27, %v703_v17  ;;  %v724_v46 = vrot.slane %v722_v30, 1  ;;  %v5255_v47 = vsel %vm5060_vm3, %v312_v23, 0  ;;  %v322_v48 = vor.u32 %v320_v35, %v319_v26 }
  0x23   :  { %v719_v49 = vrot.slane %v717_v41, 1  ;;  %v5259_v51 = vsel %vm5060_vm3, 0, %v315_v42  ;;  %v734_v52 = vshll.u32 %v5255_v47, 16  ;;  %v5264_v53 = vsel %vm5060_vm3, %v319_v26, 0 }
  0x24   :  { %v5267_v54 = vsel %vm605_vm2, %v708_v45, %v712_v19  ;;  %v727_v58 = vshrl.u32 %v5259_v51, 16  ;;  %v729_v59 = vshll.u32 %v5259_v51, 16  ;;  %v5273_v60 = vsel %vm5060_vm3, 0, %v322_v48 }
  0x25   :  { %7489 = vst [vmem:[#allocation16_spill] sm:$0xff] %v5267_v54  ;;  %994 = vrot.lane.b32.xlu0 %v5267_v54, %s5031_s24  ;;  %v720_v63 = vor.u32 %v719_v49, %v715_v40  ;;  %v736_v0 = vrot.slane %v734_v52, 1  ;;  %v739_v3 = vshrl.u32 %v5273_v60, 16  ;;  %v741_v7 = vshll.u32 %v5273_v60, 16  ;;  %v5011_v54 = vld [vmem:[%s7344_s0 + $0x90] sm:$0xff]  }
  0x26   :  { %v731_v12 = vrot.slane %v729_v59, 1  ;;  %v746_v16 = vshll.u32 %v5264_v53, 16  ;;  %v324_v17 = vshrl.u32 %v5005_v37, 16  ;;  %v327_v18 = vshll.u32 %v5005_v37, 16 }
  0x27   :  { %v5287_v19 = vsel %vm605_vm2, %v720_v63, %v724_v46  ;;  %v743_v20 = vrot.slane %v741_v7, 1  ;;  %v331_v21 = vshrl.u32 %v5006_v44, 16  ;;  %v334_v23 = vshll.u32 %v5006_v44, 16  ;;  %v5009_v7 = vld [vmem:[%s7344_s0 + $0x80] sm:$0xff]  }
  0x28   :  { %7490 = vst [vmem:[#allocation17_spill] sm:$0xff] %v5287_v19  ;;  %996 = vrot.lane.b32.xlu1 %v5287_v19, %s5031_s24  ;;  %v732_v26 = vor.u32 %v731_v12, %v727_v58  ;;  %v748_v27 = vrot.slane %v746_v16, 1  ;;  %v326_v30 = vrot.slane %v324_v17, 7  ;;  %v338_v35 = vshrl.u32 %v5007_v62, 16 }
  0x29   :  { %v744_v40 = vor.u32 %v743_v20, %v739_v3  ;;  %v333_v41 = vrot.slane %v331_v21, 7  ;;  %v341_v42 = vshll.u32 %v5007_v62, 16  ;;  %v345_v45 = vshrl.u32 %v5008_v9, 16 }
  0x2a   :  { %v5292_v48 = vsel %vm605_vm2, %v732_v26, %v736_v0  ;;  %v329_v37 = vor.u32 %v327_v18, %v326_v30  ;;  %v5296_v46 = vsel %vm5060_vm3, %v326_v30, 0  ;;  %v340_v44 = vrot.slane %v338_v35, 7 }
  0x2b   :  { %7491 = vst [vmem:[#allocation18_spill] sm:$0xff] %v5292_v48  ;;  %998 = vrot.lane.b32.xlu0 %v5292_v48, %s5031_s24  ;;  %v5301_v49 = vsel %vm605_vm2, %v744_v40, %v748_v27  ;;  %v758_v52 = vshll.u32 %v5296_v46, 16  ;;  %v336_v58 = vor.u32 %v334_v23, %v333_v41  ;;  %v5306_v59 = vsel %vm5060_vm3, %v333_v41, 0  ;;  %v5010_v41 = vld [vmem:[%s7344_s0 + $0x88] sm:$0xff]  }
  0x2c   :  { %7492 = vst [vmem:[#allocation19_spill] sm:$0xff] %v5301_v49  ;;  %1000 = vrot.lane.b32.xlu1 %v5301_v49, %s5031_s24  ;;  %v5312_v62 = vsel %vm5060_vm3, 0, %v329_v37  ;;  %v770_v63 = vshll.u32 %v5306_v59, 16  ;;  %v343_v0 = vor.u32 %v341_v42, %v340_v44  ;;  %v5317_v3 = vsel %vm5060_vm3, %v340_v44, 0 }
  0x2d   :  { %7493 = vst [vmem:[#allocation20_spill] sm:$0xff] %v5312_v62  ;;  %v751_v12 = vshrl.u32 %v5312_v62, 16  ;;  %v753_v16 = vshll.u32 %v5312_v62, 16  ;;  %v760_v17 = vrot.slane %v758_v52, 1  ;;  %v5326_v18 = vsel %vm5060_vm3, 0, %v336_v58 }
  0x2e   :  { %7494 = vst [vmem:[#allocation21_spill] sm:$0xff] %v5326_v18  ;;  %v763_v20 = vshrl.u32 %v5326_v18, 16  ;;  %v765_v21 = vshll.u32 %v5326_v18, 16  ;;  %v772_v23 = vrot.slane %v770_v63, 1  ;;  %v5332_v26 = vsel %vm5060_vm3, 0, %v343_v0 }
  0x2f   :  { %7495 = vst [vmem:[#allocation22_spill] sm:$0xff] %v5332_v26  ;;  %v755_v27 = vrot.slane %v753_v16, 1  ;;  %v775_v30 = vshrl.u32 %v5332_v26, 16  ;;  %v777_v35 = vshll.u32 %v5332_v26, 16  ;;  %v782_v40 = vshll.u32 %v5317_v3, 16 }
  0x30   :  { %v767_v42 = vrot.slane %v765_v21, 1  ;;  %v347_v37 = vrot.slane %v345_v45, 7  ;;  %v348_v44 = vshll.u32 %v5008_v9, 16  ;;  %v359_v52 = vshrl.u32 %v5009_v7, 16 }
  0x31   :  { %v756_v58 = vor.u32 %v755_v27, %v751_v12  ;;  %v779_v63 = vrot.slane %v777_v35, 1  ;;  %v784_v31 = vrot.slane %v782_v40, 1  ;;  %v362_v0 = vshll.u32 %v5009_v7, 16 }
  0x32   :  { %v768_v49 = vor.u32 %v767_v42, %v763_v20  ;;  %v350_v16 = vor.u32 %v348_v44, %v347_v37  ;;  %v5342_v48 = vsel %vm5060_vm3, %v347_v37, 0  ;;  %v361_v19 = vrot.slane %v359_v52, 7  ;;  %v5012_v44 = vld [vmem:[%s7344_s0 + $0x98] sm:$0xff]  }
  0x33   :  { %v5348_v21 = vsel %vm605_vm2, %v756_v58, %v760_v17  ;;  %v780_v9 = vor.u32 %v779_v63, %v775_v30  ;;  %v794_v45 = vshll.u32 %v5342_v48, 16  ;;  %v366_v12 = vshrl.u32 %v5010_v41, 16 }
  0x34   :  { %7496 = vst [vmem:[#allocation23_spill] sm:$0xff] %v5348_v21  ;;  %1002 = vrot.lane.b32.xlu0 %v5348_v21, %s5031_s24  ;;  %v5354_v7 = vsel %vm605_vm2, %v768_v49, %v772_v23  ;;  %v5358_v20 = vsel %vm5060_vm3, 0, %v350_v16  ;;  %v364_v27 = vor.u32 %v362_v0, %v361_v19  ;;  %v5362_v35 = vsel %vm5060_vm3, %v361_v19, 0 }
  0x35   :  { %7497 = vst [vmem:[#allocation24_spill] sm:$0xff] %v5354_v7  ;;  %7498 = vst [vmem:[#allocation25_spill] sm:$0xff] %v5358_v20  ;;  %1004 = vrot.lane.b32.xlu1 %v5354_v7, %s5031_s24  ;;  %v5367_v17 = vsel %vm605_vm2, %v780_v9, %v784_v31  ;;  %v787_v30 = vshrl.u32 %v5358_v20, 16  ;;  %v789_v49 = vshll.u32 %v5358_v20, 16  ;;  %v796_v23 = vrot.slane %v794_v45, 1  ;;  %v5013_v31 = vld [vmem:[%s7344_s0 + $0xa0] sm:$0xff]  }
  0x36   :  { %7499 = vst [vmem:[#allocation26_spill] sm:$0xff] %v5367_v17  ;;  %v5373_v40 = vsel %vm5060_vm3, 0, %v364_v27  ;;  %v806_v42 = vshll.u32 %v5362_v35, 16  ;;  %v368_v37 = vrot.slane %v366_v12, 7  ;;  %v369_v19 = vshll.u32 %v5010_v41, 16 }
  0x37   :  { %v791_v52 = vrot.slane %v789_v49, 1  ;;  %v799_v58 = vshrl.u32 %v5373_v40, 16  ;;  %v801_v63 = vshll.u32 %v5373_v40, 16  ;;  %v373_v0 = vshrl.u32 %v5011_v54, 16 }
  0x38   :  { %1006 = vrot.lane.b32.xlu0 %v5367_v17, %s5031_s24  ;;  %v808_v16 = vrot.slane %v806_v42, 1  ;;  %v371_v9 = vor.u32 %v369_v19, %v368_v37  ;;  %v5388_v41 = vsel %vm5060_vm3, %v368_v37, 0  ;;  %v376_v45 = vshll.u32 %v5011_v54, 16 }
  0x39   :  { %v792_v12 = vor.u32 %v791_v52, %v787_v30  ;;  %v803_v27 = vrot.slane %v801_v63, 1  ;;  %v818_v7 = vshll.u32 %v5388_v41, 16  ;;  %v375_v49 = vrot.slane %v373_v0, 7 }
  0x3a   :  { %v5393_v21 = vsel %vm5060_vm3, 0, %v371_v9  ;;  %v380_v38 = vshrl.u32 %v5012_v44, 16  ;;  %v383_v11 = vshll.u32 %v5012_v44, 16  ;;  %v387_v55 = vshrl.u32 %v5013_v31, 16 }
  0x3b   :  { %v5396_v42 = vsel %vm605_vm2, %v792_v12, %v796_v23  ;;  %v804_v19 = vor.u32 %v803_v27, %v799_v58  ;;  %v811_v37 = vshrl.u32 %v5393_v21, 16  ;;  %v813_v54 = vshll.u32 %v5393_v21, 16 }
  0x3c   :  { %7500 = vst [vmem:[#allocation27_spill] sm:$0xff] %v5396_v42  ;;  %1008 = vrot.lane.b32.xlu1 %v5396_v42, %s5031_s24  ;;  %v820_v30 = vrot.slane %v818_v7, 1  ;;  %v378_v52 = vor.u32 %v376_v45, %v375_v49  ;;  %v5404_v63 = vsel %vm5060_vm3, %v375_v49, 0  ;;  %v382_v0 = vrot.slane %v380_v38, 7 }
  0x3d   :  { %v5407_v44 = vsel %vm605_vm2, %v804_v19, %v808_v16  ;;  %v815_v23 = vrot.slane %v813_v54, 1  ;;  %v830_v58 = vshll.u32 %v5404_v63, 16  ;;  %v389_v9 = vrot.slane %v387_v55, 7  ;;  %v5014_v16 = vld [vmem:[%s7344_s0 + $0xa8] sm:$0xff]  }
  0x3e   :  { %7501 = vst [vmem:[#allocation28_spill] sm:$0xff] %v5407_v44  ;;  %1010 = vrot.lane.b32.xlu0 %v5407_v44, %s5031_s24  ;;  %v5414_v12 = vsel %vm5060_vm3, 0, %v378_v52  ;;  %v385_v7 = vor.u32 %v383_v11, %v382_v0  ;;  %v5418_v45 = vsel %vm5060_vm3, %v382_v0, 0  ;;  %v390_v38 = vshll.u32 %v5013_v31, 16 }
  0x3f   :  { %7502 = vst [vmem:[#allocation29_spill] sm:$0xff] %v5418_v45  ;;  %v816_v27 = vor.u32 %v815_v23, %v811_v37  ;;  %v823_v55 = vshrl.u32 %v5414_v12, 16  ;;  %v825_v49 = vshll.u32 %v5414_v12, 16  ;;  %v832_v19 = vrot.slane %v830_v58, 1  ;;  %v5015_v37 = vld [vmem:[%s7344_s0 + $0xb0] sm:$0xff]  }
  0x40   :  { %v5427_v54 = vsel %vm5060_vm3, 0, %v385_v7  ;;  %v842_v11 = vshll.u32 %v5418_v45, 16  ;;  %v392_v52 = vor.u32 %v390_v38, %v389_v9  ;;  %v5432_v31 = vsel %vm5060_vm3, %v389_v9, 0 }
  0x41   :  { %7503 = vst [vmem:[#allocation30_spill] sm:$0xff] %v5427_v54  ;;  %7504 = vst [vmem:[#allocation31_spill] sm:$0xff] %v5432_v31  ;;  %v5438_v0 = vsel %vm605_vm2, %v816_v27, %v820_v30  ;;  %v827_v23 = vrot.slane %v825_v49, 1  ;;  %v835_v58 = vshrl.u32 %v5427_v54, 16  ;;  %v837_v7 = vshll.u32 %v5427_v54, 16  ;;  %v5016_v30 = vld [vmem:[%s7344_s0 + $0xb8] sm:$0xff]  }
  0x42   :  { %7505 = vst [vmem:[#allocation32_spill] sm:$0xff] %v5438_v0  ;;  %1012 = vrot.lane.b32.xlu1 %v5438_v0, %s5031_s24  ;;  %v844_v38 = vrot.slane %v842_v11, 1  ;;  %v5446_v9 = vsel %vm5060_vm3, 0, %v392_v52  ;;  %v854_v42 = vshll.u32 %v5432_v31, 16  ;;  %v394_v17 = vshrl.u32 %v5014_v16, 16 }
  0x43   :  { %7506 = vst [vmem:[#allocation33_spill] sm:$0xff] %v5446_v9  ;;  %v828_v27 = vor.u32 %v827_v23, %v823_v55  ;;  %v839_v49 = vrot.slane %v837_v7, 1  ;;  %v847_v50 = vshrl.u32 %v5446_v9, 16  ;;  %v849_v8 = vshll.u32 %v5446_v9, 16 }
  0x44   :  { %v856_v61 = vrot.slane %v854_v42, 1  ;;  %v396_v0 = vrot.slane %v394_v17, 7  ;;  %v397_v11 = vshll.u32 %v5014_v16, 16  ;;  %v401_v44 = vshrl.u32 %v5015_v37, 16 }
  0x45   :  { %v5455_v52 = vsel %vm605_vm2, %v828_v27, %v832_v19  ;;  %v840_v1 = vor.u32 %v839_v49, %v835_v58  ;;  %v851_v31 = vrot.slane %v849_v8, 1  ;;  %v404_v45 = vshll.u32 %v5015_v37, 16 }
  0x46   :  { %7507 = vst [vmem:[#allocation34_spill] sm:$0xff] %v5455_v52  ;;  %1014 = vrot.lane.b32.xlu0 %v5455_v52, %s5031_s24  ;;  %v399_v54 = vor.u32 %v397_v11, %v396_v0  ;;  %v5461_v55 = vsel %vm5060_vm3, %v396_v0, 0  ;;  %v403_v23 = vrot.slane %v401_v44, 7  ;;  %v408_v7 = vshrl.u32 %v5016_v30, 16 }
  0x47   :  { %7508 = vst [vmem:[#allocation35_spill] sm:$0xff] %v5461_v55  ;;  %v5464_v17 = vsel %vm605_vm2, %v840_v1, %v844_v38  ;;  %v852_v42 = vor.u32 %v851_v31, %v847_v50  ;;  %v866_v16 = vshll.u32 %v5461_v55, 16  ;;  %v411_v19 = vshll.u32 %v5016_v30, 16  ;;  %v5017_v1 = vld [vmem:[%s7344_s0 + $0xc0] sm:$0xff]  }
  0x48   :  { %7509 = vst [vmem:[#allocation36_spill] sm:$0xff] %v5464_v17  ;;  %1016 = vrot.lane.b32.xlu1 %v5464_v17, %s5031_s24  ;;  %v5471_v8 = vsel %vm5060_vm3, 0, %v399_v54  ;;  %v406_v37 = vor.u32 %v404_v45, %v403_v23  ;;  %v5475_v0 = vsel %vm5060_vm3, %v403_v23, 0  ;;  %v410_v44 = vrot.slane %v408_v7, 7 }
  0x49   :  { %7510 = vst [vmem:[#allocation37_spill] sm:$0xff] %v5471_v8  ;;  %7511 = vst [vmem:[#allocation38_spill] sm:$0xff] %v5475_v0  ;;  %v5481_v50 = vsel %vm605_vm2, %v852_v42, %v856_v61  ;;  %v859_v31 = vshrl.u32 %v5471_v8, 16  ;;  %v861_v58 = vshll.u32 %v5471_v8, 16  ;;  %v868_v38 = vrot.slane %v866_v16, 1  ;;  %v5018_v61 = vld [vmem:[%s7344_s0 + $0xc8] sm:$0xff]  }
  0x4a   :  { %7512 = vst [vmem:[#allocation39_spill] sm:$0xff] %v5481_v50  ;;  %1018 = vrot.lane.b32.xlu0 %v5481_v50, %s5031_s24  ;;  %v5489_v45 = vsel %vm5060_vm3, 0, %v406_v37  ;;  %v878_v54 = vshll.u32 %v5475_v0, 16  ;;  %v413_v30 = vor.u32 %v411_v19, %v410_v44  ;;  %v5494_v27 = vsel %vm5060_vm3, %v410_v44, 0  ;;  %v5019_v42 = vld [vmem:[%s7344_s0 + $0xd0] sm:$0xff]  }
  0x4b   :  { %7513 = vst [vmem:[#allocation40_spill] sm:$0xff] %v5489_v45  ;;  %7514 = vst [vmem:[#allocation41_spill] sm:$0xff] %v5494_v27  ;;  %v863_v49 = vrot.slane %v861_v58, 1  ;;  %v871_v11 = vshrl.u32 %v5489_v45, 16  ;;  %v873_v23 = vshll.u32 %v5489_v45, 16  ;;  %v890_v7 = vshll.u32 %v5494_v27, 16 }
  0x4c   :  { %v880_v16 = vrot.slane %v878_v54, 1  ;;  %v5507_v19 = vsel %vm5060_vm3, 0, %v413_v30  ;;  %v415_v37 = vshrl.u32 %v5017_v1, 16  ;;  %v418_v44 = vshll.u32 %v5017_v1, 16  ;;  %v5020_v54 = vld [vmem:[%s7344_s0 + $0xd8] sm:$0xff]  }
  0x4d   :  { %v864_v50 = vor.u32 %v863_v49, %v859_v31  ;;  %v875_v17 = vrot.slane %v873_v23, 1  ;;  %v883_v58 = vshrl.u32 %v5507_v19, 16  ;;  %v885_v52 = vshll.u32 %v5507_v19, 16 }
  0x4e   :  { %v892_v0 = vrot.slane %v890_v7, 1  ;;  %v417_v45 = vrot.slane %v415_v37, 7  ;;  %v422_v27 = vshrl.u32 %v5018_v61, 16  ;;  %v425_v55 = vshll.u32 %v5018_v61, 16 }
  0x4f   :  { %v5515_v8 = vsel %vm605_vm2, %v864_v50, %v868_v38  ;;  %v876_v30 = vor.u32 %v875_v17, %v871_v11  ;;  %v887_v9 = vrot.slane %v885_v52, 1  ;;  %v429_v1 = vshrl.u32 %v5019_v42, 16 }
  0x50   :  { %7515 = vst [vmem:[#allocation42_spill] sm:$0xff] %v5515_v8  ;;  %1020 = vrot.lane.b32.xlu1 %v5515_v8, %s5031_s24  ;;  %v420_v31 = vor.u32 %v418_v44, %v417_v45  ;;  %v5521_v49 = vsel %vm5060_vm3, %v417_v45, 0  ;;  %v424_v23 = vrot.slane %v422_v27, 7  ;;  %v432_v61 = vshll.u32 %v5019_v42, 16 }
  0x51   :  { %7516 = vst [vmem:[#allocation43_spill] sm:$0xff] %v5521_v49  ;;  %v5524_v7 = vsel %vm605_vm2, %v876_v30, %v880_v16  ;;  %v888_v37 = vor.u32 %v887_v9, %v883_v58  ;;  %v902_v50 = vshll.u32 %v5521_v49, 16  ;;  %v431_v38 = vrot.slane %v429_v1, 7 }
  0x52   :  { %7517 = vst [vmem:[#allocation44_spill] sm:$0xff] %v5524_v7  ;;  %1022 = vrot.lane.b32.xlu0 %v5524_v7, %s5031_s24  ;;  %v5531_v52 = vsel %vm5060_vm3, 0, %v420_v31  ;;  %v427_v17 = vor.u32 %v425_v55, %v424_v23  ;;  %v5535_v45 = vsel %vm5060_vm3, %v424_v23, 0  ;;  %v436_v27 = vshrl.u32 %v5020_v54, 16 }
  0x53   :  { %7518 = vst [vmem:[#allocation45_spill] sm:$0xff] %v5531_v52  ;;  %7519 = vst [vmem:[#allocation46_spill] sm:$0xff] %v5535_v45  ;;  %v5538_v11 = vsel %vm605_vm2, %v888_v37, %v892_v0  ;;  %v895_v9 = vshrl.u32 %v5531_v52, 16  ;;  %v897_v42 = vshll.u32 %v5531_v52, 16  ;;  %v904_v16 = vrot.slane %v902_v50, 1  ;;  %v5021_v0 = vld [vmem:[%s7344_s0 + $0xe0] sm:$0xff]  }
  0x54   :  { %7520 = vst [vmem:[#allocation47_spill] sm:$0xff] %v5538_v11  ;;  %1024 = vrot.lane.b32.xlu1 %v5538_v11, %s5031_s24  ;;  %v5546_v44 = vsel %vm5060_vm3, 0, %v427_v17  ;;  %v914_v55 = vshll.u32 %v5535_v45, 16  ;;  %v434_v58 = vor.u32 %v432_v61, %v431_v38  ;;  %v5551_v30 = vsel %vm5060_vm3, %v431_v38, 0  ;;  %v5022_v38 = vld [vmem:[%s7344_s0 + $0xe8] sm:$0xff]  }
  0x55   :  { %7521 = vst [vmem:[#allocation48_spill] sm:$0xff] %v5546_v44  ;;  %7522 = vst [vmem:[#allocation49_spill] sm:$0xff] %v5551_v30  ;;  %v899_v1 = vrot.slane %v897_v42, 1  ;;  %v907_v31 = vshrl.u32 %v5546_v44, 16  ;;  %v909_v23 = vshll.u32 %v5546_v44, 16  ;;  %v926_v37 = vshll.u32 %v5551_v30, 16 }
  0x56   :  { %v916_v50 = vrot.slane %v914_v55, 1  ;;  %v5561_v17 = vsel %vm5060_vm3, 0, %v434_v58  ;;  %v438_v61 = vrot.slane %v436_v27, 7  ;;  %v439_v11 = vshll.u32 %v5020_v54, 16 }
  0x57   :  { %v900_v7 = vor.u32 %v899_v1, %v895_v9  ;;  %v911_v8 = vrot.slane %v909_v23, 1  ;;  %v919_v42 = vshrl.u32 %v5561_v17, 16  ;;  %v921_v45 = vshll.u32 %v5561_v17, 16 }
  0x58   :  { %v928_v44 = vrot.slane %v926_v37, 1  ;;  %v441_v49 = vor.u32 %v439_v11, %v438_v61  ;;  %v5570_v55 = vsel %vm5060_vm3, %v438_v61, 0  ;;  %v443_v58 = vshrl.u32 %v5021_v0, 16  ;;  %v5023_v37 = vld [vmem:[%s7344_s0 + $0xf0] sm:$0xff]  }
  0x59   :  { %v5573_v27 = vsel %vm605_vm2, %v900_v7, %v904_v16  ;;  %v912_v54 = vor.u32 %v911_v8, %v907_v31  ;;  %v923_v30 = vrot.slane %v921_v45, 1  ;;  %v938_v52 = vshll.u32 %v5570_v55, 16 }
  0x5a   :  { %7523 = vst [vmem:[#allocation50_spill] sm:$0xff] %v5573_v27  ;;  %1026 = vrot.lane.b32.xlu0 %v5573_v27, %s5031_s24  ;;  %v5580_v9 = vsel %vm5060_vm3, 0, %v441_v49  ;;  %v445_v11 = vrot.slane %v443_v58, 7  ;;  %v446_v1 = vshll.u32 %v5021_v0, 16  ;;  %v450_v23 = vshrl.u32 %v5022_v38, 16 }
  0x5b   :  { %v5586_v7 = vsel %vm605_vm2, %v912_v54, %v916_v50  ;;  %v924_v8 = vor.u32 %v923_v30, %v919_v42  ;;  %v931_v45 = vshrl.u32 %v5580_v9, 16  ;;  %v933_v16 = vshll.u32 %v5580_v9, 16 }
  0x5c   :  { %7524 = vst [vmem:[#allocation51_spill] sm:$0xff] %v5586_v7  ;;  %1028 = vrot.lane.b32.xlu1 %v5586_v7, %s5031_s24  ;;  %v940_v49 = vrot.slane %v938_v52, 1  ;;  %v448_v31 = vor.u32 %v446_v1, %v445_v11  ;;  %v5594_v0 = vsel %vm5060_vm3, %v445_v11, 0  ;;  %v452_v61 = vrot.slane %v450_v23, 7 }
  0x5d   :  { %v5597_v58 = vsel %vm605_vm2, %v924_v8, %v928_v44  ;;  %v935_v50 = vrot.slane %v933_v16, 1  ;;  %v950_v30 = vshll.u32 %v5594_v0, 16  ;;  %v453_v42 = vshll.u32 %v5022_v38, 16 }
  0x5e   :  { %7525 = vst [vmem:[#allocation52_spill] sm:$0xff] %v5597_v58  ;;  %1030 = vrot.lane.b32.xlu0 %v5597_v58, %s5031_s24  ;;  %v5604_v54 = vsel %vm5060_vm3, 0, %v448_v31  ;;  %v5608_v52 = vsel %vm5060_vm3, %v452_v61, 0  ;;  %v457_v11 = vshrl.u32 %v5023_v37, 16  ;;  %v460_v1 = vshll.u32 %v5023_v37, 16 }
  0x5f   :  { %7526 = vst [vmem:[#allocation53_spill] sm:$0xff] %v5604_v54  ;;  %v936_v23 = vor.u32 %v935_v50, %v931_v45  ;;  %v943_v44 = vshrl.u32 %v5604_v54, 16  ;;  %v945_v8 = vshll.u32 %v5604_v54, 16  ;;  %v455_v16 = vor.u32 %v453_v42, %v452_v61 }
  0x60   :  { %v962_v38 = vshll.u32 %v5608_v52, 16  ;;  %v459_v7 = vrot.slane %v457_v11, 7  ;;  %v952_v27 = vrot.slane %v950_v30, 1  ;;  %v1104_v2 = vrot.slane %v5073_v5, 1 }
  0x61   :  { %v5614_v58 = vsel %vm605_vm2, %v936_v23, %v940_v49  ;;  %v947_v31 = vrot.slane %v945_v8, 1  ;;  %v5620_v37 = vsel %vm5060_vm3, 0, %v455_v16  ;;  %v1109_v5 = vrot.slane %v5104_v32, 1 }
  0x62   :  { %7527 = vst [vmem:[#allocation54_spill] sm:$0xff] %v5614_v58  ;;  %1032 = vrot.lane.b32.xlu1 %v5614_v58, %s5031_s24  ;;  %7528 = vst [vmem:[#allocation55_spill] sm:$0xff] %v5620_v37  ;;  %v462_v45 = vor.u32 %v460_v1, %v459_v7  ;;  %v5624_v50 = vsel %vm5060_vm3, %v459_v7, 0  ;;  %v955_v42 = vshrl.u32 %v5620_v37, 16  ;;  %v957_v49 = vshll.u32 %v5620_v37, 16 }
  0x63   :  { %v948_v61 = vor.u32 %v947_v31, %v943_v44  ;;  %v974_v11 = vshll.u32 %v5624_v50, 16  ;;  %v964_v30 = vrot.slane %v962_v38, 1  ;;  %v1103_v44 = vrot.slane %v5069_v4, 1 }
  0x64   :  { %v5631_v23 = vsel %vm5060_vm3, 0, %v462_v45  ;;  %v959_v1 = vrot.slane %v957_v49, 1  ;;  %v1107_v49 = vrot.slane %v5097_v29, 1  ;;  %v1112_v29 = vrot.slane %v5126_v43, 1 }
  0x65   :  { %7529 = vst [vmem:[#allocation56_spill] sm:$0xff] %v5631_v23  ;;  %v5634_v8 = vsel %vm605_vm2, %v948_v61, %v952_v27  ;;  %v967_v16 = vshrl.u32 %v5631_v23, 16  ;;  %v969_v7 = vshll.u32 %v5631_v23, 16  ;;  %v976_v38 = vrot.slane %v974_v11, 1 }
  0x66   :  { %7530 = vst [vmem:[#allocation57_spill] sm:$0xff] %v5634_v8  ;;  %1034 = vrot.lane.b32.xlu0 %v5634_v8, %s5031_s24  ;;  %v960_v31 = vor.u32 %v959_v1, %v955_v42  ;;  %v1106_v61 = vrot.slane %v5120_v39, 1  ;;  %v5653_v42 = vsel %vm1102_vm4, %v1103_v44, %v1104_v2  ;;  %v1110_v11 = vrot.slane %v5086_v24, 1 }
  0x67   :  { %v971_v58 = vrot.slane %v969_v7, 1  ;;  %7533 = vst [vmem:[#allocation60_spill] sm:$0xff] %v5653_v42  ;;  %v1115_v1 = vrot.slane %v5161_v13, 1  ;;  %v1116_v24 = vrot.slane %v5144_v6, 1  ;;  %v1118_v7 = vrot.slane %v5165_v14, 1 }
  0x68   :  { %v5643_v45 = vsel %vm605_vm2, %v960_v31, %v964_v30  ;;  %v1113_v30 = vrot.slane %v5109_v34, 1  ;;  %v5667_v2 = vsel %vm1102_vm4, %v1109_v5, %v1110_v11  ;;  %v1119_v34 = vrot.slane %v5154_v10, 1 }
  0x69   :  { %7531 = vst [vmem:[#allocation58_spill] sm:$0xff] %v5643_v45  ;;  %v972_v27 = vor.u32 %v971_v58, %v967_v16  ;;  %1036 = vrot.lane.b32.xlu1 %v5643_v45, %s5031_s24  ;;  %v5660_v58 = vsel %vm1102_vm4, %v1106_v61, %v1107_v49  ;;  %v5681_v44 = vsel %vm1102_vm4, %v1115_v1, %v1116_v24  ;;  %v1121_v31 = vrot.slane %v5188_v36, 1  ;;  %v7549_v45 = vld [vmem:[#allocation38_spill] sm:$0xff] }
  0x6a   :  { %v5674_v16 = vsel %vm1102_vm4, %v1112_v29, %v1113_v30  ;;  %v1122_v6 = vrot.slane %v5176_v25, 1  ;;  %v1125_v10 = vrot.slane %v5184_v33, 1  ;;  %v1127_v49 = vrot.slane %v5225_v15, 1 }
  0x6b   :  { %v5650_v8 = vsel %vm605_vm2, %v972_v27, %v976_v38  ;;  %v5688_v38 = vsel %vm1102_vm4, %v1118_v7, %v1119_v34  ;;  %v1124_v27 = vrot.slane %v5209_v56, 1  ;;  %v1128_v25 = vrot.slane %v5213_v57, 1 }
  0x6c   :  { %7532 = vst [vmem:[#allocation59_spill] sm:$0xff] %v5650_v8  ;;  %1038 = vrot.lane.b32.xlu0 %v5650_v8, %s5031_s24  ;;  %v5695_v61 = vsel %vm1102_vm4, %v1121_v31, %v1122_v6  ;;  %v1130_v11 = vrot.slane %v5237_v28, 1  ;;  %v1131_v33 = vrot.slane %v5233_v22, 1  ;;  %v1133_v30 = vrot.slane %v5259_v51, 1  ;;  %s5033_s24 = smov 12  }
  0x6d   :  { %1196 = vrot.lane.b32.xlu1 %v5653_v42, %s5032_s20  ;;  %v5702_v5 = vsel %vm1102_vm4, %v1124_v27, %v1125_v10  ;;  %v5709_v29 = vsel %vm1102_vm4, %v1127_v49, %v1128_v25  ;;  %v1134_v57 = vrot.slane %v5255_v47, 1  ;;  %v1136_v24 = vrot.slane %v5273_v60, 1  ;;  %v7544_v42 = vld [vmem:[#allocation31_spill] sm:$0xff] }
  0x6e   :  { %v5716_v1 = vsel %vm1102_vm4, %v1130_v11, %v1131_v33  ;;  %v1137_v22 = vrot.slane %v5264_v53, 1  ;;  %v1139_v34 = vrot.slane %v5312_v62, 1  ;;  %v1140_v47 = vrot.slane %v5296_v46, 1 }
  0x6f   :  { %v5723_v7 = vsel %vm1102_vm4, %v1133_v30, %v1134_v57  ;;  %v1142_v6 = vrot.slane %v5326_v18, 1  ;;  %v1143_v53 = vrot.slane %v5306_v59, 1  ;;  %v1145_v10 = vrot.slane %v5332_v26, 1 }
  0x70   :  { %1198 = vrot.lane.b32.xlu0 %v5660_v58, %s5032_s20  ;;  %7534 = vst [vmem:[#allocation61_spill] sm:$0xff] %v5723_v7  ;;  %v5730_v31 = vsel %vm1102_vm4, %v1136_v24, %v1137_v22  ;;  %v5737_v27 = vsel %vm1102_vm4, %v1139_v34, %v1140_v47  ;;  %v1146_v46 = vrot.slane %v5317_v3, 1  ;;  %v1148_v59 = vrot.slane %v5358_v20, 1  ;;  %v7547_v20 = vld [vmem:[#allocation35_spill] sm:$0xff] }
  0x71   :  { %1200 = vrot.lane.b32.xlu1 %v5667_v2, %s5032_s20  ;;  %7535 = vst [vmem:[#allocation62_spill] sm:$0xff] %v5730_v31  ;;  %7536 = vst [vmem:[#allocation63_spill] sm:$0xff] %v5737_v27  ;;  %v5746_v25 = vsel %vm1102_vm4, %v1142_v6, %v1143_v53  ;;  %v1149_v11 = vrot.slane %v5342_v48, 1  ;;  %v1151_v3 = vrot.slane %v5373_v40, 1  ;;  %v1152_v30 = vrot.slane %v5362_v35, 1 }
  0x72   :  { %7537 = vst [vmem:[#allocation64_spill] sm:$0xff] %v5746_v25  ;;  %v5753_v33 = vsel %vm1102_vm4, %v1145_v10, %v1146_v46  ;;  %v1154_v48 = vrot.slane %v5393_v21, 1  ;;  %v1155_v22 = vrot.slane %v5388_v41, 1  ;;  %v1157_v35 = vrot.slane %v5414_v12, 1  ;;  %v7540_v10 = vld [vmem:[#allocation30_spill] sm:$0xff]  ;;  %v7541_v46 = vld [vmem:[#allocation29_spill] sm:$0xff] }
  0x73   :  { %7538 = vst [vmem:[#allocation65_spill] sm:$0xff] %v5753_v33  ;;  %v5762_v24 = vsel %vm1102_vm4, %v1148_v59, %v1149_v11  ;;  %v5771_v47 = vsel %vm1102_vm4, %v1151_v3, %v1152_v30  ;;  %v1158_v6 = vrot.slane %v5404_v63, 1  ;;  %v1160_v41 = vrot.slane %v7540_v10, 1  ;;  %v7543_v30 = vld [vmem:[#allocation33_spill] sm:$0xff] }
  0x74   :  { %1202 = vrot.lane.b32.xlu0 %v5674_v16, %s5032_s20  ;;  %7539 = vst [vmem:[#allocation66_spill] sm:$0xff] %v5762_v24  ;;  %v5778_v53 = vsel %vm1102_vm4, %v1154_v48, %v1155_v22  ;;  %v1161_v59 = vrot.slane %v7541_v46, 1  ;;  %v1163_v63 = vrot.slane %v7543_v30, 1  ;;  %v1164_v8 = vrot.slane %v7544_v42, 1  ;;  %v7546_v46 = vld [vmem:[#allocation37_spill] sm:$0xff] }
  0x75   :  { %1204 = vrot.lane.b32.xlu1 %v5681_v44, %s5032_s20  ;;  %v5787_v3 = vsel %vm1102_vm4, %v1157_v35, %v1158_v6  ;;  %v7548_v6 = vld [vmem:[#allocation40_spill] sm:$0xff]  ;;  %v1170_v26 = vrot.slane %v7549_v45, 1  ;;  %v7553_v45 = vld [vmem:[#allocation45_spill] sm:$0xff]  ;;  %vm2275_vm5 = vcmask 1041408   ;;  %vm1670_vm6 = vcmask 31744  }
  0x76   :  { %v5796_v22 = vsel %vm1102_vm4, %v1160_v41, %v1161_v59  ;;  %v5803_v35 = vsel %vm1102_vm4, %v1163_v63, %v1164_v8  ;;  %v1169_v42 = vrot.slane %v7548_v6, 1  ;;  %v7551_v59 = vld [vmem:[#allocation41_spill] sm:$0xff]  ;;  %vm1733_vm7 = vcmask 64512  }
  0x77   :  { %v1173_v18 = vrot.slane %v7551_v59, 1  ;;  %vm1796_vm8 = vcmask 97280   ;;  %vm1861_vm9 = vcmask 130048   ;;  %vm1926_vm10 = vcmask 162816  }
  0x78   :  { %1206 = vrot.lane.b32.xlu0 %v5688_v38, %s5032_s20  ;;  %v5821_v63 = vsel %vm1102_vm4, %v1169_v42, %v1170_v26  ;;  %v7558_v42 = vld [vmem:[#allocation49_spill] sm:$0xff]  ;;  %vm1991_vm11 = vcmask 195584   ;;  %vm2055_vm12 = vcmask 228352   ;;  %vm2119_vm13 = vcmask 261120  }
  0x79   :  { %1208 = vrot.lane.b32.xlu1 %v5695_v61, %s5032_s20  ;;  %vm2210_vm14 = vcmask 293888   ;;  %vm4520_vm15 = vcmask 1041409   ;;  %vm4522_vm0 = vcmask 1042434   ;;  %vm4524_vm1 = vcmask 1043459  }
  0x7c   :  { %1210 = vrot.lane.b32.xlu0 %v5702_v5, %s5032_s20 }
  0x7d   :  { %1212 = vrot.lane.b32.xlu1 %v5709_v29, %s5032_s20  ;;  %v5743_v49 = vpop.permute.xlu0 %978 }
  0x80   :  { %1214 = vrot.lane.b32.xlu0 %v5716_v1, %s5032_s20 }
  0x81   :  { %1216 = vrot.lane.b32.xlu1 %v5723_v7, %s5032_s20  ;;  %v1182_v7 = vrot.slane %v7558_v42, 1  ;;  %v1188_v42 = vrot.slane %v5594_v0, 1  ;;  %v1193_v0 = vrot.slane %v5631_v23, 1  ;;  %v7579_v23 = vld [vmem:[#allocation32_spill] sm:$0xff] }
  0x82   :  { %v5759_v57 = vpop.permute.xlu1 %982 }
  0x83   :  { %v5768_v34 = vpop.permute.xlu0 %980 }
  0x84   :  { %1218 = vrot.lane.b32.xlu0 %v5730_v31, %s5032_s20 }
  0x85   :  { %1220 = vrot.lane.b32.xlu1 %v5737_v27, %s5032_s20  ;;  %v1175_v27 = vrot.slane %v7553_v45, 1 }
  0x86   :  { %v5784_v11 = vpop.permute.xlu1 %984 }
  0x87   :  { %7542 = vst [vmem:[#allocation29_spill] sm:$0xff] %v5784_v11  ;;  %v1185_v11 = vrot.slane %v5570_v55, 1  ;;  %v1190_v55 = vrot.slane %v5620_v37, 1 }
  0x88   :  { %1222 = vrot.lane.b32.xlu0 %v5746_v25, %s5032_s20 }
  0x89   :  { %1224 = vrot.lane.b32.xlu1 %v5753_v33, %s5032_s20  ;;  %v1167_v33 = vrot.slane %v7547_v20, 1  ;;  %v1172_v20 = vrot.slane %v5507_v19, 1 }
  0x8c   :  { %1226 = vrot.lane.b32.xlu0 %v5762_v24, %s5032_s20  ;;  %v5793_v48 = vpop.permute.xlu0 %986  ;;  %v1166_v24 = vrot.slane %v7546_v46, 1 }
  0x8d   :  { %1228 = vrot.lane.b32.xlu1 %v5771_v47, %s5032_s20  ;;  %7545 = vst [vmem:[#allocation31_spill] sm:$0xff] %v5793_v48  ;;  %v5809_v25 = vpop.permute.xlu1 %988  ;;  %v7554_v48 = vld [vmem:[#allocation43_spill] sm:$0xff] }
  0x8e   :  { %7550 = vst [vmem:[#allocation35_spill] sm:$0xff] %v5809_v25  ;;  %v5812_v41 = vsel %vm1102_vm4, %v1166_v24, %v1167_v33  ;;  %v1176_v62 = vrot.slane %v7554_v48, 1  ;;  %v5828_v33 = vsel %vm1102_vm4, %v1172_v20, %v1173_v18  ;;  %v7555_v24 = vld [vmem:[#allocation48_spill] sm:$0xff]  ;;  %v7556_v25 = vld [vmem:[#allocation46_spill] sm:$0xff]  ;;  %v1181_v48 = vrot.slane %v5561_v17, 1 }
  0x8f   :  { %v1178_v59 = vrot.slane %v7555_v24, 1  ;;  %v1179_v31 = vrot.slane %v7556_v25, 1  ;;  %v1184_v25 = vrot.slane %v5580_v9, 1 }
  0x90   :  { %1230 = vrot.lane.b32.xlu0 %v5778_v53, %s5032_s20  ;;  %v5818_v8 = vpop.permute.xlu0 %990  ;;  %v5837_v26 = vsel %vm1102_vm4, %v1175_v27, %v1176_v62  ;;  %v5853_v62 = vsel %vm1102_vm4, %v1181_v48, %v1182_v7  ;;  %v1187_v27 = vrot.slane %v5604_v54, 1 }
  0x91   :  { %1232 = vrot.lane.b32.xlu1 %v5787_v3, %s5032_s20  ;;  %7552 = vst [vmem:[#allocation38_spill] sm:$0xff] %v5818_v8  ;;  %v5846_v20 = vsel %vm1102_vm4, %v1178_v59, %v1179_v31  ;;  %v5862_v31 = vsel %vm1102_vm4, %v1184_v25, %v1185_v11  ;;  %v1191_v59 = vrot.slane %v5608_v52, 1 }
  0x92   :  { %7561 = vst [vmem:[#allocation48_spill] sm:$0xff] %v5862_v31  ;;  %v5871_v48 = vsel %vm1102_vm4, %v1187_v27, %v1188_v42 }
  0x93   :  { %7563 = vst [vmem:[#allocation49_spill] sm:$0xff] %v5871_v48  ;;  %v5878_v11 = vsel %vm1102_vm4, %v1190_v55, %v1191_v59 }
  0x94   :  { %1234 = vrot.lane.b32.xlu0 %v5796_v22, %s5032_s20  ;;  %v5834_v8 = vpop.permute.xlu1 %992  ;;  %7564 = vst [vmem:[#allocation67_spill] sm:$0xff] %v5878_v11 }
  0x95   :  { %1236 = vrot.lane.b32.xlu1 %v5803_v35, %s5032_s20  ;;  %7557 = vst [vmem:[#allocation41_spill] sm:$0xff] %v5834_v8  ;;  %v1194_v8 = vrot.slane %v5624_v50, 1 }
  0x97   :  { %v5843_v18 = vpop.permute.xlu0 %994  ;;  %v5885_v25 = vsel %vm1102_vm4, %v1193_v0, %v1194_v8 }
  0x98   :  { %1238 = vrot.lane.b32.xlu0 %v5812_v41, %s5032_s20  ;;  %7559 = vst [vmem:[#allocation45_spill] sm:$0xff] %v5843_v18  ;;  %7566 = vst [vmem:[#allocation69_spill] sm:$0xff] %v5885_v25 }
  0x99   :  { %1240 = vrot.lane.b32.xlu1 %v5821_v63, %s5032_s20 }
  0x9a   :  { %v5859_v18 = vpop.permute.xlu1 %996 }
  0x9b   :  { %7560 = vst [vmem:[#allocation43_spill] sm:$0xff] %v5859_v18  ;;  %v7577_v18 = vld [vmem:[#allocation5_spill] sm:$0xff] }
  0x9c   :  { %1242 = vrot.lane.b32.xlu0 %v5828_v33, %s5032_s20 }
  0x9d   :  { %1244 = vrot.lane.b32.xlu1 %v5837_v26, %s5032_s20  ;;  %v5868_v7 = vpop.permute.xlu0 %998 }
  0x9e   :  { %7562 = vst [vmem:[#allocation46_spill] sm:$0xff] %v5868_v7  ;;  %v5882_v52 = vpop.permute.xlu1 %1000  ;;  %v7576_v7 = vld [vmem:[#allocation28_spill] sm:$0xff] }
  0x9f   :  { %7565 = vst [vmem:[#allocation68_spill] sm:$0xff] %v5882_v52 }
  0xa0   :  { %1246 = vrot.lane.b32.xlu0 %v5846_v20, %s5032_s20 }
  0xa1   :  { %1248 = vrot.lane.b32.xlu1 %v5853_v62, %s5032_s20 }
  0xa4   :  { %1250 = vrot.lane.b32.xlu0 %v5862_v31, %s5032_s20  ;;  %v7609_v31 = vld [vmem:[#allocation39_spill] sm:$0xff] }
  0xa5   :  { %1252 = vrot.lane.b32.xlu1 %v5871_v48, %s5032_s20  ;;  %v7598_v48 = vld [vmem:[#allocation36_spill] sm:$0xff] }
  0xa6   :  { %v5889_v27 = vpop.permute.xlu0 %1002 }
  0xa7   :  { %7567 = vst [vmem:[#allocation70_spill] sm:$0xff] %v5889_v27  ;;  %v5895_v50 = vpop.permute.xlu1 %1004  ;;  %v7574_v27 = vld [vmem:[#allocation6_spill] sm:$0xff] }
  0xa8   :  { %1254 = vrot.lane.b32.xlu0 %v5878_v11, %s5032_s20  ;;  %7568 = vst [vmem:[#allocation71_spill] sm:$0xff] %v5895_v50 }
  0xa9   :  { %1256 = vrot.lane.b32.xlu1 %v5885_v25, %s5032_s20 }
  0xaa   :  { %v5899_v42 = vpop.permute.xlu0 %1006 }
  0xab   :  { %7569 = vst [vmem:[#allocation72_spill] sm:$0xff] %v5899_v42 }
  0xac   :  { %1260 = vrot.lane.b32.xlu0 %v5120_v39, %s5033_s24 }
  0xad   :  { %1262 = vrot.lane.b32.xlu1 %v5104_v32, %s5033_s24 }
  0xae   :  { %v5905_v8 = vpop.permute.xlu1 %1008 }
  0xaf   :  { %7570 = vst [vmem:[#allocation73_spill] sm:$0xff] %v5905_v8 }
  0xb0   :  { %1264 = vrot.lane.b32.xlu0 %v5126_v43, %s5033_s24  ;;  %v5909_v55 = vpop.permute.xlu0 %1010 }
  0xb1   :  { %1266 = vrot.lane.b32.xlu1 %v5161_v13, %s5033_s24 }
  0xb4   :  { %1268 = vrot.lane.b32.xlu0 %v5165_v14, %s5033_s24  ;;  %v5915_v59 = vpop.permute.xlu1 %1012 }
  0xb5   :  { %1270 = vrot.lane.b32.xlu1 %v5188_v36, %s5033_s24 }
  0xb8   :  { %1272 = vrot.lane.b32.xlu0 %v5209_v56, %s5033_s24  ;;  %v5919_v0 = vpop.permute.xlu0 %1014 }
  0xb9   :  { %1274 = vrot.lane.b32.xlu1 %v5225_v15, %s5033_s24 }
  0xba   :  { %v5925_v8 = vpop.permute.xlu1 %1016 }
  0xbb   :  { %7571 = vst [vmem:[#allocation74_spill] sm:$0xff] %v5925_v8 }
  0xbc   :  { %1276 = vrot.lane.b32.xlu0 %v5237_v28, %s5033_s24  ;;  %v5929_v42 = vpop.permute.xlu0 %1018 }
  0xbd   :  { %1278 = vrot.lane.b32.xlu1 %v5259_v51, %s5033_s24  ;;  %7572 = vst [vmem:[#allocation75_spill] sm:$0xff] %v5929_v42 }
  0xc0   :  { %1280 = vrot.lane.b32.xlu0 %v5273_v60, %s5033_s24 }
  0xc1   :  { %1292 = vrot.lane.b32.xlu1 %v5373_v40, %s5033_s24 }
  0xc2   :  { %v5935_v50 = vpop.permute.xlu1 %1020 }
  0xc3   :  { %7573 = vst [vmem:[#allocation76_spill] sm:$0xff] %v5935_v50 }
  0xc4   :  { %1294 = vrot.lane.b32.xlu0 %v5393_v21, %s5033_s24  ;;  %v5939_v52 = vpop.permute.xlu0 %1022 }
  0xc5   :  { %1348 = vrot.lane.b32.xlu1 %v7574_v27, %s5034_s21  ;;  %7575 = vst [vmem:[#allocation6_spill] sm:$0xff] %v5939_v52 }
  0xc6   :  { %v5945_v25 = vpop.permute.xlu1 %1024 }
  0xc7   :  { %7578 = vst [vmem:[#allocation28_spill] sm:$0xff] %v5945_v25  ;;  %v5024_v25 = vld [vmem:[%s7345_s1] sm:$0xff]  }
  0xc8   :  { %1380 = vrot.lane.b32.xlu0 %v7576_v7, %s5034_s21  ;;  %4906 = vmatprep.subr.bf16.mxu0 %v5024_v25 }
  0xc9   :  { %1350 = vrot.lane.b32.xlu1 %v7577_v18, %s5034_s21  ;;  %4976 = vmatprep.subr.bf16.mxu1 %v5024_v25 }
  0xca   :  { %4907 = vmatpush3.bf16.msra.mxu0 %v5024_v25  ;;  %4979 = vmatpush3.bf16.msra.mxu1 %v5024_v25  ;;  %v5026_v25 = vld [vmem:[%s7345_s1 + $0x10] ss:$0 sps:$4 sm:$0x33]  }
  0xcc   :  { %1382 = vrot.lane.b32.xlu0 %v7579_v23, %s5034_s21  ;;  %v5949_v11 = vpop.permute.xlu0 %1026 }
  0xcd   :  { %7580 = vst [vmem:[#allocation5_spill] sm:$0xff] %v5949_v11  ;;  %1420 = vrot.lane.b32.xlu1 %v5660_v58, %s5035_s22 }
  0xce   :  { %v5955_v27 = vpop.permute.xlu1 %1028 }
  0xcf   :  { %7581 = vst [vmem:[#allocation32_spill] sm:$0xff] %v5955_v27  ;;  %v2277_v27 = vsel %vm2275_vm5, %v5026_v25, 0 }
  0xd0   :  { %1452 = vrot.lane.b32.xlu0 %v5771_v47, %s5035_s22  ;;  %v5959_v7 = vpop.permute.xlu0 %1030  ;;  %v5025_v47 = vld [vmem:[%s7345_s1 + $0x8] sm:$0xff]   ;;  %s5038_s1 = smov 32  }
  0xd1   :  { %1422 = vrot.lane.b32.xlu1 %v5667_v2, %s5035_s22  ;;  %7582 = vst [vmem:[#allocation77_spill] sm:$0xff] %v5959_v7  ;;  %4908 = vmatprep.subr.bf16.mxu0 %v5025_v47 }
  0xd2   :  { %4977 = vmatprep.subr.bf16.mxu1 %v5025_v47  ;;  %4909 = vmatpush3.bf16.msra.mxu0 %v5025_v47 }
  0xd3   :  { %4980 = vmatpush3.bf16.msra.mxu1 %v5025_v47  ;;  %4982 = vmatprep.subr.msk.bf16.mxu0 %vm2275_vm5, %v5026_v25 }
  0xd4   :  { %1454 = vrot.lane.b32.xlu0 %v5778_v53, %s5035_s22  ;;  %v5968_v58 = vpop.permute.xlu1 %1032  ;;  %4983 = vmatprep.subr.msk.bf16.mxu1 %vm2275_vm5, %v5026_v25  ;;  %v7588_v25 = vld [vmem:[#allocation34_spill] sm:$0xff]  ;;  %vm4532_vm5 = vcmask 1047559  }
  0xd5   :  { %1484 = vrot.lane.b32.xlu1 %v5104_v32, %s5036_s26  ;;  %7583 = vst [vmem:[#allocation78_spill] sm:$0xff] %v5968_v58 }
  0xd6   :  { %4911 = vmatpush3.bf16.msra.mxu0 %v2277_v27 }
  0xd7   :  { %4981 = vmatpush3.bf16.msra.mxu1 %v2277_v27 }
  0xd8   :  { %1516 = vrot.lane.b32.xlu0 %v5393_v21, %s5036_s26  ;;  %v5975_v7 = vpop.permute.xlu0 %1034 }
  0xd9   :  { %7584 = vst [vmem:[#allocation79_spill] sm:$0xff] %v5975_v7  ;;  %1486 = vrot.lane.b32.xlu1 %v5126_v43, %s5036_s26 }
  0xdb   :  { %v5984_v58 = vpop.permute.xlu1 %1036 }
  0xdc   :  { %1518 = vrot.lane.b32.xlu0 %v5414_v12, %s5036_s26  ;;  %7585 = vst [vmem:[#allocation80_spill] sm:$0xff] %v5984_v58  ;;  %v7587_v58 = vld [vmem:[#allocation7_spill] sm:$0xff] }
  0xdd   :  { %1546 = vrot.lane.b32.xlu1 %v7577_v18, %s5037_s4 }
  0xde   :  { %v5986_v7 = vpop.permute.xlu0 %1038 }
  0xdf   :  { %7586 = vst [vmem:[#allocation81_spill] sm:$0xff] %v5986_v7  ;;  %v5992_v47 = vpop.permute.xlu1 %1196 }
  0xe0   :  { %1578 = vrot.lane.b32.xlu0 %v7579_v23, %s5037_s4 }
  0xe1   :  { %1548 = vrot.lane.b32.xlu1 %v7587_v58, %s5037_s4 }
  0xe2   :  { %v5994_v11 = vpop.permute.xlu0 %1198 }
  0xe3   :  { %v6000_v52 = vpop.permute.xlu1 %1200 }
  0xe4   :  { %1580 = vrot.lane.b32.xlu0 %v7588_v25, %s5037_s4 }
  0xe5   :  { %1608 = vrot.lane.b32.xlu1 %v5667_v2, %s5038_s1 }
  0xe6   :  { %v6002_v7 = vpop.permute.xlu0 %1202 }
  0xe7   :  { %v6008_v23 = vpop.permute.xlu1 %1204 }
  0xe8   :  { %1640 = vrot.lane.b32.xlu0 %v5778_v53, %s5038_s1  ;;  %7589 = vst [vmem:[#allocation7_spill] sm:$0xff] %v6008_v23 }
  0xe9   :  { %1610 = vrot.lane.b32.xlu1 %v5674_v16, %s5038_s1 }
  0xea   :  { %v6010_v18 = vpop.permute.xlu0 %1206 }
  0xeb   :  { %7590 = vst [vmem:[#allocation34_spill] sm:$0xff] %v6010_v18  ;;  %v6016_v27 = vpop.permute.xlu1 %1208 }
  0xec   :  { %1642 = vrot.lane.b32.xlu0 %v5787_v3, %s5038_s1  ;;  %7591 = vst [vmem:[#allocation82_spill] sm:$0xff] %v6016_v27 }
  0xed   :  { %1296 = vrot.lane.b32.xlu1 %v5414_v12, %s5033_s24 }
  0xee   :  { %v6018_v50 = vpop.permute.xlu0 %1210 }
  0xef   :  { %7592 = vst [vmem:[#allocation83_spill] sm:$0xff] %v6018_v50  ;;  %v6024_v2 = vpop.permute.xlu1 %1212  ;;  %v7597_v50 = vld [vmem:[#allocation11_spill] sm:$0xff] }
  0xf0   :  { %1298 = vrot.lane.b32.xlu0 %v7540_v10, %s5033_s24  ;;  %7593 = vst [vmem:[#allocation84_spill] sm:$0xff] %v6024_v2 }
  0xf1   :  { %1352 = vrot.lane.b32.xlu1 %v7587_v58, %s5034_s21 }
  0xf2   :  { %v6026_v53 = vpop.permute.xlu0 %1214 }
  0xf3   :  { %7594 = vst [vmem:[#allocation85_spill] sm:$0xff] %v6026_v53  ;;  %v6032_v37 = vpop.permute.xlu1 %1216  ;;  %v7608_v53 = vld [vmem:[#allocation12_spill] sm:$0xff] }
  0xf4   :  { %1384 = vrot.lane.b32.xlu0 %v7588_v25, %s5034_s21  ;;  %7595 = vst [vmem:[#allocation86_spill] sm:$0xff] %v6032_v37 }
  0xf5   :  { %1354 = vrot.lane.b32.xlu1 %v7597_v50, %s5034_s21 }
  0xf6   :  { %v6034_v27 = vpop.permute.xlu0 %1218 }
  0xf7   :  { %7596 = vst [vmem:[#allocation87_spill] sm:$0xff] %v6034_v27  ;;  %v6040_v54 = vpop.permute.xlu1 %1220 }
  0xf8   :  { %1386 = vrot.lane.b32.xlu0 %v7598_v48, %s5034_s21  ;;  %7599 = vst [vmem:[#allocation11_spill] sm:$0xff] %v6040_v54 }
  0xf9   :  { %1424 = vrot.lane.b32.xlu1 %v5674_v16, %s5035_s22 }
  0xfa   :  { %v6042_v2 = vpop.permute.xlu0 %1222 }
  0xfb   :  { %7600 = vst [vmem:[#allocation36_spill] sm:$0xff] %v6042_v2  ;;  %v6048_v58 = vpop.permute.xlu1 %1224 }
  0xfc   :  { %1456 = vrot.lane.b32.xlu0 %v5787_v3, %s5035_s22  ;;  %7601 = vst [vmem:[#allocation88_spill] sm:$0xff] %v6048_v58 }
  0xfd   :  { %1426 = vrot.lane.b32.xlu1 %v5681_v44, %s5035_s22 }
  0xfe   :  { %v6050_v25 = vpop.permute.xlu0 %1226 }
  0xff   :  { %7602 = vst [vmem:[#allocation89_spill] sm:$0xff] %v6050_v25  ;;  %v6056_v27 = vpop.permute.xlu1 %1228 }
 0x100   :  { %1458 = vrot.lane.b32.xlu0 %v5796_v22, %s5035_s22 }
 0x101   :  { %1488 = vrot.lane.b32.xlu1 %v5161_v13, %s5036_s26 }
 0x102   :  { %v6058_v54 = vpop.permute.xlu0 %1230 }
 0x103   :  { %v6064_v16 = vpop.permute.xlu1 %1232 }
 0x104   :  { %1520 = vrot.lane.b32.xlu0 %v7540_v10, %s5036_s26  ;;  %v1672_v10 = vsel %vm1670_vm6, %v5069_v4, %v5743_v49  ;;  %v1674_v49 = vsel %vm1670_vm6, %v5120_v39, %v5768_v34  ;;  %v1704_v39 = vsel %vm1670_vm6, %v5373_v40, %v5909_v55 }
 0x105   :  { %1490 = vrot.lane.b32.xlu1 %v5165_v14, %s5036_s26 }
 0x106   :  { %v6066_v3 = vpop.permute.xlu0 %1234 }
 0x107   :  { %7603 = vst [vmem:[#allocation90_spill] sm:$0xff] %v6066_v3  ;;  %v6072_v25 = vpop.permute.xlu1 %1236  ;;  %v7628_v3 = vld [vmem:[#allocation16_spill] sm:$0xff] }
 0x108   :  { %1522 = vrot.lane.b32.xlu0 %v7543_v30, %s5036_s26  ;;  %7604 = vst [vmem:[#allocation91_spill] sm:$0xff] %v6072_v25 }
 0x109   :  { %1550 = vrot.lane.b32.xlu1 %v7597_v50, %s5037_s4 }
 0x10a   :  { %v6074_v58 = vpop.permute.xlu0 %1238 }
 0x10b   :  { %7605 = vst [vmem:[#allocation92_spill] sm:$0xff] %v6074_v58  ;;  %v6080_v2 = vpop.permute.xlu1 %1240 }
 0x10c   :  { %1582 = vrot.lane.b32.xlu0 %v7598_v48, %s5037_s4  ;;  %7606 = vst [vmem:[#allocation93_spill] sm:$0xff] %v6080_v2 }
 0x10d   :  { %1552 = vrot.lane.b32.xlu1 %v7608_v53, %s5037_s4 }
 0x10e   :  { %v6082_v37 = vpop.permute.xlu0 %1242 }
 0x10f   :  { %7607 = vst [vmem:[#allocation94_spill] sm:$0xff] %v6082_v37  ;;  %v6088_v42 = vpop.permute.xlu1 %1244 }
 0x110   :  { %1584 = vrot.lane.b32.xlu0 %v7609_v31, %s5037_s4  ;;  %7610 = vst [vmem:[#allocation12_spill] sm:$0xff] %v6088_v42 }
 0x111   :  { %1612 = vrot.lane.b32.xlu1 %v5681_v44, %s5038_s1 }
 0x112   :  { %v6090_v25 = vpop.permute.xlu0 %1246 }
 0x113   :  { %7611 = vst [vmem:[#allocation39_spill] sm:$0xff] %v6090_v25  ;;  %v6096_v48 = vpop.permute.xlu1 %1248 }
 0x114   :  { %1644 = vrot.lane.b32.xlu0 %v5796_v22, %s5038_s1  ;;  %7612 = vst [vmem:[#allocation95_spill] sm:$0xff] %v6096_v48  ;;  %v7618_v48 = vld [vmem:[#allocation42_spill] sm:$0xff] }
 0x115   :  { %1614 = vrot.lane.b32.xlu1 %v5688_v38, %s5038_s1 }
 0x116   :  { %v6098_v50 = vpop.permute.xlu0 %1250 }
 0x117   :  { %7613 = vst [vmem:[#allocation96_spill] sm:$0xff] %v6098_v50  ;;  %v6104_v37 = vpop.permute.xlu1 %1252 }
 0x118   :  { %1646 = vrot.lane.b32.xlu0 %v5803_v35, %s5038_s1  ;;  %7614 = vst [vmem:[#allocation97_spill] sm:$0xff] %v6104_v37 }
 0x119   :  { %1300 = vrot.lane.b32.xlu1 %v7543_v30, %s5033_s24 }
 0x11a   :  { %v6106_v42 = vpop.permute.xlu0 %1254 }
 0x11b   :  { %7615 = vst [vmem:[#allocation98_spill] sm:$0xff] %v6106_v42  ;;  %v6112_v44 = vpop.permute.xlu1 %1256  ;;  %v7617_v42 = vld [vmem:[#allocation14_spill] sm:$0xff] }
 0x11c   :  { %1302 = vrot.lane.b32.xlu0 %v7546_v46, %s5033_s24  ;;  %7616 = vst [vmem:[#allocation99_spill] sm:$0xff] %v6112_v44 }
 0x11d   :  { %1356 = vrot.lane.b32.xlu1 %v7608_v53, %s5034_s21 }
 0x11e   :  { %v1261_v22 = vpop.permute.xlu0 %1260 }
 0x11f   :  { %v6118_v50 = vpop.permute.xlu1 %1262 }
 0x120   :  { %1388 = vrot.lane.b32.xlu0 %v7609_v31, %s5034_s21 }
 0x121   :  { %1358 = vrot.lane.b32.xlu1 %v7617_v42, %s5034_s21 }
 0x122   :  { %v6120_v37 = vpop.permute.xlu0 %1264 }
 0x123   :  { %v6126_v25 = vpop.permute.xlu1 %1266 }
 0x124   :  { %1390 = vrot.lane.b32.xlu0 %v7618_v48, %s5034_s21 }
 0x125   :  { %1428 = vrot.lane.b32.xlu1 %v5688_v38, %s5035_s22 }
 0x126   :  { %v6128_v44 = vpop.permute.xlu0 %1268 }
 0x127   :  { %7619 = vst [vmem:[#allocation14_spill] sm:$0xff] %v6128_v44  ;;  %v6134_v31 = vpop.permute.xlu1 %1270 }
 0x128   :  { %1460 = vrot.lane.b32.xlu0 %v5803_v35, %s5035_s22  ;;  %7620 = vst [vmem:[#allocation42_spill] sm:$0xff] %v6134_v31 }
 0x129   :  { %1430 = vrot.lane.b32.xlu1 %v5695_v61, %s5035_s22 }
 0x12a   :  { %v6136_v53 = vpop.permute.xlu0 %1272 }
 0x12b   :  { %7621 = vst [vmem:[#allocation100_spill] sm:$0xff] %v6136_v53  ;;  %v6142_v2 = vpop.permute.xlu1 %1274 }
 0x12c   :  { %1462 = vrot.lane.b32.xlu0 %v5812_v41, %s5035_s22  ;;  %7622 = vst [vmem:[#allocation101_spill] sm:$0xff] %v6142_v2 }
 0x12d   :  { %1492 = vrot.lane.b32.xlu1 %v5188_v36, %s5036_s26 }
 0x12e   :  { %v6144_v58 = vpop.permute.xlu0 %1276 }
 0x12f   :  { %7623 = vst [vmem:[#allocation102_spill] sm:$0xff] %v6144_v58  ;;  %v6150_v38 = vpop.permute.xlu1 %1278 }
 0x130   :  { %1524 = vrot.lane.b32.xlu0 %v7546_v46, %s5036_s26  ;;  %7624 = vst [vmem:[#allocation103_spill] sm:$0xff] %v6150_v38  ;;  %v7626_v38 = vld [vmem:[#allocation15_spill] sm:$0xff] }
 0x131   :  { %1494 = vrot.lane.b32.xlu1 %v5209_v56, %s5036_s26 }
 0x132   :  { %v6152_v35 = vpop.permute.xlu0 %1280 }
 0x133   :  { %7625 = vst [vmem:[#allocation104_spill] sm:$0xff] %v6152_v35  ;;  %v1293_v53 = vpop.permute.xlu1 %1292  ;;  %v7627_v35 = vld [vmem:[#allocation44_spill] sm:$0xff] }
 0x134   :  { %1526 = vrot.lane.b32.xlu0 %v7548_v6, %s5036_s26 }
 0x135   :  { %1554 = vrot.lane.b32.xlu1 %v7617_v42, %s5037_s4 }
 0x136   :  { %v6158_v2 = vpop.permute.xlu0 %1294 }
 0x137   :  { %v1349_v58 = vpop.permute.xlu1 %1348 }
 0x138   :  { %1586 = vrot.lane.b32.xlu0 %v7618_v48, %s5037_s4 }
 0x139   :  { %1556 = vrot.lane.b32.xlu1 %v7626_v38, %s5037_s4 }
 0x13a   :  { %v1381_v46 = vpop.permute.xlu0 %1380 }
 0x13b   :  { %v1351_v56 = vpop.permute.xlu1 %1350 }
 0x13c   :  { %1588 = vrot.lane.b32.xlu0 %v7627_v35, %s5037_s4 }
 0x13d   :  { %1616 = vrot.lane.b32.xlu1 %v5695_v61, %s5038_s1 }
 0x13e   :  { %v1383_v36 = vpop.permute.xlu0 %1382 }
 0x13f   :  { %v1421_v42 = vpop.permute.xlu1 %1420 }
 0x140   :  { %1648 = vrot.lane.b32.xlu0 %v5812_v41, %s5038_s1 }
 0x141   :  { %1618 = vrot.lane.b32.xlu1 %v5702_v5, %s5038_s1 }
 0x142   :  { %v1453_v31 = vpop.permute.xlu0 %1452 }
 0x143   :  { %v1423_v48 = vpop.permute.xlu1 %1422 }
 0x144   :  { %1650 = vrot.lane.b32.xlu0 %v5821_v63, %s5038_s1 }
 0x145   :  { %1304 = vrot.lane.b32.xlu1 %v7548_v6, %s5033_s24  ;;  %v7629_v6 = vld [vmem:[#allocation47_spill] sm:$0xff] }
 0x146   :  { %v1455_v30 = vpop.permute.xlu0 %1454 }
 0x147   :  { %v1485_v61 = vpop.permute.xlu1 %1484 }
 0x148   :  { %1306 = vrot.lane.b32.xlu0 %v5507_v19, %s5033_s24 }
 0x149   :  { %1360 = vrot.lane.b32.xlu1 %v7626_v38, %s5034_s21 }
 0x14a   :  { %v1517_v18 = vpop.permute.xlu0 %1516 }
 0x14b   :  { %v1487_v41 = vpop.permute.xlu1 %1486 }
 0x14c   :  { %1392 = vrot.lane.b32.xlu0 %v7627_v35, %s5034_s21  ;;  %v1735_v35 = vsel %vm1733_vm7, %v1672_v10, %v5992_v47 }
 0x14d   :  { %1362 = vrot.lane.b32.xlu1 %v7628_v3, %s5034_s21  ;;  %v1798_v8 = vsel %vm1796_vm8, %v1735_v35, %v1261_v22 }
 0x14e   :  { %v1519_v14 = vpop.permute.xlu0 %1518  ;;  %v1863_v13 = vsel %vm1861_vm9, %v1798_v8, %v1349_v58 }
 0x14f   :  { %v1547_v44 = vpop.permute.xlu1 %1546  ;;  %v1928_v4 = vsel %vm1926_vm10, %v1863_v13, %v1421_v42 }
 0x150   :  { %1394 = vrot.lane.b32.xlu0 %v7629_v6, %s5034_s21  ;;  %v1993_v8 = vsel %vm1991_vm11, %v1928_v4, %v1485_v61 }
 0x151   :  { %1432 = vrot.lane.b32.xlu1 %v5702_v5, %s5035_s22  ;;  %v1830_v5 = vsel %vm1796_vm8, %v1735_v35, %v1293_v53  ;;  %v2057_v58 = vsel %vm2055_vm12, %v1993_v8, %v1547_v44 }
 0x152   :  { %v1579_v38 = vpop.permute.xlu0 %1578  ;;  %v1895_v47 = vsel %vm1861_vm9, %v1830_v5, %v1381_v46  ;;  %v1767_v46 = vsel %vm1733_vm7, %v1704_v39, %v6056_v27  ;;  %v7631_v5 = vld [vmem:[#allocation50_spill] sm:$0xff] }
 0x153   :  { %v1549_v23 = vpop.permute.xlu1 %1548  ;;  %v1960_v34 = vsel %vm1926_vm10, %v1895_v47, %v1453_v31  ;;  %v1832_v55 = vsel %vm1796_vm8, %v1767_v46, %v6158_v2  ;;  %v1676_v46 = vsel %vm1670_vm6, %v5104_v32, %v5759_v57 }
 0x154   :  { %1464 = vrot.lane.b32.xlu0 %v5821_v63, %s5035_s22  ;;  %v1737_v63 = vsel %vm1733_vm7, %v1674_v49, %v5994_v11  ;;  %v2025_v22 = vsel %vm1991_vm11, %v1960_v34, %v1517_v18  ;;  %v1897_v27 = vsel %vm1861_vm9, %v1832_v55, %v1383_v36  ;;  %v7630_v49 = vld [vmem:[#allocation17_spill] sm:$0xff]  ;;  %v7632_v34 = vld [vmem:[#allocation18_spill] sm:$0xff] }
 0x155   :  { %1434 = vrot.lane.b32.xlu1 %v5709_v29, %s5035_s22  ;;  %v1800_v13 = vsel %vm1796_vm8, %v1737_v63, %v6118_v50  ;;  %v2089_v44 = vsel %vm2055_vm12, %v2025_v22, %v1579_v38  ;;  %v1962_v53 = vsel %vm1926_vm10, %v1897_v27, %v1455_v30  ;;  %v1739_v22 = vsel %vm1733_vm7, %v1676_v46, %v6000_v52 }
 0x156   :  { %v1581_v10 = vpop.permute.xlu0 %1580  ;;  %v1865_v4 = vsel %vm1861_vm9, %v1800_v13, %v1351_v56  ;;  %v1802_v55 = vsel %vm1796_vm8, %v1739_v22, %v6120_v37  ;;  %v7635_v37 = vld [vmem:[#allocation61_spill] sm:$0xff]  ;;  %v1708_v27 = vsel %vm1670_vm6, %v5414_v12, %v5919_v0 }
 0x157   :  { %v1609_v11 = vpop.permute.xlu1 %1608  ;;  %v1930_v50 = vsel %vm1926_vm10, %v1865_v4, %v1423_v48  ;;  %v2027_v48 = vsel %vm1991_vm11, %v1962_v53, %v1519_v14 }
 0x158   :  { %1466 = vrot.lane.b32.xlu0 %v5828_v33, %s5035_s22  ;;  %v2121_v40 = vsel %vm2119_vm13, %v2057_v58, %v1609_v11  ;;  %v1995_v56 = vsel %vm1991_vm11, %v1930_v50, %v1487_v41  ;;  %v2091_v36 = vsel %vm2055_vm12, %v2027_v48, %v1581_v10  ;;  %v7633_v58 = vld [vmem:[#allocation51_spill] sm:$0xff] }
 0x159   :  { %1496 = vrot.lane.b32.xlu1 %v5225_v15, %s5036_s26  ;;  %4912 = vmatprep.mubr.msk.bf16.mxu0 %vm2210_vm14, %v2121_v40  ;;  %v2059_v2 = vsel %vm2055_vm12, %v1995_v56, %v1549_v23  ;;  %v1706_v40 = vsel %vm1670_vm6, %v5393_v21, %v5915_v59 }
 0x15a   :  { %v1641_v31 = vpop.permute.xlu0 %1640  ;;  %v1769_v32 = vsel %vm1733_vm7, %v1706_v40, %v6058_v54 }
 0x15b   :  { %v2153_v18 = vsel %vm2119_vm13, %v2089_v44, %v1641_v31  ;;  %v1611_v42 = vpop.permute.xlu1 %1610 }
 0x15c   :  { %1528 = vrot.lane.b32.xlu0 %v5507_v19, %s5036_s26  ;;  %4944 = vmatprep.mubr.msk.bf16.mxu1 %vm2210_vm14, %v2153_v18  ;;  %v2123_v61 = vsel %vm2119_vm13, %v2059_v2, %v1611_v42 }
 0x15d   :  { %1498 = vrot.lane.b32.xlu1 %v5237_v28, %s5036_s26  ;;  %4913 = vmatmul.mubr.msk.bf16.vlgmr.msra.gmra.mrb[0].mxu0 %vm2210_vm14, %v2123_v61 }
 0x15e   :  { %v1643_v38 = vpop.permute.xlu0 %1642 }
 0x15f   :  { %v2155_v30 = vsel %vm2119_vm13, %v2091_v36, %v1643_v38  ;;  %v1297_v23 = vpop.permute.xlu1 %1296 }
 0x160   :  { %1530 = vrot.lane.b32.xlu0 %v7553_v45, %s5036_s26  ;;  %4945 = vmatmul.mubr.msk.bf16.vlgmr.msra.gmra.mrb[0].mxu1 %vm2210_vm14, %v2155_v30  ;;  %v1834_v44 = vsel %vm1796_vm8, %v1769_v32, %v1297_v23 }
 0x161   :  { %1558 = vrot.lane.b32.xlu1 %v7628_v3, %s5037_s4 }
 0x162   :  { %v1299_v41 = vpop.permute.xlu0 %1298 }
 0x163   :  { %v1353_v14 = vpop.permute.xlu1 %1352 }
 0x164   :  { %1590 = vrot.lane.b32.xlu0 %v7629_v6, %s5037_s4  ;;  %v1867_v57 = vsel %vm1861_vm9, %v1802_v55, %v1353_v14 }
 0x165   :  { %1560 = vrot.lane.b32.xlu1 %v7630_v49, %s5037_s4 }
 0x166   :  { %v1385_v35 = vpop.permute.xlu0 %1384 }
 0x167   :  { %v1355_v10 = vpop.permute.xlu1 %1354  ;;  %v1899_v31 = vsel %vm1861_vm9, %v1834_v44, %v1385_v35 }
 0x168   :  { %1592 = vrot.lane.b32.xlu0 %v7631_v5, %s5037_s4 }
 0x169   :  { %1620 = vrot.lane.b32.xlu1 %v5709_v29, %s5038_s1 }
 0x16a   :  { %v1387_v63 = vpop.permute.xlu0 %1386 }
 0x16b   :  { %v1425_v3 = vpop.permute.xlu1 %1424 }
 0x16c   :  { %1652 = vrot.lane.b32.xlu0 %v5828_v33, %s5038_s1  ;;  %v1932_v21 = vsel %vm1926_vm10, %v1867_v57, %v1425_v3  ;;  %v7641_v57 = vld [vmem:[#allocation31_spill] sm:$0xff] }
 0x16d   :  { %1622 = vrot.lane.b32.xlu1 %v5716_v1, %s5038_s1 }
 0x16e   :  { %v1457_v47 = vpop.permute.xlu0 %1456 }
 0x16f   :  { %v1427_v6 = vpop.permute.xlu1 %1426  ;;  %v1964_v56 = vsel %vm1926_vm10, %v1899_v31, %v1457_v47  ;;  %v7646_v31 = vld [vmem:[#allocation30_spill] sm:$0xff] }
 0x170   :  { %1654 = vrot.lane.b32.xlu0 %v5837_v26, %s5038_s1 }
 0x171   :  { %1308 = vrot.lane.b32.xlu1 %v7553_v45, %s5033_s24 }
 0x172   :  { %v1459_v8 = vpop.permute.xlu0 %1458 }
 0x173   :  { %v1489_v29 = vpop.permute.xlu1 %1488 }
 0x174   :  { %1310 = vrot.lane.b32.xlu0 %v7555_v24, %s5033_s24  ;;  %v1997_v54 = vsel %vm1991_vm11, %v1932_v21, %v1489_v29  ;;  %v7637_v29 = vld [vmem:[#allocation52_spill] sm:$0xff]  ;;  %v7643_v21 = vld [vmem:[#allocation54_spill] sm:$0xff] }
 0x175   :  { %1364 = vrot.lane.b32.xlu1 %v7630_v49, %s5034_s21 }
 0x176   :  { %v1521_v39 = vpop.permute.xlu0 %1520 }
 0x177   :  { %v1491_v33 = vpop.permute.xlu1 %1490  ;;  %v2029_v42 = vsel %vm1991_vm11, %v1964_v56, %v1521_v39 }
 0x178   :  { %1396 = vrot.lane.b32.xlu0 %v7631_v5, %s5034_s21 }
 0x179   :  { %1366 = vrot.lane.b32.xlu1 %v7632_v34, %s5034_s21 }
 0x17a   :  { %v1523_v13 = vpop.permute.xlu0 %1522 }
 0x17b   :  { %v1551_v11 = vpop.permute.xlu1 %1550 }
 0x17c   :  { %1398 = vrot.lane.b32.xlu0 %v7633_v58, %s5034_s21  ;;  %v2061_v18 = vsel %vm2055_vm12, %v1997_v54, %v1551_v11 }
 0x17d   :  { %1436 = vrot.lane.b32.xlu1 %v5716_v1, %s5035_s22  ;;  %v7634_v1 = vld [vmem:[#allocation29_spill] sm:$0xff] }
 0x17e   :  { %v1583_v4 = vpop.permute.xlu0 %1582  ;;  %v1678_v52 = vsel %vm1670_vm6, %v5126_v43, %v7634_v1  ;;  %v7642_v1 = vld [vmem:[#allocation8_spill] sm:$0xff] }
 0x17f   :  { %v1553_v50 = vpop.permute.xlu1 %1552  ;;  %v2093_v48 = vsel %vm2055_vm12, %v2029_v42, %v1583_v4  ;;  %v7639_v4 = vld [vmem:[#allocation20_spill] sm:$0xff]  ;;  %v7650_v42 = vld [vmem:[#allocation9_spill] sm:$0xff] }
 0x180   :  { %1468 = vrot.lane.b32.xlu0 %v5837_v26, %s5035_s22  ;;  %v1741_v26 = vsel %vm1733_vm7, %v1678_v52, %v6002_v7  ;;  %v1771_v7 = vsel %vm1733_vm7, %v1708_v27, %v6064_v16  ;;  %v1680_v52 = vsel %vm1670_vm6, %v7642_v1, %v7641_v57  ;;  %v7647_v27 = vld [vmem:[#allocation14_spill] sm:$0xff] }
 0x181   :  { %1438 = vrot.lane.b32.xlu1 %v7635_v37, %s5035_s22  ;;  %v1804_v43 = vsel %vm1796_vm8, %v1741_v26, %v6126_v25  ;;  %v1836_v0 = vsel %vm1796_vm8, %v1771_v7, %v1299_v41  ;;  %v7645_v26 = vld [vmem:[#allocation74_spill] sm:$0xff] }
 0x182   :  { %v1585_v59 = vpop.permute.xlu0 %1584  ;;  %v1869_v2 = vsel %vm1861_vm9, %v1804_v43, %v1355_v10  ;;  %v1901_v16 = vsel %vm1861_vm9, %v1836_v0, %v1387_v63  ;;  %v1710_v54 = vsel %vm1670_vm6, %v7646_v31, %v7645_v26 }
 0x183   :  { %v1613_v53 = vpop.permute.xlu1 %1612  ;;  %v1934_v25 = vsel %vm1926_vm10, %v1869_v2, %v1427_v6  ;;  %v1966_v30 = vsel %vm1926_vm10, %v1901_v16, %v1459_v8  ;;  %v7636_v8 = vld [vmem:[#allocation19_spill] sm:$0xff] }
 0x184   :  { %1470 = vrot.lane.b32.xlu0 %v5846_v20, %s5035_s22  ;;  %v2125_v12 = vsel %vm2119_vm13, %v2061_v18, %v1613_v53  ;;  %v1999_v36 = vsel %vm1991_vm11, %v1934_v25, %v1491_v33  ;;  %v2031_v14 = vsel %vm1991_vm11, %v1966_v30, %v1523_v13  ;;  %v7648_v18 = vld [vmem:[#allocation90_spill] sm:$0xff]  ;;  %v7649_v2 = vld [vmem:[#allocation35_spill] sm:$0xff] }
 0x185   :  { %1500 = vrot.lane.b32.xlu1 %v5259_v51, %s5036_s26  ;;  %4916 = vmatprep.mubr.msk.bf16.mxu0 %vm2210_vm14, %v2125_v12  ;;  %v2063_v23 = vsel %vm2055_vm12, %v1999_v36, %v1553_v50  ;;  %v2095_v49 = vsel %vm2055_vm12, %v2031_v14, %v1585_v59  ;;  %v7640_v50 = vld [vmem:[#allocation23_spill] sm:$0xff]  ;;  %v1773_v53 = vsel %vm1733_vm7, %v1710_v54, %v7648_v18  ;;  %v7654_v14 = vld [vmem:[#allocation42_spill] sm:$0xff]  ;;  %v7661_v18 = vld [vmem:[#allocation57_spill] sm:$0xff] }
 0x186   :  { %v1645_v61 = vpop.permute.xlu0 %1644  ;;  %v7644_v59 = vld [vmem:[#allocation7_spill] sm:$0xff]  ;;  %v1682_v12 = vsel %vm1670_vm6, %v7650_v42, %v7649_v2  ;;  %v7663_v42 = vld [vmem:[#allocation49_spill] sm:$0xff] }
 0x187   :  { %v2157_v38 = vsel %vm2119_vm13, %v2093_v48, %v1645_v61  ;;  %v1615_v41 = vpop.permute.xlu1 %1614  ;;  %v7651_v61 = vld [vmem:[#allocation34_spill] sm:$0xff]  ;;  %v7652_v30 = vld [vmem:[#allocation75_spill] sm:$0xff] }
 0x188   :  { %1532 = vrot.lane.b32.xlu0 %v7555_v24, %s5036_s26  ;;  %4948 = vmatprep.mubr.msk.bf16.mxu1 %vm2210_vm14, %v2157_v38  ;;  %v2127_v35 = vsel %vm2119_vm13, %v2063_v23, %v1615_v41  ;;  %v1745_v16 = vsel %vm1733_vm7, %v1682_v12, %v7651_v61  ;;  %v7653_v23 = vld [vmem:[#allocation33_spill] sm:$0xff] }
 0x189   :  { %1502 = vrot.lane.b32.xlu1 %v5273_v60, %s5036_s26  ;;  %4917 = vmatmul.mubr.msk.bf16.gmra.mrb[4].mxu0 %vm2210_vm14, %v2127_v35  ;;  %v1712_v41 = vsel %vm1670_vm6, %v7653_v23, %v7652_v30  ;;  %v1808_v35 = vsel %vm1796_vm8, %v1745_v16, %v7654_v14  ;;  %v7665_v16 = vld [vmem:[#allocation55_spill] sm:$0xff]  ;;  %v7667_v30 = vld [vmem:[#allocation10_spill] sm:$0xff] }
 0x18a   :  { %v1647_v5 = vpop.permute.xlu0 %1646  ;;  %v7668_v14 = vld [vmem:[#allocation82_spill] sm:$0xff] }
 0x18b   :  { %v2159_v10 = vsel %vm2119_vm13, %v2095_v49, %v1647_v5  ;;  %v1301_v63 = vpop.permute.xlu1 %1300 }
 0x18c   :  { %1534 = vrot.lane.b32.xlu0 %v5561_v17, %s5036_s26  ;;  %4949 = vmatmul.mubr.msk.bf16.gmra.mrb[4].mxu1 %vm2210_vm14, %v2159_v10  ;;  %v1838_v0 = vsel %vm1796_vm8, %v1773_v53, %v1301_v63  ;;  %v7656_v63 = vld [vmem:[#allocation91_spill] sm:$0xff] }
 0x18d   :  { %1562 = vrot.lane.b32.xlu1 %v7632_v34, %s5037_s4 }
 0x18e   :  { %v1303_v3 = vpop.permute.xlu0 %1302 }
 0x18f   :  { %v1357_v47 = vpop.permute.xlu1 %1356 }
 0x190   :  { %1594 = vrot.lane.b32.xlu0 %v7633_v58, %s5037_s4  ;;  %v7638_v58 = vld [vmem:[#allocation62_spill] sm:$0xff] }
 0x191   :  { %1564 = vrot.lane.b32.xlu1 %v7636_v8, %s5037_s4 }
 0x192   :  { %v1389_v6 = vpop.permute.xlu0 %1388 }
 0x193   :  { %v1359_v39 = vpop.permute.xlu1 %1358  ;;  %v1903_v36 = vsel %vm1861_vm9, %v1838_v0, %v1389_v6 }
 0x194   :  { %1596 = vrot.lane.b32.xlu0 %v7637_v29, %s5037_s4  ;;  %v1873_v6 = vsel %vm1861_vm9, %v1808_v35, %v1359_v39 }
 0x195   :  { %1624 = vrot.lane.b32.xlu1 %v7635_v37, %s5038_s1  ;;  %v1743_v37 = vsel %vm1733_vm7, %v1680_v52, %v7644_v59 }
 0x196   :  { %v1391_v33 = vpop.permute.xlu0 %1390  ;;  %v1806_v43 = vsel %vm1796_vm8, %v1743_v37, %v7647_v27  ;;  %v7660_v27 = vld [vmem:[#allocation24_spill] sm:$0xff] }
 0x197   :  { %v1429_v13 = vpop.permute.xlu1 %1428  ;;  %v1871_v7 = vsel %vm1861_vm9, %v1806_v43, %v1357_v47  ;;  %v1775_v47 = vsel %vm1733_vm7, %v1712_v41, %v7656_v63 }
 0x198   :  { %1656 = vrot.lane.b32.xlu0 %v5846_v20, %s5038_s1  ;;  %v1936_v25 = vsel %vm1926_vm10, %v1871_v7, %v1429_v13  ;;  %v1840_v13 = vsel %vm1796_vm8, %v1775_v47, %v1303_v3  ;;  %v7672_v47 = vld [vmem:[#allocation26_spill] sm:$0xff] }
 0x199   :  { %1626 = vrot.lane.b32.xlu1 %v7638_v58, %s5038_s1  ;;  %v1905_v57 = vsel %vm1861_vm9, %v1840_v13, %v1391_v33 }
 0x19a   :  { %v1461_v34 = vpop.permute.xlu0 %1460 }
 0x19b   :  { %v1431_v11 = vpop.permute.xlu1 %1430  ;;  %v1968_v49 = vsel %vm1926_vm10, %v1903_v36, %v1461_v34 }
 0x19c   :  { %1658 = vrot.lane.b32.xlu0 %v5853_v62, %s5038_s1 }
 0x19d   :  { %1312 = vrot.lane.b32.xlu1 %v5561_v17, %s5033_s24 }
 0x19e   :  { %v1463_v46 = vpop.permute.xlu0 %1462 }
 0x19f   :  { %v1493_v22 = vpop.permute.xlu1 %1492  ;;  %v1970_v1 = vsel %vm1926_vm10, %v1905_v57, %v1463_v46 }
 0x1a0   :  { %1282 = vrot.lane.b32.xlu0 %v7639_v4, %s5033_s24  ;;  %v2001_v38 = vsel %vm1991_vm11, %v1936_v25, %v1493_v22  ;;  %v7664_v25 = vld [vmem:[#allocation22_spill] sm:$0xff] }
 0x1a1   :  { %1314 = vrot.lane.b32.xlu1 %v5580_v9, %s5033_s24 }
 0x1a2   :  { %v1525_v40 = vpop.permute.xlu0 %1524 }
 0x1a3   :  { %v1495_v20 = vpop.permute.xlu1 %1494 }
 0x1a4   :  { %1368 = vrot.lane.b32.xlu0 %v7636_v8, %s5034_s21  ;;  %v2033_v8 = vsel %vm1991_vm11, %v1968_v49, %v1525_v40  ;;  %v7669_v49 = vld [vmem:[#allocation76_spill] sm:$0xff] }
 0x1a5   :  { %1400 = vrot.lane.b32.xlu1 %v7637_v29, %s5034_s21 }
 0x1a6   :  { %v1527_v55 = vpop.permute.xlu0 %1526 }
 0x1a7   :  { %v1555_v32 = vpop.permute.xlu1 %1554  ;;  %v2035_v52 = vsel %vm1991_vm11, %v1970_v1, %v1527_v55  ;;  %v7659_v55 = vld [vmem:[#allocation53_spill] sm:$0xff]  ;;  %v7677_v1 = vld [vmem:[#allocation83_spill] sm:$0xff] }
 0x1a8   :  { %1370 = vrot.lane.b32.xlu0 %v7640_v50, %s5034_s21  ;;  %v2065_v5 = vsel %vm2055_vm12, %v2001_v38, %v1555_v32  ;;  %v7657_v32 = vld [vmem:[#allocation48_spill] sm:$0xff]  ;;  %v7666_v38 = vld [vmem:[#allocation38_spill] sm:$0xff] }
 0x1a9   :  { %1402 = vrot.lane.b32.xlu1 %v7643_v21, %s5034_s21  ;;  %v1684_v23 = vsel %vm1670_vm6, %v7667_v30, %v7666_v38 }
 0x1aa   :  { %v1587_v44 = vpop.permute.xlu0 %1586  ;;  %v1747_v35 = vsel %vm1733_vm7, %v1684_v23, %v7668_v14 }
 0x1ab   :  { %v1557_v56 = vpop.permute.xlu1 %1556  ;;  %v2097_v34 = vsel %vm2055_vm12, %v2033_v8, %v1587_v44  ;;  %v7673_v8 = vld [vmem:[#allocation92_spill] sm:$0xff] }
 0x1ac   :  { %1440 = vrot.lane.b32.xlu0 %v7638_v58, %s5035_s22  ;;  %v1938_v58 = vsel %vm1926_vm10, %v1873_v6, %v1431_v11 }
 0x1ad   :  { %1472 = vrot.lane.b32.xlu1 %v5853_v62, %s5035_s22  ;;  %v7655_v62 = vld [vmem:[#allocation63_spill] sm:$0xff]  ;;  %v2003_v39 = vsel %vm1991_vm11, %v1938_v58, %v1495_v20  ;;  %v7658_v20 = vld [vmem:[#allocation21_spill] sm:$0xff] }
 0x1ae   :  { %v1589_v48 = vpop.permute.xlu0 %1588  ;;  %v2067_v3 = vsel %vm2055_vm12, %v2003_v39, %v1557_v56  ;;  %v7674_v58 = vld [vmem:[#allocation41_spill] sm:$0xff] }
 0x1af   :  { %v1617_v10 = vpop.permute.xlu1 %1616  ;;  %v2099_v33 = vsel %vm2055_vm12, %v2035_v52, %v1589_v48 }
 0x1b0   :  { %1442 = vrot.lane.b32.xlu0 %v7655_v62, %s5035_s22  ;;  %v2129_v29 = vsel %vm2119_vm13, %v2065_v5, %v1617_v10  ;;  %v7670_v5 = vld [vmem:[#allocation37_spill] sm:$0xff]  ;;  %v7671_v10 = vld [vmem:[#allocation100_spill] sm:$0xff] }
 0x1b1   :  { %1474 = vrot.lane.b32.xlu1 %v7657_v32, %s5035_s22  ;;  %4920 = vmatprep.mubr.msk.bf16.mxu0 %vm2210_vm14, %v2129_v29  ;;  %v1810_v63 = vsel %vm1796_vm8, %v1747_v35, %v7671_v10  ;;  %v5027_v10 = vld [vmem:[%s7344_s0 + $0x78] sm:$0xff]  }
 0x1b2   :  { %v1649_v22 = vpop.permute.xlu0 %1648 }
 0x1b3   :  { %v2161_v40 = vsel %vm2119_vm13, %v2097_v34, %v1649_v22  ;;  %v1619_v11 = vpop.permute.xlu1 %1618  ;;  %v7675_v34 = vld [vmem:[#allocation13_spill] sm:$0xff] }
 0x1b4   :  { %1504 = vrot.lane.b32.xlu0 %v7639_v4, %s5036_s26  ;;  %4952 = vmatprep.mubr.msk.bf16.mxu1 %vm2210_vm14, %v2161_v40  ;;  %v2131_v44 = vsel %vm2119_vm13, %v2067_v3, %v1619_v11  ;;  %v1686_v22 = vsel %vm1670_vm6, %v7675_v34, %v7674_v58  ;;  %v7676_v40 = vld [vmem:[#allocation58_spill] sm:$0xff]  ;;  %v352_v58 = vshrl.u32 %v5027_v10, 16 }
 0x1b5   :  { %1536 = vrot.lane.b32.xlu1 %v5580_v9, %s5036_s26  ;;  %4921 = vmatmul.mubr.msk.bf16.gmra.mrb[8].mxu0 %vm2210_vm14, %v2131_v44  ;;  %v1749_v3 = vsel %vm1733_vm7, %v1686_v22, %v7677_v1  ;;  %v7678_v44 = vld [vmem:[#allocation6_spill] sm:$0xff]  ;;  %v7686_v1 = vld [vmem:[#allocation27_spill] sm:$0xff] }
 0x1b6   :  { %v1651_v59 = vpop.permute.xlu0 %1650 }
 0x1b7   :  { %v2163_v46 = vsel %vm2119_vm13, %v2099_v33, %v1651_v59  ;;  %v1305_v37 = vpop.permute.xlu1 %1304  ;;  %v7679_v33 = vld [vmem:[#allocation40_spill] sm:$0xff] }
 0x1b8   :  { %1506 = vrot.lane.b32.xlu0 %v7658_v20, %s5036_s26  ;;  %4953 = vmatmul.mubr.msk.bf16.gmra.mrb[8].mxu1 %vm2210_vm14, %v2163_v46  ;;  %v1716_v59 = vsel %vm1670_vm6, %v7679_v33, %v7678_v44  ;;  %v7680_v46 = vld [vmem:[#allocation101_spill] sm:$0xff]  ;;  %v7687_v33 = vld [vmem:[#allocation59_spill] sm:$0xff] }
 0x1b9   :  { %1538 = vrot.lane.b32.xlu1 %v7659_v55, %s5036_s26 }
 0x1ba   :  { %v1307_v26 = vpop.permute.xlu0 %1306 }
 0x1bb   :  { %v1361_v31 = vpop.permute.xlu1 %1360 }
 0x1bc   :  { %1566 = vrot.lane.b32.xlu0 %v7640_v50, %s5037_s4  ;;  %v7662_v50 = vld [vmem:[#allocation64_spill] sm:$0xff]  ;;  %v1875_v13 = vsel %vm1861_vm9, %v1810_v63, %v1361_v31  ;;  %v7684_v63 = vld [vmem:[#allocation25_spill] sm:$0xff] }
 0x1bd   :  { %1598 = vrot.lane.b32.xlu1 %v7643_v21, %s5037_s4 }
 0x1be   :  { %v1393_v54 = vpop.permute.xlu0 %1392 }
 0x1bf   :  { %v1363_v43 = vpop.permute.xlu1 %1362 }
 0x1c0   :  { %1568 = vrot.lane.b32.xlu0 %v7660_v27, %s5037_s4 }
 0x1c1   :  { %1600 = vrot.lane.b32.xlu1 %v7661_v18, %s5037_s4 }
 0x1c2   :  { %v1395_v56 = vpop.permute.xlu0 %1394 }
 0x1c3   :  { %v1433_v53 = vpop.permute.xlu1 %1432 }
 0x1c4   :  { %1628 = vrot.lane.b32.xlu0 %v7655_v62, %s5038_s1  ;;  %v1714_v62 = vsel %vm1670_vm6, %v7670_v5, %v7669_v49  ;;  %v1940_v57 = vsel %vm1926_vm10, %v1875_v13, %v1433_v53  ;;  %v7681_v53 = vld [vmem:[#allocation93_spill] sm:$0xff]  ;;  %v7685_v13 = vld [vmem:[#allocation56_spill] sm:$0xff] }
 0x1c5   :  { %1660 = vrot.lane.b32.xlu1 %v7657_v32, %s5038_s1  ;;  %v1777_v29 = vsel %vm1733_vm7, %v1714_v62, %v7673_v8  ;;  %v5028_v8 = vld [vmem:[%s7344_s0 + $0xf8] sm:$0xff]  }
 0x1c6   :  { %v1465_v7 = vpop.permute.xlu0 %1464  ;;  %v1842_v32 = vsel %vm1796_vm8, %v1777_v29, %v1305_v37  ;;  %v1812_v37 = vsel %vm1796_vm8, %v1749_v3, %v7680_v46  ;;  %v464_v22 = vshrl.u32 %v5028_v8, 16 }
 0x1c7   :  { %v1435_v21 = vpop.permute.xlu1 %1434  ;;  %v1907_v11 = vsel %vm1861_vm9, %v1842_v32, %v1393_v54  ;;  %v1779_v54 = vsel %vm1733_vm7, %v1716_v59, %v7681_v53 }
 0x1c8   :  { %1630 = vrot.lane.b32.xlu0 %v7662_v50, %s5038_s1  ;;  %v1972_v31 = vsel %vm1926_vm10, %v1907_v11, %v1465_v7  ;;  %v1844_v23 = vsel %vm1796_vm8, %v1779_v54, %v1307_v26  ;;  %v466_v11 = vrot.slane %v464_v22, 7  ;;  %v7693_v22 = vld [vmem:[#allocation28_spill] sm:$0xff] }
 0x1c9   :  { %1662 = vrot.lane.b32.xlu1 %v7663_v42, %s5038_s1 }
 0x1ca   :  { %v1467_v2 = vpop.permute.xlu0 %1466 }
 0x1cb   :  { %v1497_v12 = vpop.permute.xlu1 %1496 }
 0x1cc   :  { %1284 = vrot.lane.b32.xlu0 %v7658_v20, %s5033_s24  ;;  %v2005_v52 = vsel %vm1991_vm11, %v1940_v57, %v1497_v12  ;;  %v1877_v12 = vsel %vm1861_vm9, %v1812_v37, %v1363_v43  ;;  %v354_v57 = vrot.slane %v352_v58, 7 }
 0x1cd   :  { %1316 = vrot.lane.b32.xlu1 %v7659_v55, %s5033_s24  ;;  %v1942_v14 = vsel %vm1926_vm10, %v1877_v12, %v1435_v21  ;;  %v7682_v21 = vld [vmem:[#allocation65_spill] sm:$0xff] }
 0x1ce   :  { %v1529_v0 = vpop.permute.xlu0 %1528 }
 0x1cf   :  { %v1499_v48 = vpop.permute.xlu1 %1498  ;;  %v2037_v38 = vsel %vm1991_vm11, %v1972_v31, %v1529_v0 }
 0x1d0   :  { %1286 = vrot.lane.b32.xlu0 %v7664_v25, %s5033_s24  ;;  %v2007_v43 = vsel %vm1991_vm11, %v1942_v14, %v1499_v48  ;;  %v7683_v48 = vld [vmem:[#allocation67_spill] sm:$0xff] }
 0x1d1   :  { %1318 = vrot.lane.b32.xlu1 %v7665_v16, %s5033_s24 }
 0x1d2   :  { %v1531_v61 = vpop.permute.xlu0 %1530 }
 0x1d3   :  { %v1559_v36 = vpop.permute.xlu1 %1558 }
 0x1d4   :  { %1372 = vrot.lane.b32.xlu0 %v7660_v27, %s5034_s21  ;;  %v2069_v27 = vsel %vm2055_vm12, %v2005_v52, %v1559_v36  ;;  %v467_v52 = vshll.u32 %v5028_v8, 16 }
 0x1d5   :  { %1404 = vrot.lane.b32.xlu1 %v7661_v18, %s5034_s21 }
 0x1d6   :  { %v1591_v41 = vpop.permute.xlu0 %1590  ;;  %v469_v46 = vor.u32 %v467_v52, %v466_v11  ;;  %v7695_v52 = vld [vmem:[#allocation43_spill] sm:$0xff] }
 0x1d7   :  { %v1561_v6 = vpop.permute.xlu1 %1560  ;;  %v2101_v7 = vsel %vm2055_vm12, %v2037_v38, %v1591_v41  ;;  %v7690_v38 = vld [vmem:[#allocation69_spill] sm:$0xff] }
 0x1d8   :  { %1374 = vrot.lane.b32.xlu0 %v7672_v47, %s5034_s21  ;;  %v2071_v26 = vsel %vm2055_vm12, %v2007_v43, %v1561_v6  ;;  %v6577_v53 = vsel %vm5060_vm3, 0, %v469_v46  ;;  %v7696_v46 = vld [vmem:[#allocation94_spill] sm:$0xff] }
 0x1d9   :  { %1406 = vrot.lane.b32.xlu1 %v7676_v40, %s5034_s21 }
 0x1da   :  { %v1593_v39 = vpop.permute.xlu0 %1592 }
 0x1db   :  { %v1621_v18 = vpop.permute.xlu1 %1620 }
 0x1dc   :  { %1444 = vrot.lane.b32.xlu0 %v7662_v50, %s5035_s22  ;;  %v2133_v30 = vsel %vm2119_vm13, %v2069_v27, %v1621_v18  ;;  %v1909_v50 = vsel %vm1861_vm9, %v1844_v23, %v1395_v56  ;;  %v7689_v27 = vld [vmem:[#allocation66_spill] sm:$0xff]  ;;  %v1339_v23 = vshll.u32 %v6577_v53, 16 }
 0x1dd   :  { %1476 = vrot.lane.b32.xlu1 %v7663_v42, %s5035_s22  ;;  %4924 = vmatprep.mubr.msk.bf16.mxu0 %vm2210_vm14, %v2133_v30  ;;  %v1974_v35 = vsel %vm1926_vm10, %v1909_v50, %v1467_v2  ;;  %v6584_v30 = vsel %vm5060_vm3, %v354_v57, 0 }
 0x1de   :  { %v1653_v36 = vpop.permute.xlu0 %1652  ;;  %v2039_v42 = vsel %vm1991_vm11, %v1974_v35, %v1531_v61  ;;  %v1332_v43 = vshll.u32 %v6584_v30, 16  ;;  %v1337_v35 = vshrl.u32 %v6577_v53, 16 }
 0x1df   :  { %v2165_v0 = vsel %vm2119_vm13, %v2101_v7, %v1653_v36  ;;  %v1623_v41 = vpop.permute.xlu1 %1622  ;;  %v2103_v56 = vsel %vm2055_vm12, %v2039_v42, %v1593_v39  ;;  %v355_v39 = vshll.u32 %v5027_v10, 16  ;;  %v6591_v7 = vsel %vm5060_vm3, %v466_v11, 0 }
 0x1e0   :  { %1446 = vrot.lane.b32.xlu0 %v7682_v21, %s5035_s22  ;;  %4956 = vmatprep.mubr.msk.bf16.mxu1 %vm2210_vm14, %v2165_v0  ;;  %v2135_v49 = vsel %vm2119_vm13, %v2071_v26, %v1623_v41  ;;  %v1341_v26 = vrot.slane %v1339_v23, 1 }
 0x1e1   :  { %1478 = vrot.lane.b32.xlu1 %v7683_v48, %s5035_s22  ;;  %4925 = vmatmul.mubr.msk.bf16.gmra.mrb[12].mxu0 %vm2210_vm14, %v2135_v49  ;;  %v1334_v49 = vrot.slane %v1332_v43, 1 }
 0x1e2   :  { %v1655_v5 = vpop.permute.xlu0 %1654  ;;  %v1342_v8 = vor.u32 %v1341_v26, %v1337_v35  ;;  %v7699_v26 = vld [vmem:[#allocation12_spill] sm:$0xff] }
 0x1e3   :  { %v2167_v2 = vsel %vm2119_vm13, %v2103_v56, %v1655_v5  ;;  %v6531_v62 = vpop.permute.xlu1 %1308  ;;  %v7691_v56 = vld [vmem:[#allocation45_spill] sm:$0xff] }
 0x1e4   :  { %1508 = vrot.lane.b32.xlu0 %v7664_v25, %s5036_s26  ;;  %4957 = vmatmul.mubr.msk.bf16.gmra.mrb[12].mxu1 %vm2210_vm14, %v2167_v2  ;;  %v1688_v5 = vsel %vm1670_vm6, %v5225_v15, %v7691_v56  ;;  %v7692_v2 = vld [vmem:[#allocation84_spill] sm:$0xff] }
 0x1e5   :  { %1540 = vrot.lane.b32.xlu1 %v7665_v16, %s5036_s26  ;;  %v1751_v10 = vsel %vm1733_vm7, %v1688_v5, %v7692_v2 }
 0x1e6   :  { %v6533_v61 = vpop.permute.xlu0 %1310 }
 0x1e7   :  { %v1365_v6 = vpop.permute.xlu1 %1364 }
 0x1e8   :  { %1510 = vrot.lane.b32.xlu0 %v7684_v63, %s5036_s26 }
 0x1e9   :  { %1542 = vrot.lane.b32.xlu1 %v7685_v13, %s5036_s26 }
 0x1ea   :  { %v6545_v29 = vpop.permute.xlu0 %1396 }
 0x1eb   :  { %v6551_v34 = vpop.permute.xlu1 %1366 }
 0x1ec   :  { %1570 = vrot.lane.b32.xlu0 %v7672_v47, %s5037_s4  ;;  %v357_v47 = vor.u32 %v355_v39, %v354_v57  ;;  %v1718_v57 = vsel %vm1670_vm6, %v5507_v19, %v7693_v22  ;;  %v7694_v39 = vld [vmem:[#allocation102_spill] sm:$0xff] }
 0x1ed   :  { %1602 = vrot.lane.b32.xlu1 %v7676_v40, %s5037_s4  ;;  %v1814_v11 = vsel %vm1796_vm8, %v1751_v10, %v7694_v39  ;;  %v1781_v37 = vsel %vm1733_vm7, %v1718_v57, %v7696_v46  ;;  %v1415_v10 = vrot.slane %v6584_v30, 1 }
 0x1ee   :  { %v6553_v32 = vpop.permute.xlu0 %1398  ;;  %v6571_v31 = vsel %vm5060_vm3, 0, %v357_v47  ;;  %v1690_v47 = vsel %vm1670_vm6, %v5237_v28, %v7695_v52  ;;  %vm4528_vm3 = vcmask 1045509  }
 0x1ef   :  { %v1437_v3 = vpop.permute.xlu1 %1436  ;;  %v1327_v54 = vshll.u32 %v6571_v31, 16  ;;  %v1325_v36 = vshrl.u32 %v6571_v31, 16  ;;  %v1414_v5 = vrot.slane %v6571_v31, 1 }
 0x1f0   :  { %1572 = vrot.lane.b32.xlu0 %v7686_v1, %s5037_s4 }
 0x1f1   :  { %1604 = vrot.lane.b32.xlu1 %v7687_v33, %s5037_s4  ;;  %v1329_v50 = vrot.slane %v1327_v54, 1  ;;  %v1879_v54 = vsel %vm1861_vm9, %v1814_v11, %v1365_v6 }
 0x1f2   :  { %v1469_v44 = vpop.permute.xlu0 %1468  ;;  %v1944_v35 = vsel %vm1926_vm10, %v1879_v54, %v1437_v3 }
 0x1f3   :  { %v6563_v59 = vpop.permute.xlu1 %1438  ;;  %v1330_v42 = vor.u32 %v1329_v50, %v1325_v36  ;;  %v7697_v36 = vld [vmem:[#allocation5_spill] sm:$0xff] }
 0x1f4   :  { %1632 = vrot.lane.b32.xlu0 %v7682_v21, %s5038_s1  ;;  %v1344_v21 = vshll.u32 %v6591_v7, 16  ;;  %v1720_v19 = vsel %vm1670_vm6, %v7553_v45, %v7697_v36  ;;  %v7698_v50 = vld [vmem:[#allocation85_spill] sm:$0xff] }
 0x1f5   :  { %1664 = vrot.lane.b32.xlu1 %v7683_v48, %s5038_s1  ;;  %v1335_v23 = vsel %vm605_vm2, %v1330_v42, %v1334_v49  ;;  %v1753_v43 = vsel %vm1733_vm7, %v1690_v47, %v7698_v50  ;;  %v1783_v6 = vsel %vm1733_vm7, %v1720_v19, %v7699_v26  ;;  %v7700_v49 = vld [vmem:[#allocation103_spill] sm:$0xff]  ;;  %v7702_v19 = vld [vmem:[#allocation4_spill] sm:$0xff]  ;;  %v2700_v26 = vlaneseq }
 0x1f6   :  { %v6565_v40 = vpop.permute.xlu0 %1470  ;;  %v1346_v58 = vrot.slane %v1344_v21, 1  ;;  %v1816_v56 = vsel %vm1796_vm8, %v1753_v43, %v7700_v49  ;;  %v7704_v49 = vld [vmem:[#allocation46_spill] sm:$0xff] }
 0x1f7   :  { %v1501_v18 = vpop.permute.xlu1 %1500  ;;  %v1881_v2 = vsel %vm1861_vm9, %v1816_v56, %v6551_v34  ;;  %v1417_v34 = vrot.slane %v6577_v53, 1  ;;  %v1692_v56 = vsel %vm1670_vm6, %v5259_v51, %v7704_v49  ;;  %v7710_v51 = vld [vmem:[#allocation39_spill] sm:$0xff] }
 0x1f8   :  { %1634 = vrot.lane.b32.xlu0 %v7689_v27, %s5038_s1  ;;  %v2009_v45 = vsel %vm1991_vm11, %v1944_v35, %v1501_v18  ;;  %v1347_v42 = vsel %vm605_vm2, %v1342_v8, %v1346_v58  ;;  %v1848_v8 = vsel %vm1796_vm8, %v1783_v6, %v6533_v61  ;;  %v1418_v61 = vrot.slane %v6591_v7, 1 }
 0x1f9   :  { %1666 = vrot.lane.b32.xlu1 %v7690_v38, %s5038_s1  ;;  %v5039_v35 = vmov 1983009808   ;;  %vm4526_vm2 = vcmask 1044484  }
 0x1fa   :  { %v1533_v12 = vpop.permute.xlu0 %1532 }
 0x1fb   :  { %v1503_v14 = vpop.permute.xlu1 %1502 }
 0x1fc   :  { %1288 = vrot.lane.b32.xlu0 %v7684_v63, %s5033_s24 }
 0x1fd   :  { %1320 = vrot.lane.b32.xlu1 %v7685_v13, %s5033_s24 }
 0x1fe   :  { %v1535_v0 = vpop.permute.xlu0 %1534 }
 0x1ff   :  { %v1563_v41 = vpop.permute.xlu1 %1562 }
 0x200   :  { %1290 = vrot.lane.b32.xlu0 %v6571_v31, %s5033_s24  ;;  %v2073_v3 = vsel %vm2055_vm12, %v2009_v45, %v1563_v41 }
 0x201   :  { %1322 = vrot.lane.b32.xlu1 %v6577_v53, %s5033_s24 }
 0x202   :  { %v1595_v48 = vpop.permute.xlu0 %1594 }
 0x203   :  { %v1565_v15 = vpop.permute.xlu1 %1564 }
 0x204   :  { %1376 = vrot.lane.b32.xlu0 %v7686_v1, %s5034_s21  ;;  %v1846_v1 = vsel %vm1796_vm8, %v1781_v37, %v6531_v62 }
 0x205   :  { %1408 = vrot.lane.b32.xlu1 %v7687_v33, %s5034_s21  ;;  %v1911_v21 = vsel %vm1861_vm9, %v1846_v1, %v6545_v29 }
 0x206   :  { %v1597_v28 = vpop.permute.xlu0 %1596  ;;  %v1976_v62 = vsel %vm1926_vm10, %v1911_v21, %v1469_v44  ;;  %v1946_v44 = vsel %vm1926_vm10, %v1881_v2, %v6563_v59 }
 0x207   :  { %v1625_v33 = vpop.permute.xlu1 %1624  ;;  %v2041_v29 = vsel %vm1991_vm11, %v1976_v62, %v1533_v12  ;;  %v1913_v12 = vsel %vm1861_vm9, %v1848_v8, %v6553_v32  ;;  %v2011_v30 = vsel %vm1991_vm11, %v1946_v44, %v1503_v14  ;;  %v1416_v14 = vsel %vm1102_vm4, %v1414_v5, %v1415_v10  ;;  %v7705_v62 = vld [vmem:[#allocation68_spill] sm:$0xff]  ;;  %v7708_v10 = vld [vmem:[#allocation86_spill] sm:$0xff]  ;;  %v7709_v44 = vld [vmem:[#allocation87_spill] sm:$0xff] }
 0x208   :  { %1378 = vrot.lane.b32.xlu0 %v1335_v23, %s5034_s21  ;;  %v2137_v18 = vsel %vm2119_vm13, %v2073_v3, %v1625_v33  ;;  %v2105_v41 = vsel %vm2055_vm12, %v2041_v29, %v1595_v48  ;;  %v1978_v59 = vsel %vm1926_vm10, %v1913_v12, %v6565_v40  ;;  %v2075_v48 = vsel %vm2055_vm12, %v2011_v30, %v1565_v15  ;;  %v7706_v33 = vld [vmem:[#allocation32_spill] sm:$0xff]  ;;  %v7707_v29 = vld [vmem:[#allocation77_spill] sm:$0xff] }
 0x209   :  { %1410 = vrot.lane.b32.xlu1 %v1347_v42, %s5034_s21  ;;  %4928 = vmatprep.mubr.msk.bf16.mxu0 %vm2210_vm14, %v2137_v18  ;;  %v2043_v39 = vsel %vm1991_vm11, %v1978_v59, %v1535_v0  ;;  %v1694_v3 = vsel %vm1670_vm6, %v5273_v60, %v7705_v62  ;;  %v1722_v5 = vsel %vm1670_vm6, %v7555_v24, %v7706_v33  ;;  %v6721_v60 = vld [vmem:[%s7346_s2] ss:$0 sm:$0xff]  ;;  %v7711_v24 = vld [vmem:[#allocation95_spill] sm:$0xff]  ;;  %v7712_v12 = vld [vmem:[#allocation104_spill] sm:$0xff] }
 0x20a   :  { %v1657_v58 = vpop.permute.xlu0 %1656  ;;  %v2107_v11 = vsel %vm2055_vm12, %v2043_v39, %v1597_v28  ;;  %v2698_v28 = vunpack.c.l.s4 %v5039_v35  ;;  %v1724_v18 = vsel %vm1670_vm6, %v5561_v17, %v7707_v29  ;;  %v1755_v8 = vsel %vm1733_vm7, %v1692_v56, %v7708_v10 }
 0x20b   :  { %v2169_v22 = vsel %vm2119_vm13, %v2105_v41, %v1657_v58  ;;  %v1627_v57 = vpop.permute.xlu1 %1626  ;;  %v1757_v41 = vsel %vm1733_vm7, %v1694_v3, %v7709_v44  ;;  %v1785_v58 = vsel %vm1733_vm7, %v1722_v5, %v7710_v51  ;;  %v1818_v17 = vsel %vm1796_vm8, %v1755_v8, %v7712_v12 }
 0x20c   :  { %1448 = vrot.lane.b32.xlu0 %v7689_v27, %s5035_s22  ;;  %4960 = vmatprep.mubr.msk.bf16.mxu1 %vm2210_vm14, %v2169_v22  ;;  %v2139_v32 = vsel %vm2119_vm13, %v2075_v48, %v1627_v57  ;;  %v1419_v27 = vsel %vm1102_vm4, %v1417_v34, %v1418_v61  ;;  %v2699_v45 = vunpack.c.0.s8 %v2698_v28  ;;  %v1787_v34 = vsel %vm1733_vm7, %v1724_v18, %v7711_v24 }
 0x20d   :  { %1480 = vrot.lane.b32.xlu1 %v7690_v38, %s5035_s22  ;;  %4929 = vmatmul.mubr.msk.bf16.gmra.mrb[16].mxu0 %vm2210_vm14, %v2139_v32  ;;  %v7701_v38 = vld [vmem:[#allocation3_spill] sm:$0xff]  ;;  %vm4530_vm4 = vcmask 1046534  }
 0x20e   :  { %v1659_v7 = vpop.permute.xlu0 %1658 }
 0x20f   :  { %v2171_v40 = vsel %vm2119_vm13, %v2107_v11, %v1659_v7  ;;  %v1313_v0 = vpop.permute.xlu1 %1312 }
 0x210   :  { %1450 = vrot.lane.b32.xlu0 %v1416_v14, %s5035_s22  ;;  %4961 = vmatmul.mubr.msk.bf16.gmra.mrb[16].mxu1 %vm2210_vm14, %v2171_v40  ;;  %v1850_v59 = vsel %vm1796_vm8, %v1785_v58, %v1313_v0 }
 0x211   :  { %1482 = vrot.lane.b32.xlu1 %v1419_v27, %s5035_s22 }
 0x212   :  { %v1283_v15 = vpop.permute.xlu0 %1282 }
 0x213   :  { %v1315_v52 = vpop.permute.xlu1 %1314  ;;  %v1820_v48 = vsel %vm1796_vm8, %v1757_v41, %v1283_v15 }
 0x214   :  { %1512 = vrot.lane.b32.xlu0 %v6571_v31, %s5036_s26  ;;  %v1852_v57 = vsel %vm1796_vm8, %v1787_v34, %v1315_v52 }
 0x215   :  { %1544 = vrot.lane.b32.xlu1 %v6577_v53, %s5036_s26  ;;  %v7703_v53 = vld [vmem:[#allocation60_spill] sm:$0xff] }
 0x216   :  { %v1369_v47 = vpop.permute.xlu0 %1368 }
 0x217   :  { %v1401_v46 = vpop.permute.xlu1 %1400  ;;  %v1883_v39 = vsel %vm1861_vm9, %v1818_v17, %v1369_v47 }
 0x218   :  { %1514 = vrot.lane.b32.xlu0 %v7701_v38, %s5036_s26 }
 0x219   :  { %1574 = vrot.lane.b32.xlu1 %v1335_v23, %s5037_s4 }
 0x21a   :  { %v1371_v37 = vpop.permute.xlu0 %1370 }
 0x21b   :  { %v1403_v54 = vpop.permute.xlu1 %1402  ;;  %v1885_v11 = vsel %vm1861_vm9, %v1820_v48, %v1371_v37 }
 0x21c   :  { %1606 = vrot.lane.b32.xlu0 %v1347_v42, %s5037_s4  ;;  %v2701_v42 = vshrl.u32 %v2700_v26, 7  ;;  %v1917_v7 = vsel %vm1861_vm9, %v1852_v57, %v1403_v54 }
 0x21d   :  { %1576 = vrot.lane.b32.xlu1 %v7702_v19, %s5037_s4 }
 0x21e   :  { %v1441_v36 = vpop.permute.xlu0 %1440  ;;  %v6727_v22 = vsub.s32 %v2699_v45, %v2701_v42  ;;  %v6729_v61 = vsub.s32 0, %v2701_v42 }
 0x21f   :  { %v1473_v31 = vpop.permute.xlu1 %1472  ;;  %v1948_v0 = vsel %vm1926_vm10, %v1883_v39, %v1441_v36 }
 0x220   :  { %1636 = vrot.lane.b32.xlu0 %v1416_v14, %s5038_s1  ;;  %v1915_v14 = vsel %vm1861_vm9, %v1850_v59, %v1401_v46 }
 0x221   :  { %1668 = vrot.lane.b32.xlu1 %v1419_v27, %s5038_s1  ;;  %v1980_v15 = vsel %vm1926_vm10, %v1915_v14, %v1473_v31 }
 0x222   :  { %v1443_v50 = vpop.permute.xlu0 %1442 }
 0x223   :  { %v6694_v43 = vpop.permute.xlu1 %1474  ;;  %v1950_v52 = vsel %vm1926_vm10, %v1885_v11, %v1443_v50 }
 0x224   :  { %1638 = vrot.lane.b32.xlu0 %v7703_v53, %s5038_s1 }
 0x226   :  { %v1505_v1 = vpop.permute.xlu0 %1504 }
 0x227   :  { %v1537_v23 = vpop.permute.xlu1 %1536  ;;  %v2013_v46 = vsel %vm1991_vm11, %v1948_v0, %v1505_v1 }
 0x228   :  { %v2045_v36 = vsel %vm1991_vm11, %v1980_v15, %v1537_v23 }
 0x22a   :  { %v6696_v6 = vpop.permute.xlu0 %1506 }
 0x22b   :  { %v6698_v21 = vpop.permute.xlu1 %1538  ;;  %v2015_v17 = vsel %vm1991_vm11, %v1950_v52, %v6696_v6 }
 0x22e   :  { %v1567_v2 = vpop.permute.xlu0 %1566 }
 0x22f   :  { %v1599_v30 = vpop.permute.xlu1 %1598  ;;  %v2077_v31 = vsel %vm2055_vm12, %v2013_v46, %v1567_v2  ;;  %v1982_v2 = vsel %vm1926_vm10, %v1917_v7, %v6694_v43 }
 0x230   :  { %v4914_v32 = vpop.f32.mrb[0].mxu0  ;;  %v2109_v8 = vsel %vm2055_vm12, %v2045_v36, %v1599_v30  ;;  %v2047_v43 = vsel %vm1991_vm11, %v1982_v2, %v6698_v21 }
 0x231   :  { %v2322_v27 = vadd.f32 %v4914_v32, %v6721_v60  ;;  %v2313_v38 = vpop.f32.mrb[1].mxu0 }
 0x232   :  { %v6738_v40 = vpop.permute.xlu0 %1568  ;;  %v2314_v47 = vadd.f32 %v6721_v60, %v2313_v38  ;;  %v4915_v53 = vpop.f32.mrb[2].mxu0 }
 0x233   :  { %v4946_v19 = vpop.f32.mrb[0].mxu1  ;;  %v2570_v37 = vmax.f32 %v2322_v27, 0.0  ;;  %v2325_v28 = vadd.f32 %v4915_v53, %v6721_v60  ;;  %v6748_v26 = vpop.permute.xlu1 %1600 }
 0x234   :  { %v2450_v54 = vadd.f32 %v4946_v19, %v6721_v60  ;;  %v2441_v35 = vpop.f32.mrb[1].mxu1  ;;  %v2568_v45 = vmax.f32 %v2314_v47, 0.0  ;;  %v2316_v49 = vpop.f32.mrb[3].mxu0 }
 0x235   :  { %v2442_v50 = vadd.f32 %v6721_v60, %v2441_v35  ;;  %v4947_v42 = vpop.f32.mrb[2].mxu1  ;;  %v2571_v62 = vmax.f32 %v2325_v28, 0.0  ;;  %v2317_v3 = vadd.f32 %v6721_v60, %v2316_v49 }
 0x236   :  { %v2602_v56 = vmax.f32 %v2450_v54, 0.0  ;;  %v2453_v1 = vadd.f32 %v4947_v42, %v6721_v60  ;;  %v2444_v33 = vpop.f32.mrb[3].mxu1  ;;  %v1629_v5 = vpop.permute.xlu0 %1628  ;;  %v2632_v29 = vmax.f32 %v2568_v45, %v2570_v37 }
 0x237   :  { %v2600_v18 = vmax.f32 %v2442_v50, 0.0  ;;  %v2445_v10 = vadd.f32 %v6721_v60, %v2444_v33  ;;  %v2141_v23 = vsel %vm2119_vm13, %v2077_v31, %v1629_v5  ;;  %v2569_v41 = vmax.f32 %v2317_v3, 0.0  ;;  %v1661_v51 = vpop.permute.xlu1 %1660 }
 0x238   :  { %v2603_v44 = vmax.f32 %v2453_v1, 0.0  ;;  %4932 = vmatprep.mubr.msk.bf16.mxu0 %vm2210_vm14, %v2141_v23  ;;  %v2696_v58 = vcombine.high %v2632_v29, %v2632_v29  ;;  %v2703_v24 = vrot.slane %v2632_v29, %v6727_v22  ;;  %v2173_v30 = vsel %vm2119_vm13, %v2109_v8, %v1661_v51 }
 0x239   :  { %v2648_v34 = vmax.f32 %v2600_v18, %v2602_v56  ;;  %v2601_v12 = vmax.f32 %v2445_v10, 0.0  ;;  %v2633_v59 = vmax.f32 %v2569_v41, %v2571_v62  ;;  %4964 = vmatprep.mubr.msk.bf16.mxu1 %vm2210_vm14, %v2173_v30 }
 0x23a   :  { %v6767_v48 = vpop.permute.xlu0 %1630  ;;  %v2710_v57 = vrot.slane %v2696_v58, %v6727_v22  ;;  %v2711_v39 = vcombine.high %v2703_v24, %v2703_v24  ;;  %v4743_v32 = vrot.slane %v2703_v24, 9 }
 0x23b   :  { %v2968_v14 = vcombine.high %v2648_v34, %v2648_v34  ;;  %v2975_v11 = vrot.slane %v2648_v34, %v6727_v22  ;;  %v2713_v7 = vcombine.high %v2633_v59, %v2633_v59  ;;  %v2720_v6 = vrot.slane %v2633_v59, %v6727_v22  ;;  %v6773_v21 = vpop.permute.xlu1 %1662 }
 0x23c   :  { %v2649_v27 = vmax.f32 %v2601_v12, %v2603_v44  ;;  %v2712_v38 = vcombine.high %v2710_v57, %v2710_v57  ;;  %v4744_v0 = vrot.slane %v2711_v39, 9  ;;  %v4745_v15 = vrot.slane %v2710_v57, 9 }
 0x23d   :  { %v3752_v52 = vmax.f32 %v2703_v24, %v4743_v32  ;;  %v2982_v19 = vrot.slane %v2968_v14, %v6727_v22  ;;  %v2983_v47 = vcombine.high %v2975_v11, %v2975_v11  ;;  %v4807_v53 = vrot.slane %v2975_v11, 9 }
 0x23e   :  { %v2727_v46 = vrot.slane %v2713_v7, %v6727_v22  ;;  %v6777_v37 = vpop.permute.xlu0 %1284  ;;  %v4746_v54 = vrot.slane %v2712_v38, 9  ;;  %v3753_v35 = vmax.f32 %v2711_v39, %v4744_v0  ;;  %v3754_v28 = vmax.f32 %v2710_v57, %v4745_v15 }
 0x23f   :  { %v4011_v36 = vrot.slane %v3752_v52, %v6729_v61  ;;  %v2984_v31 = vcombine.high %v2982_v19, %v2982_v19  ;;  %v4808_v45 = vrot.slane %v2983_v47, 9  ;;  %v4809_v50 = vrot.slane %v2982_v19, 9  ;;  %v6780_v49 = vpop.permute.xlu1 %1316 }
 0x240   :  { %v3816_v42 = vmax.f32 %v2975_v11, %v4807_v53  ;;  %v3755_v56 = vmax.f32 %v2712_v38, %v4746_v54  ;;  %v4015_v62 = vrot.slane %v3753_v35, %v6729_v61  ;;  %v4019_v1 = vrot.slane %v3754_v28, %v6729_v61 }
 0x241   :  { %v2728_v3 = vcombine.high %v2720_v6, %v2720_v6  ;;  %v4810_v33 = vrot.slane %v2984_v31, 9  ;;  %v3817_v5 = vmax.f32 %v2983_v47, %v4808_v45  ;;  %v3818_v29 = vmax.f32 %v2982_v19, %v4809_v50 }
 0x242   :  { %v4267_v18 = vrot.slane %v3816_v42, %v6729_v61  ;;  %v6785_v10 = vpop.permute.xlu0 %1286  ;;  %v4023_v23 = vrot.slane %v3755_v56, %v6729_v61  ;;  %v4521_v2 = vsel %vm4520_vm15, %v4015_v62, %v4011_v36  ;;  %v2729_v8 = vcombine.high %v2727_v46, %v2727_v46 }
 0x243   :  { %v4747_v44 = vrot.slane %v2720_v6, 9  ;;  %v4523_v41 = vsel %vm4522_vm0, %v4019_v1, %v4521_v2  ;;  %v3819_v51 = vmax.f32 %v2984_v31, %v4810_v33  ;;  %v4271_v58 = vrot.slane %v3817_v5, %v6729_v61  ;;  %v6792_v34 = vpop.permute.xlu1 %1318 }
 0x244   :  { %v4275_v24 = vrot.slane %v3818_v29, %v6729_v61  ;;  %v4748_v12 = vrot.slane %v2728_v3, 9  ;;  %v4749_v59 = vrot.slane %v2727_v46, 9  ;;  %v4750_v30 = vrot.slane %v2729_v8, 9 }
 0x245   :  { %v3756_v57 = vmax.f32 %v2720_v6, %v4747_v44  ;;  %v2079_v39 = vsel %vm2055_vm12, %v2015_v17, %v6738_v40  ;;  %v4583_v32 = vsel %vm4520_vm15, %v4271_v58, %v4267_v18  ;;  %v2111_v14 = vsel %vm2055_vm12, %v2047_v43, %v6748_v26 }
 0x246   :  { %v2985_v11 = vcombine.high %v2649_v27, %v2649_v27  ;;  %v6799_v7 = vpop.permute.xlu0 %1372  ;;  %v3757_v38 = vmax.f32 %v2728_v3, %v4748_v12  ;;  %v3758_v0 = vmax.f32 %v2727_v46, %v4749_v59  ;;  %v3759_v15 = vmax.f32 %v2729_v8, %v4750_v30 }
 0x247   :  { %v4525_v52 = vsel %vm4524_vm1, %v4023_v23, %v4523_v41  ;;  %v4279_v19 = vrot.slane %v3819_v51, %v6729_v61  ;;  %v4027_v6 = vrot.slane %v3756_v57, %v6729_v61  ;;  %v2992_v47 = vrot.slane %v2649_v27, %v6727_v22  ;;  %v1405_v17 = vpop.permute.xlu1 %1404 }
 0x248   :  { %v2999_v40 = vrot.slane %v2985_v11, %v6727_v22  ;;  %v4584_v53 = vsel %vm4522_vm0, %v4275_v24, %v4583_v32  ;;  %v4031_v26 = vrot.slane %v3757_v38, %v6729_v61  ;;  %v4035_v43 = vrot.slane %v3758_v0, %v6729_v61  ;;  %v7713_v11 = vld [vmem:[#allocation70_spill] sm:$0xff]  ;;  %v7714_v0 = vld [vmem:[#allocation71_spill] sm:$0xff] }
 0x249   :  { %v2143_v46 = vsel %vm2119_vm13, %v2079_v39, %v6767_v48  ;;  %v4527_v54 = vsel %vm4526_vm2, %v4027_v6, %v4525_v52  ;;  %v3000_v35 = vcombine.high %v2992_v47, %v2992_v47  ;;  %v4811_v36 = vrot.slane %v2992_v47, 9  ;;  %v7715_v52 = vld [vmem:[#allocation78_spill] sm:$0xff]  ;;  %v7716_v6 = vld [vmem:[#allocation79_spill] sm:$0xff] }
 0x24a   :  { %v3001_v28 = vcombine.high %v2999_v40, %v2999_v40  ;;  %4933 = vmatmul.mubr.msk.bf16.gmra.mrb[20].mxu0 %vm2210_vm14, %v2143_v46  ;;  %v1375_v27 = vpop.permute.xlu0 %1374  ;;  %v4039_v31 = vrot.slane %v3759_v15, %v6729_v61  ;;  %v4529_v45 = vsel %vm4528_vm3, %v4031_v26, %v4527_v54  ;;  %v4813_v50 = vrot.slane %v2999_v40, 9  ;;  %v7718_v26 = vld [vmem:[#allocation36_spill] sm:$0xff]  ;;  %v7720_v54 = vld [vmem:[#allocation97_spill] sm:$0xff] }
 0x24b   :  { %v2175_v42 = vsel %vm2119_vm13, %v2111_v14, %v6773_v21  ;;  %v4531_v56 = vsel %vm4530_vm4, %v4035_v43, %v4529_v45  ;;  %v4812_v62 = vrot.slane %v3000_v35, 9  ;;  %v3820_v1 = vmax.f32 %v2992_v47, %v4811_v36  ;;  %v1407_v3 = vpop.permute.xlu1 %1406  ;;  %v7719_v46 = vld [vmem:[#allocation96_spill] sm:$0xff] }
 0x24c   :  { %v4814_v48 = vrot.slane %v3001_v28, 9  ;;  %4965 = vmatmul.mubr.msk.bf16.gmra.mrb[20].mxu1 %vm2210_vm14, %v2175_v42  ;;  %v4533_v33 = vsel %vm4532_vm5, %v4039_v31, %v4531_v56  ;;  %v3822_v5 = vmax.f32 %v2999_v40, %v4813_v50  ;;  %v4585_v29 = vsel %vm4524_vm1, %v4279_v19, %v4584_v53  ;;  %v7717_v40 = vld [vmem:[#allocation11_spill] sm:$0xff] }
 0x24d   :  { %4655 = vst [vmem:[%s7347_s3] sm:$0xff] %v4533_v33  ;;  %v3821_v18 = vmax.f32 %v3000_v35, %v4812_v62  ;;  %v4283_v21 = vrot.slane %v3820_v1, %v6729_v61  ;;  %v1696_v38 = vsel %vm1670_vm6, %v7639_v4, %v7713_v11  ;;  %v1698_v15 = vsel %vm1670_vm6, %v7658_v20, %v7714_v0 }
 0x24e   :  { %v3823_v23 = vmax.f32 %v3001_v28, %v4814_v48  ;;  %v1445_v2 = vpop.permute.xlu0 %1444  ;;  %v4291_v51 = vrot.slane %v3822_v5, %v6729_v61  ;;  %v1726_v19 = vsel %vm1670_vm6, %v5580_v9, %v7715_v52  ;;  %v1728_v47 = vsel %vm1670_vm6, %v7659_v55, %v7716_v6 }
 0x24f   :  { %v4287_v8 = vrot.slane %v3821_v18, %v6729_v61  ;;  %v4586_v44 = vsel %vm4526_vm2, %v4283_v21, %v4585_v29  ;;  %v1477_v41 = vpop.permute.xlu1 %1476  ;;  %v1759_v53 = vsel %vm1733_vm7, %v1696_v38, %v7717_v40  ;;  %v1761_v43 = vsel %vm1733_vm7, %v1698_v15, %v7718_v26 }
 0x250   :  { %v4295_v58 = vrot.slane %v3823_v23, %v6729_v61  ;;  %v1789_v4 = vsel %vm1733_vm7, %v1726_v19, %v7719_v46  ;;  %v1791_v20 = vsel %vm1733_vm7, %v1728_v47, %v7720_v54  ;;  %v1822_v9 = vsel %vm1796_vm8, %v1759_v53, %v6777_v37 }
 0x251   :  { %v4587_v24 = vsel %vm4528_vm3, %v4287_v8, %v4586_v44  ;;  %v1854_v28 = vsel %vm1796_vm8, %v1789_v4, %v6780_v49  ;;  %v1824_v55 = vsel %vm1796_vm8, %v1761_v43, %v6785_v10  ;;  %v1856_v36 = vsel %vm1796_vm8, %v1791_v20, %v6792_v34 }
 0x252   :  { %v1447_v12 = vpop.permute.xlu0 %1446  ;;  %v4588_v59 = vsel %vm4530_vm4, %v4291_v51, %v4587_v24  ;;  %v1887_v45 = vsel %vm1861_vm9, %v1822_v9, %v6799_v7  ;;  %v1919_v50 = vsel %vm1861_vm9, %v1854_v28, %v1405_v17  ;;  %v1889_v42 = vsel %vm1861_vm9, %v1824_v55, %v1375_v27 }
 0x253   :  { %v4589_v30 = vsel %vm4532_vm5, %v4295_v58, %v4588_v59  ;;  %v1479_v57 = vpop.permute.xlu1 %1478  ;;  %v1921_v49 = vsel %vm1861_vm9, %v1856_v36, %v1407_v3  ;;  %v1952_v48 = vsel %vm1926_vm10, %v1887_v45, %v1445_v2  ;;  %v1984_v10 = vsel %vm1926_vm10, %v1919_v50, %v1477_v41 }
 0x254   :  { %4663 = vst [vmem:[%s7347_s3 + $0x40] sm:$0xff] %v4589_v30  ;;  %v1954_v7 = vsel %vm1926_vm10, %v1889_v42, %v1447_v12  ;;  %v1986_v23 = vsel %vm1926_vm10, %v1921_v49, %v1479_v57 }
 0x256   :  { %v1509_v39 = vpop.permute.xlu0 %1508 }
 0x257   :  { %v1541_v32 = vpop.permute.xlu1 %1540  ;;  %v2017_v3 = vsel %vm1991_vm11, %v1952_v48, %v1509_v39 }
 0x258   :  { %v2049_v30 = vsel %vm1991_vm11, %v1984_v10, %v1541_v32 }
 0x25a   :  { %v1511_v14 = vpop.permute.xlu0 %1510 }
 0x25b   :  { %v1543_v35 = vpop.permute.xlu1 %1542  ;;  %v2019_v39 = vsel %vm1991_vm11, %v1954_v7, %v1511_v14 }
 0x25c   :  { %v4918_v31 = vpop.f32.mrb[4].mxu0  ;;  %v6884_v0 = vsel %vm1991_vm11, %v1986_v23, %v1543_v35 }
 0x25d   :  { %v2338_v37 = vadd.f32 %v4918_v31, %v6721_v60  ;;  %v2329_v62 = vpop.f32.mrb[5].mxu0 }
 0x25e   :  { %v1571_v56 = vpop.permute.xlu0 %1570  ;;  %v2330_v34 = vadd.f32 %v6721_v60, %v2329_v62  ;;  %v4919_v33 = vpop.f32.mrb[6].mxu0 }
 0x25f   :  { %v4950_v1 = vpop.f32.mrb[4].mxu1  ;;  %v2574_v5 = vmax.f32 %v2338_v37, 0.0  ;;  %v2341_v29 = vadd.f32 %v4919_v33, %v6721_v60  ;;  %v1603_v18 = vpop.permute.xlu1 %1602  ;;  %v6890_v32 = vsel %vm2055_vm12, %v2017_v3, %v1571_v56 }
 0x260   :  { %v2466_v17 = vadd.f32 %v4950_v1, %v6721_v60  ;;  %v2457_v27 = vpop.f32.mrb[5].mxu1  ;;  %v2572_v21 = vmax.f32 %v2330_v34, 0.0  ;;  %v2332_v44 = vpop.f32.mrb[7].mxu0  ;;  %v6893_v26 = vsel %vm2055_vm12, %v2049_v30, %v1603_v18 }
 0x261   :  { %v2458_v2 = vadd.f32 %v6721_v60, %v2457_v27  ;;  %v4951_v8 = vpop.f32.mrb[6].mxu1  ;;  %v2575_v51 = vmax.f32 %v2341_v29, 0.0  ;;  %v2333_v24 = vadd.f32 %v6721_v60, %v2332_v44 }
 0x262   :  { %v2606_v41 = vmax.f32 %v2466_v17, 0.0  ;;  %v2469_v58 = vadd.f32 %v4951_v8, %v6721_v60  ;;  %v2460_v12 = vpop.f32.mrb[7].mxu1  ;;  %v1573_v59 = vpop.permute.xlu0 %1572  ;;  %v2634_v11 = vmax.f32 %v2572_v21, %v2574_v5 }
 0x263   :  { %v2604_v38 = vmax.f32 %v2458_v2, 0.0  ;;  %v2461_v57 = vadd.f32 %v6721_v60, %v2460_v12  ;;  %v2573_v52 = vmax.f32 %v2333_v24, 0.0  ;;  %v6886_v19 = vpop.permute.xlu1 %1604  ;;  %v6896_v14 = vsel %vm2055_vm12, %v2019_v39, %v1573_v59 }
 0x264   :  { %v2607_v15 = vmax.f32 %v2469_v58, 0.0  ;;  %v2730_v6 = vcombine.high %v2634_v11, %v2634_v11  ;;  %v2737_v47 = vrot.slane %v2634_v11, %v6727_v22 }
 0x265   :  { %v2650_v40 = vmax.f32 %v2604_v38, %v2606_v41  ;;  %v2605_v53 = vmax.f32 %v2461_v57, 0.0  ;;  %v2635_v43 = vmax.f32 %v2573_v52, %v2575_v51 }
 0x266   :  { %v6898_v46 = vpop.permute.xlu0 %1632  ;;  %v2744_v4 = vrot.slane %v2730_v6, %v6727_v22  ;;  %v2745_v54 = vcombine.high %v2737_v47, %v2737_v47  ;;  %v4751_v20 = vrot.slane %v2737_v47, 9 }
 0x267   :  { %v3002_v35 = vcombine.high %v2650_v40, %v2650_v40  ;;  %v3009_v9 = vrot.slane %v2650_v40, %v6727_v22  ;;  %v2747_v28 = vcombine.high %v2635_v43, %v2635_v43  ;;  %v2754_v55 = vrot.slane %v2635_v43, %v6727_v22  ;;  %v6903_v31 = vpop.permute.xlu1 %1664 }
 0x268   :  { %v2651_v36 = vmax.f32 %v2605_v53, %v2607_v15  ;;  %v2746_v45 = vcombine.high %v2744_v4, %v2744_v4  ;;  %v4752_v50 = vrot.slane %v2745_v54, 9  ;;  %v4753_v42 = vrot.slane %v2744_v4, 9 }
 0x269   :  { %v3760_v56 = vmax.f32 %v2737_v47, %v4751_v20  ;;  %v3016_v37 = vrot.slane %v3002_v35, %v6727_v22  ;;  %v3017_v62 = vcombine.high %v3009_v9, %v3009_v9  ;;  %v4815_v49 = vrot.slane %v3009_v9, 9 }
 0x26a   :  { %v2761_v48 = vrot.slane %v2747_v28, %v6727_v22  ;;  %v1635_v10 = vpop.permute.xlu0 %1634  ;;  %v4754_v1 = vrot.slane %v2746_v45, 9  ;;  %v3761_v34 = vmax.f32 %v2745_v54, %v4752_v50  ;;  %v3762_v33 = vmax.f32 %v2744_v4, %v4753_v42 }
 0x26b   :  { %v4043_v7 = vrot.slane %v3760_v56, %v6729_v61  ;;  %v3018_v5 = vcombine.high %v3016_v37, %v3016_v37  ;;  %v4816_v17 = vrot.slane %v3017_v62, 9  ;;  %v4817_v27 = vrot.slane %v3016_v37, 9  ;;  %v1667_v18 = vpop.permute.xlu1 %1666 }
 0x26c   :  { %v3824_v29 = vmax.f32 %v3009_v9, %v4815_v49  ;;  %v3763_v23 = vmax.f32 %v2746_v45, %v4754_v1  ;;  %v4047_v3 = vrot.slane %v3761_v34, %v6729_v61  ;;  %v4051_v21 = vrot.slane %v3762_v33, %v6729_v61 }
 0x26d   :  { %v2762_v2 = vcombine.high %v2754_v55, %v2754_v55  ;;  %v4818_v8 = vrot.slane %v3018_v5, 9  ;;  %v3825_v44 = vmax.f32 %v3017_v62, %v4816_v17  ;;  %v3826_v41 = vmax.f32 %v3016_v37, %v4817_v27 }
 0x26e   :  { %v4299_v51 = vrot.slane %v3824_v29, %v6729_v61  ;;  %v6911_v58 = vpop.permute.xlu0 %1288  ;;  %v4055_v24 = vrot.slane %v3763_v23, %v6729_v61  ;;  %v4534_v12 = vsel %vm4520_vm15, %v4047_v3, %v4043_v7  ;;  %v2763_v59 = vcombine.high %v2761_v48, %v2761_v48 }
 0x26f   :  { %v4755_v30 = vrot.slane %v2754_v55, 9  ;;  %v4535_v11 = vsel %vm4522_vm0, %v4051_v21, %v4534_v12  ;;  %v3827_v38 = vmax.f32 %v3018_v5, %v4818_v8  ;;  %v4303_v57 = vrot.slane %v3825_v44, %v6729_v61  ;;  %v6918_v15 = vpop.permute.xlu1 %1320 }
 0x270   :  { %v4307_v39 = vrot.slane %v3826_v41, %v6729_v61  ;;  %v4756_v52 = vrot.slane %v2762_v2, 9  ;;  %v4757_v6 = vrot.slane %v2761_v48, 9  ;;  %v4758_v47 = vrot.slane %v2763_v59, 9 }
 0x271   :  { %v3764_v40 = vmax.f32 %v2754_v55, %v4755_v30  ;;  %v4311_v53 = vrot.slane %v3827_v38, %v6729_v61  ;;  %v4590_v43 = vsel %vm4520_vm15, %v4303_v57, %v4299_v51  ;;  %v3019_v4 = vcombine.high %v2651_v36, %v2651_v36 }
 0x272   :  { %v2115_v54 = vsel %vm2055_vm12, %v6884_v0, %v6886_v19  ;;  %v6925_v20 = vpop.permute.xlu0 %1290  ;;  %v3765_v35 = vmax.f32 %v2762_v2, %v4756_v52  ;;  %v3766_v9 = vmax.f32 %v2761_v48, %v4757_v6  ;;  %v3767_v28 = vmax.f32 %v2763_v59, %v4758_v47  ;;  %v7721_v47 = vld [vmem:[#allocation72_spill] sm:$0xff] }
 0x273   :  { %v4536_v45 = vsel %vm4524_vm1, %v4055_v24, %v4535_v11  ;;  %v4591_v50 = vsel %vm4522_vm0, %v4307_v39, %v4590_v43  ;;  %v4059_v55 = vrot.slane %v3764_v40, %v6729_v61  ;;  %v3026_v42 = vrot.slane %v2651_v36, %v6727_v22  ;;  %v1323_v37 = vpop.permute.xlu1 %1322 }
 0x274   :  { %v3033_v56 = vrot.slane %v3019_v4, %v6727_v22  ;;  %v4063_v62 = vrot.slane %v3765_v35, %v6729_v61  ;;  %v4067_v0 = vrot.slane %v3766_v9, %v6729_v61  ;;  %v4071_v19 = vrot.slane %v3767_v28, %v6729_v61  ;;  %v7723_v4 = vld [vmem:[#allocation80_spill] sm:$0xff]  ;;  %v7724_v35 = vld [vmem:[#allocation81_spill] sm:$0xff] }
 0x275   :  { %v2145_v49 = vsel %vm2119_vm13, %v6890_v32, %v6898_v46  ;;  %v4537_v48 = vsel %vm4526_vm2, %v4059_v55, %v4536_v45  ;;  %v3034_v1 = vcombine.high %v3026_v42, %v3026_v42  ;;  %v4819_v33 = vrot.slane %v3026_v42, 9  ;;  %v7725_v28 = vld [vmem:[#allocation88_spill] sm:$0xff] }
 0x276   :  { %v3035_v34 = vcombine.high %v3033_v56, %v3033_v56  ;;  %4936 = vmatprep.mubr.msk.bf16.mxu0 %vm2210_vm14, %v2145_v49  ;;  %v1377_v36 = vpop.permute.xlu0 %1376  ;;  %v4538_v7 = vsel %vm4528_vm3, %v4063_v62, %v4537_v48  ;;  %v4821_v5 = vrot.slane %v3033_v56, 9  ;;  %v2177_v17 = vsel %vm2119_vm13, %v6893_v26, %v6903_v31 }
 0x277   :  { %v2147_v27 = vsel %vm2119_vm13, %v6896_v14, %v1635_v10  ;;  %v4539_v32 = vsel %vm4530_vm4, %v4067_v0, %v4538_v7  ;;  %v4820_v46 = vrot.slane %v3034_v1, 9  ;;  %v3828_v23 = vmax.f32 %v3026_v42, %v4819_v33  ;;  %4968 = vmatprep.mubr.msk.bf16.mxu1 %vm2210_vm14, %v2177_v17  ;;  %v1409_v3 = vpop.permute.xlu1 %1408  ;;  %v7727_v42 = vld [vmem:[#allocation98_spill] sm:$0xff] }
 0x278   :  { %v4822_v29 = vrot.slane %v3035_v34, 9  ;;  %4937 = vmatmul.mubr.msk.bf16.gmra.mrb[24].mxu0 %vm2210_vm14, %v2147_v27  ;;  %v4540_v21 = vsel %vm4532_vm5, %v4071_v19, %v4539_v32  ;;  %v3830_v2 = vmax.f32 %v3033_v56, %v4821_v5  ;;  %v4592_v8 = vsel %vm4524_vm1, %v4311_v53, %v4591_v50  ;;  %v7722_v53 = vld [vmem:[#allocation73_spill] sm:$0xff]  ;;  %v7728_v56 = vld [vmem:[#allocation99_spill] sm:$0xff] }
 0x279   :  { %v2179_v26 = vsel %vm2119_vm13, %v2115_v54, %v1667_v18  ;;  %4656 = vst [vmem:[%s7347_s3 + $0x8] sm:$0xff] %v4540_v21  ;;  %v3829_v14 = vmax.f32 %v3034_v1, %v4820_v46  ;;  %v4315_v10 = vrot.slane %v3828_v23, %v6729_v61  ;;  %v1700_v40 = vsel %vm1670_vm6, %v7664_v25, %v7721_v47  ;;  %v7726_v50 = vld [vmem:[#allocation89_spill] sm:$0xff] }
 0x27a   :  { %v3831_v31 = vmax.f32 %v3035_v34, %v4822_v29  ;;  %4969 = vmatmul.mubr.msk.bf16.gmra.mrb[24].mxu1 %vm2210_vm14, %v2179_v26  ;;  %v1379_v44 = vpop.permute.xlu0 %1378  ;;  %v4323_v12 = vrot.slane %v3830_v2, %v6729_v61  ;;  %v1702_v43 = vsel %vm1670_vm6, %v7684_v63, %v7722_v53  ;;  %v1730_v54 = vsel %vm1670_vm6, %v7665_v16, %v7723_v4 }
 0x27b   :  { %v4319_v41 = vrot.slane %v3829_v14, %v6729_v61  ;;  %v4593_v51 = vsel %vm4526_vm2, %v4315_v10, %v4592_v8  ;;  %v1411_v24 = vpop.permute.xlu1 %1410  ;;  %v1732_v9 = vsel %vm1670_vm6, %v7685_v13, %v7724_v35  ;;  %v1763_v45 = vsel %vm1733_vm7, %v1700_v40, %v7725_v28 }
 0x27c   :  { %v4327_v18 = vrot.slane %v3831_v31, %v6729_v61  ;;  %v1765_v55 = vsel %vm1733_vm7, %v1702_v43, %v7726_v50  ;;  %v1793_v25 = vsel %vm1733_vm7, %v1730_v54, %v7727_v42  ;;  %v1795_v63 = vsel %vm1733_vm7, %v1732_v9, %v7728_v56 }
 0x27d   :  { %v4594_v59 = vsel %vm4528_vm3, %v4319_v41, %v4593_v51  ;;  %v1826_v16 = vsel %vm1796_vm8, %v1763_v45, %v6911_v58  ;;  %v1858_v0 = vsel %vm1796_vm8, %v1793_v25, %v6918_v15  ;;  %v1828_v13 = vsel %vm1796_vm8, %v1765_v55, %v6925_v20 }
 0x27e   :  { %v1449_v30 = vpop.permute.xlu0 %1448  ;;  %v4595_v11 = vsel %vm4530_vm4, %v4323_v12, %v4594_v59  ;;  %v1860_v19 = vsel %vm1796_vm8, %v1795_v63, %v1323_v37  ;;  %v1891_v48 = vsel %vm1861_vm9, %v1826_v16, %v1377_v36  ;;  %v1923_v1 = vsel %vm1861_vm9, %v1858_v0, %v1409_v3 }
 0x27f   :  { %v4596_v38 = vsel %vm4532_vm5, %v4327_v18, %v4595_v11  ;;  %v1481_v57 = vpop.permute.xlu1 %1480  ;;  %v1893_v34 = vsel %vm1861_vm9, %v1828_v13, %v1379_v44  ;;  %v1925_v58 = vsel %vm1861_vm9, %v1860_v19, %v1411_v24  ;;  %v1956_v15 = vsel %vm1926_vm10, %v1891_v48, %v1449_v30 }
 0x280   :  { %4664 = vst [vmem:[%s7347_s3 + $0x48] sm:$0xff] %v4596_v38  ;;  %v1988_v17 = vsel %vm1926_vm10, %v1923_v1, %v1481_v57 }
 0x282   :  { %v1451_v39 = vpop.permute.xlu0 %1450 }
 0x283   :  { %v1483_v52 = vpop.permute.xlu1 %1482  ;;  %v1958_v36 = vsel %vm1926_vm10, %v1893_v34, %v1451_v39 }
 0x284   :  { %v1990_v21 = vsel %vm1926_vm10, %v1925_v58, %v1483_v52 }
 0x286   :  { %v1513_v6 = vpop.permute.xlu0 %1512 }
 0x287   :  { %v1545_v62 = vpop.permute.xlu1 %1544  ;;  %v2021_v2 = vsel %vm1991_vm11, %v1956_v15, %v1513_v6 }
 0x288   :  { %v4922_v49 = vpop.f32.mrb[8].mxu0  ;;  %v2053_v12 = vsel %vm1991_vm11, %v1988_v17, %v1545_v62 }
 0x289   :  { %v2354_v7 = vadd.f32 %v4922_v49, %v6721_v60  ;;  %v2345_v5 = vpop.f32.mrb[9].mxu0 }
 0x28a   :  { %v1515_v33 = vpop.permute.xlu0 %1514  ;;  %v2346_v37 = vadd.f32 %v6721_v60, %v2345_v5  ;;  %v4923_v27 = vpop.f32.mrb[10].mxu0 }
 0x28b   :  { %v4954_v20 = vpop.f32.mrb[8].mxu1  ;;  %v2578_v32 = vmax.f32 %v2354_v7, 0.0  ;;  %v2357_v23 = vadd.f32 %v4923_v27, %v6721_v60  ;;  %v1575_v3 = vpop.permute.xlu1 %1574  ;;  %v2023_v38 = vsel %vm1991_vm11, %v1958_v36, %v1515_v33  ;;  %v2054_v57 = vsel %vm1991_vm11, %v1990_v21, %v1515_v33 }
 0x28c   :  { %v2482_v46 = vadd.f32 %v4954_v20, %v6721_v60  ;;  %v2473_v29 = vpop.f32.mrb[9].mxu1  ;;  %v2576_v8 = vmax.f32 %v2346_v37, 0.0  ;;  %v2348_v31 = vpop.f32.mrb[11].mxu0  ;;  %v7016_v4 = vsel %vm2055_vm12, %v2021_v2, %v1575_v3 }
 0x28d   :  { %v2474_v26 = vadd.f32 %v6721_v60, %v2473_v29  ;;  %v4955_v14 = vpop.f32.mrb[10].mxu1  ;;  %v2579_v44 = vmax.f32 %v2357_v23, 0.0  ;;  %v2349_v51 = vadd.f32 %v6721_v60, %v2348_v31 }
 0x28e   :  { %v2610_v10 = vmax.f32 %v2482_v46, 0.0  ;;  %v2485_v41 = vadd.f32 %v4955_v14, %v6721_v60  ;;  %v2476_v24 = vpop.f32.mrb[11].mxu1  ;;  %v2636_v18 = vmax.f32 %v2576_v8, %v2578_v32  ;;  %v1607_v11 = vpop.permute.xlu0 %1606 }
 0x28f   :  { %v2608_v59 = vmax.f32 %v2474_v26, 0.0  ;;  %v2477_v30 = vadd.f32 %v6721_v60, %v2476_v24  ;;  %v2577_v52 = vmax.f32 %v2349_v51, 0.0  ;;  %v1577_v6 = vpop.permute.xlu1 %1576  ;;  %v7019_v35 = vsel %vm2055_vm12, %v2053_v12, %v1607_v11 }
 0x290   :  { %v2611_v39 = vmax.f32 %v2485_v41, 0.0  ;;  %v2764_v47 = vcombine.high %v2636_v18, %v2636_v18  ;;  %v2771_v40 = vrot.slane %v2636_v18, %v6727_v22  ;;  %v7022_v9 = vsel %vm2055_vm12, %v2023_v38, %v1577_v6 }
 0x291   :  { %v2652_v53 = vmax.f32 %v2608_v59, %v2610_v10  ;;  %v2609_v43 = vmax.f32 %v2477_v30, 0.0  ;;  %v2637_v54 = vmax.f32 %v2577_v52, %v2579_v44  ;;  %v2118_v38 = vsel %vm2055_vm12, %v2054_v57, %v1577_v6 }
 0x292   :  { %v2778_v28 = vrot.slane %v2764_v47, %v6727_v22  ;;  %v2779_v45 = vcombine.high %v2771_v40, %v2771_v40  ;;  %v4759_v50 = vrot.slane %v2771_v40, 9  ;;  %v1637_v21 = vpop.permute.xlu0 %1636 }
 0x293   :  { %v3036_v55 = vcombine.high %v2652_v53, %v2652_v53  ;;  %v3043_v42 = vrot.slane %v2652_v53, %v6727_v22  ;;  %v2781_v25 = vcombine.high %v2637_v54, %v2637_v54  ;;  %v2788_v56 = vrot.slane %v2637_v54, %v6727_v22 }
 0x294   :  { %v2653_v63 = vmax.f32 %v2609_v43, %v2611_v39  ;;  %v2780_v62 = vcombine.high %v2778_v28, %v2778_v28  ;;  %v4760_v16 = vrot.slane %v2779_v45, 9  ;;  %v4761_v0 = vrot.slane %v2778_v28, 9 }
 0x295   :  { %v3768_v13 = vmax.f32 %v2771_v40, %v4759_v50  ;;  %v3050_v19 = vrot.slane %v3036_v55, %v6727_v22  ;;  %v3051_v49 = vcombine.high %v3043_v42, %v3043_v42  ;;  %v4823_v48 = vrot.slane %v3043_v42, 9 }
 0x296   :  { %v2795_v1 = vrot.slane %v2781_v25, %v6727_v22  ;;  %v4762_v34 = vrot.slane %v2780_v62, 9  ;;  %v3769_v33 = vmax.f32 %v2779_v45, %v4760_v16  ;;  %v3770_v7 = vmax.f32 %v2778_v28, %v4761_v0  ;;  %v1669_v45 = vpop.permute.xlu1 %1668  ;;  %v1639_v50 = vpop.permute.xlu0 %1638 }
 0x297   :  { %v4075_v5 = vrot.slane %v3768_v13, %v6729_v61  ;;  %v3052_v58 = vcombine.high %v3050_v19, %v3050_v19  ;;  %v4824_v15 = vrot.slane %v3051_v49, 9  ;;  %v4825_v17 = vrot.slane %v3050_v19, 9 }
 0x298   :  { %v3832_v20 = vmax.f32 %v3043_v42, %v4823_v48  ;;  %v3771_v37 = vmax.f32 %v2780_v62, %v4762_v34  ;;  %v4079_v27 = vrot.slane %v3769_v33, %v6729_v61  ;;  %v4083_v36 = vrot.slane %v3770_v7, %v6729_v61 }
 0x299   :  { %v2796_v32 = vcombine.high %v2788_v56, %v2788_v56  ;;  %v4826_v46 = vrot.slane %v3052_v58, 9  ;;  %v3833_v29 = vmax.f32 %v3051_v49, %v4824_v15  ;;  %v3834_v23 = vmax.f32 %v3050_v19, %v4825_v17 }
 0x29a   :  { %v4331_v3 = vrot.slane %v3832_v20, %v6729_v61  ;;  %v4087_v2 = vrot.slane %v3771_v37, %v6729_v61  ;;  %v4541_v8 = vsel %vm4520_vm15, %v4079_v27, %v4075_v5  ;;  %v2797_v26 = vcombine.high %v2795_v1, %v2795_v1 }
 0x29b   :  { %v4763_v14 = vrot.slane %v2788_v56, 9  ;;  %v4542_v31 = vsel %vm4522_vm0, %v4083_v36, %v4541_v8  ;;  %v3835_v10 = vmax.f32 %v3052_v58, %v4826_v46  ;;  %v4335_v44 = vrot.slane %v3833_v29, %v6729_v61 }
 0x29c   :  { %v4339_v41 = vrot.slane %v3834_v23, %v6729_v61  ;;  %v4764_v51 = vrot.slane %v2796_v32, 9  ;;  %v4765_v24 = vrot.slane %v2795_v1, 9  ;;  %v4766_v12 = vrot.slane %v2797_v26, 9 }
 0x29d   :  { %v3772_v18 = vmax.f32 %v2788_v56, %v4763_v14  ;;  %v4343_v59 = vrot.slane %v3835_v10, %v6729_v61  ;;  %v4597_v30 = vsel %vm4520_vm15, %v4335_v44, %v4331_v3  ;;  %v3053_v11 = vcombine.high %v2653_v63, %v2653_v63 }
 0x29e   :  { %v3773_v39 = vmax.f32 %v2796_v32, %v4764_v51  ;;  %v3774_v52 = vmax.f32 %v2795_v1, %v4765_v24  ;;  %v3775_v47 = vmax.f32 %v2797_v26, %v4766_v12  ;;  %v4543_v40 = vsel %vm4524_vm1, %v4087_v2, %v4542_v31 }
 0x29f   :  { %v4598_v53 = vsel %vm4522_vm0, %v4339_v41, %v4597_v30  ;;  %v4091_v43 = vrot.slane %v3772_v18, %v6729_v61  ;;  %v3060_v54 = vrot.slane %v2653_v63, %v6727_v22  ;;  %v3067_v28 = vrot.slane %v3053_v11, %v6727_v22  ;;  %v7086_v41 = vld [vmem:[%s7346_s2] ss:$0 sm:$0xff] }
 0x2a0   :  { %v4095_v55 = vrot.slane %v3773_v39, %v6729_v61  ;;  %v4099_v42 = vrot.slane %v3774_v52, %v6729_v61  ;;  %v4103_v57 = vrot.slane %v3775_v47, %v6729_v61  ;;  %v2149_v6 = vsel %vm2119_vm13, %v7016_v4, %v1637_v21 }
 0x2a1   :  { %v4544_v25 = vsel %vm4526_vm2, %v4091_v43, %v4543_v40  ;;  %v3068_v56 = vcombine.high %v3060_v54, %v3060_v54  ;;  %v3069_v62 = vcombine.high %v3067_v28, %v3067_v28  ;;  %v4827_v16 = vrot.slane %v3060_v54, 9  ;;  %4940 = vmatprep.mubr.msk.bf16.mxu0 %vm2210_vm14, %v2149_v6 }
 0x2a2   :  { %v4545_v63 = vsel %vm4528_vm3, %v4095_v55, %v4544_v25  ;;  %v4829_v0 = vrot.slane %v3067_v28, 9  ;;  %v2181_v13 = vsel %vm2119_vm13, %v7019_v35, %v1669_v45  ;;  %v2151_v19 = vsel %vm2119_vm13, %v7022_v9, %v1639_v50 }
 0x2a3   :  { %v4546_v49 = vsel %vm4530_vm4, %v4099_v42, %v4545_v63  ;;  %v4828_v48 = vrot.slane %v3068_v56, 9  ;;  %v4830_v4 = vrot.slane %v3069_v62, 9  ;;  %v3836_v1 = vmax.f32 %v3060_v54, %v4827_v16  ;;  %4941 = vmatmul.mubr.msk.bf16.gmra.mrb[28].mxu0 %vm2210_vm14, %v2151_v19  ;;  %4972 = vmatprep.mubr.msk.bf16.mxu1 %vm2210_vm14, %v2181_v13 }
 0x2a4   :  { %v4547_v34 = vsel %vm4532_vm5, %v4103_v57, %v4546_v49  ;;  %v3838_v33 = vmax.f32 %v3067_v28, %v4829_v0  ;;  %v4599_v7 = vsel %vm4524_vm1, %v4343_v59, %v4598_v53  ;;  %v2182_v5 = vsel %vm2119_vm13, %v2118_v38, %v1639_v50 }
 0x2a5   :  { %4657 = vst [vmem:[%s7347_s3 + $0x10] sm:$0xff] %v4547_v34  ;;  %v3837_v35 = vmax.f32 %v3068_v56, %v4828_v48  ;;  %v3839_v9 = vmax.f32 %v3069_v62, %v4830_v4  ;;  %v4347_v58 = vrot.slane %v3836_v1, %v6729_v61  ;;  %4973 = vmatmul.mubr.msk.bf16.gmra.mrb[28].mxu1 %vm2210_vm14, %v2182_v5 }
 0x2a6   :  { %v4355_v20 = vrot.slane %v3838_v33, %v6729_v61 }
 0x2a7   :  { %v4351_v15 = vrot.slane %v3837_v35, %v6729_v61  ;;  %v4600_v17 = vsel %vm4526_vm2, %v4347_v58, %v4599_v7  ;;  %v4359_v37 = vrot.slane %v3839_v9, %v6729_v61 }
 0x2a9   :  { %v4601_v27 = vsel %vm4528_vm3, %v4351_v15, %v4600_v17 }
 0x2aa   :  { %v4602_v36 = vsel %vm4530_vm4, %v4355_v20, %v4601_v27 }
 0x2ab   :  { %v4603_v32 = vsel %vm4532_vm5, %v4359_v37, %v4602_v36 }
 0x2ac   :  { %4665 = vst [vmem:[%s7347_s3 + $0x50] sm:$0xff] %v4603_v32 }
 0x2b4   :  { %v4926_v46 = vpop.f32.mrb[12].mxu0 }
 0x2b5   :  { %v2370_v29 = vadd.f32 %v4926_v46, %v6721_v60  ;;  %v2361_v23 = vpop.f32.mrb[13].mxu0 }
 0x2b6   :  { %v2362_v21 = vadd.f32 %v6721_v60, %v2361_v23  ;;  %v4927_v2 = vpop.f32.mrb[14].mxu0 }
 0x2b7   :  { %v4958_v3 = vpop.f32.mrb[12].mxu1  ;;  %v2582_v8 = vmax.f32 %v2370_v29, 0.0  ;;  %v2373_v31 = vadd.f32 %v4927_v2, %v6721_v60  ;;  %v2364_v10 = vpop.f32.mrb[15].mxu0 }
 0x2b8   :  { %v2498_v26 = vadd.f32 %v4958_v3, %v6721_v60  ;;  %v2489_v14 = vpop.f32.mrb[13].mxu1  ;;  %v2580_v44 = vmax.f32 %v2362_v21, 0.0  ;;  %v2365_v12 = vadd.f32 %v7086_v41, %v2364_v10 }
 0x2b9   :  { %v2490_v51 = vadd.f32 %v7086_v41, %v2489_v14  ;;  %v4959_v24 = vpop.f32.mrb[14].mxu1  ;;  %v2583_v59 = vmax.f32 %v2373_v31, 0.0 }
 0x2ba   :  { %v2614_v18 = vmax.f32 %v2498_v26, 0.0  ;;  %v2501_v30 = vadd.f32 %v7086_v41, %v4959_v24  ;;  %v2492_v11 = vpop.f32.mrb[15].mxu1  ;;  %v2638_v38 = vmax.f32 %v2580_v44, %v2582_v8  ;;  %v2581_v60 = vmax.f32 %v2365_v12, 0.0 }
 0x2bb   :  { %v2612_v39 = vmax.f32 %v2490_v51, 0.0  ;;  %v2493_v52 = vadd.f32 %v7086_v41, %v2492_v11 }
 0x2bc   :  { %v2615_v47 = vmax.f32 %v2501_v30, 0.0  ;;  %v2798_v40 = vcombine.high %v2638_v38, %v2638_v38  ;;  %v2805_v53 = vrot.slane %v2638_v38, %v6727_v22  ;;  %v2639_v54 = vmax.f32 %v2581_v60, %v2583_v59 }
 0x2bd   :  { %v2654_v43 = vmax.f32 %v2612_v39, %v2614_v18  ;;  %v2613_v28 = vmax.f32 %v2493_v52, 0.0 }
 0x2be   :  { %v2812_v45 = vrot.slane %v2798_v40, %v6727_v22  ;;  %v2813_v50 = vcombine.high %v2805_v53, %v2805_v53  ;;  %v4767_v55 = vrot.slane %v2805_v53, 9  ;;  %v2815_v6 = vcombine.high %v2639_v54, %v2639_v54 }
 0x2bf   :  { %v3070_v42 = vcombine.high %v2654_v43, %v2654_v43  ;;  %v3077_v57 = vrot.slane %v2654_v43, %v6727_v22  ;;  %v2822_v25 = vrot.slane %v2639_v54, %v6727_v22  ;;  %v2655_v56 = vmax.f32 %v2613_v28, %v2615_v47 }
 0x2c0   :  { %v2814_v62 = vcombine.high %v2812_v45, %v2812_v45  ;;  %v4768_v16 = vrot.slane %v2813_v50, 9  ;;  %v4769_v63 = vrot.slane %v2812_v45, 9  ;;  %v3776_v0 = vmax.f32 %v2805_v53, %v4767_v55 }
 0x2c1   :  { %v3084_v13 = vrot.slane %v3070_v42, %v6727_v22  ;;  %v3085_v19 = vcombine.high %v3077_v57, %v3077_v57  ;;  %v4831_v49 = vrot.slane %v3077_v57, 9  ;;  %v2829_v48 = vrot.slane %v2815_v6, %v6727_v22 }
 0x2c2   :  { %v4770_v4 = vrot.slane %v2814_v62, 9  ;;  %v3777_v1 = vmax.f32 %v2813_v50, %v4768_v16  ;;  %v3778_v34 = vmax.f32 %v2812_v45, %v4769_v63  ;;  %v4107_v33 = vrot.slane %v3776_v0, %v6729_v61 }
 0x2c3   :  { %v3086_v7 = vcombine.high %v3084_v13, %v3084_v13  ;;  %v4832_v5 = vrot.slane %v3085_v19, 9  ;;  %v4833_v35 = vrot.slane %v3084_v13, 9  ;;  %v3840_v9 = vmax.f32 %v3077_v57, %v4831_v49 }
 0x2c4   :  { %v3779_v58 = vmax.f32 %v2814_v62, %v4770_v4  ;;  %v4111_v15 = vrot.slane %v3777_v1, %v6729_v61  ;;  %v4115_v17 = vrot.slane %v3778_v34, %v6729_v61  ;;  %v2830_v20 = vcombine.high %v2822_v25, %v2822_v25 }
 0x2c5   :  { %v4834_v37 = vrot.slane %v3086_v7, 9  ;;  %v3841_v27 = vmax.f32 %v3085_v19, %v4832_v5  ;;  %v3842_v36 = vmax.f32 %v3084_v13, %v4833_v35  ;;  %v4363_v32 = vrot.slane %v3840_v9, %v6729_v61 }
 0x2c6   :  { %v4119_v46 = vrot.slane %v3779_v58, %v6729_v61  ;;  %v4548_v29 = vsel %vm4520_vm15, %v4111_v15, %v4107_v33  ;;  %v2831_v23 = vcombine.high %v2829_v48, %v2829_v48  ;;  %v4771_v3 = vrot.slane %v2822_v25, 9 }
 0x2c7   :  { %v4549_v21 = vsel %vm4522_vm0, %v4115_v17, %v4548_v29  ;;  %v3843_v2 = vmax.f32 %v3086_v7, %v4834_v37  ;;  %v4367_v8 = vrot.slane %v3841_v27, %v6729_v61  ;;  %v4371_v26 = vrot.slane %v3842_v36, %v6729_v61 }
 0x2c8   :  { %v4772_v14 = vrot.slane %v2830_v20, 9  ;;  %v4773_v31 = vrot.slane %v2829_v48, 9  ;;  %v4774_v10 = vrot.slane %v2831_v23, 9  ;;  %v3780_v44 = vmax.f32 %v2822_v25, %v4771_v3 }
 0x2c9   :  { %v4604_v51 = vsel %vm4520_vm15, %v4367_v8, %v4363_v32  ;;  %v3087_v24 = vcombine.high %v2655_v56, %v2655_v56  ;;  %v4550_v30 = vsel %vm4524_vm1, %v4119_v46, %v4549_v21  ;;  %v3094_v38 = vrot.slane %v2655_v56, %v6727_v22 }
 0x2ca   :  { %v3781_v12 = vmax.f32 %v2830_v20, %v4772_v14  ;;  %v3782_v18 = vmax.f32 %v2829_v48, %v4773_v31  ;;  %v3783_v59 = vmax.f32 %v2831_v23, %v4774_v10  ;;  %v4123_v11 = vrot.slane %v3780_v44, %v6729_v61 }
 0x2cb   :  { %v3101_v39 = vrot.slane %v3087_v24, %v6727_v22  ;;  %v4375_v60 = vrot.slane %v3843_v2, %v6729_v61  ;;  %v4605_v52 = vsel %vm4522_vm0, %v4371_v26, %v4604_v51  ;;  %v3102_v43 = vcombine.high %v3094_v38, %v3094_v38 }
 0x2cc   :  { %v4127_v47 = vrot.slane %v3781_v12, %v6729_v61  ;;  %v4131_v40 = vrot.slane %v3782_v18, %v6729_v61  ;;  %v4551_v53 = vsel %vm4526_vm2, %v4123_v11, %v4550_v30  ;;  %v4835_v28 = vrot.slane %v3094_v38, 9 }
 0x2cd   :  { %v3103_v54 = vcombine.high %v3101_v39, %v3101_v39  ;;  %v4135_v45 = vrot.slane %v3783_v59, %v6729_v61  ;;  %v4837_v55 = vrot.slane %v3101_v39, 9  ;;  %v4836_v57 = vrot.slane %v3102_v43, 9 }
 0x2ce   :  { %v4552_v50 = vsel %vm4528_vm3, %v4127_v47, %v4551_v53  ;;  %v3844_v25 = vmax.f32 %v3094_v38, %v4835_v28  ;;  %v4606_v16 = vsel %vm4524_vm1, %v4375_v60, %v4605_v52 }
 0x2cf   :  { %v4553_v42 = vsel %vm4530_vm4, %v4131_v40, %v4552_v50  ;;  %v4838_v6 = vrot.slane %v3103_v54, 9  ;;  %v3846_v62 = vmax.f32 %v3101_v39, %v4837_v55  ;;  %v3845_v63 = vmax.f32 %v3102_v43, %v4836_v57 }
 0x2d0   :  { %v4554_v56 = vsel %vm4532_vm5, %v4135_v45, %v4553_v42  ;;  %v4379_v13 = vrot.slane %v3844_v25, %v6729_v61 }
 0x2d1   :  { %4658 = vst [vmem:[%s7347_s3 + $0x18] sm:$0xff] %v4554_v56  ;;  %v3847_v0 = vmax.f32 %v3103_v54, %v4838_v6  ;;  %v4383_v19 = vrot.slane %v3845_v63, %v6729_v61  ;;  %v4387_v48 = vrot.slane %v3846_v62, %v6729_v61 }
 0x2d2   :  { %v4607_v49 = vsel %vm4526_vm2, %v4379_v13, %v4606_v16 }
 0x2d3   :  { %v4391_v4 = vrot.slane %v3847_v0, %v6729_v61  ;;  %v4608_v1 = vsel %vm4528_vm3, %v4383_v19, %v4607_v49 }
 0x2d4   :  { %v4609_v34 = vsel %vm4530_vm4, %v4387_v48, %v4608_v1 }
 0x2d5   :  { %v4610_v33 = vsel %vm4532_vm5, %v4391_v4, %v4609_v34 }
 0x2d6   :  { %4666 = vst [vmem:[%s7347_s3 + $0x58] sm:$0xff] %v4610_v33 }
 0x2e0   :  { %v4930_v7 = vpop.f32.mrb[16].mxu0 }
 0x2e1   :  { %v2386_v5 = vadd.f32 %v7086_v41, %v4930_v7  ;;  %v2377_v35 = vpop.f32.mrb[17].mxu0 }
 0x2e2   :  { %v2378_v58 = vadd.f32 %v7086_v41, %v2377_v35  ;;  %v4931_v15 = vpop.f32.mrb[18].mxu0 }
 0x2e3   :  { %v4962_v9 = vpop.f32.mrb[16].mxu1  ;;  %v2586_v17 = vmax.f32 %v2386_v5, 0.0  ;;  %v2389_v27 = vadd.f32 %v7086_v41, %v4931_v15  ;;  %v2380_v36 = vpop.f32.mrb[19].mxu0 }
 0x2e4   :  { %v2514_v20 = vadd.f32 %v7086_v41, %v4962_v9  ;;  %v2505_v37 = vpop.f32.mrb[17].mxu1  ;;  %v2584_v32 = vmax.f32 %v2378_v58, 0.0  ;;  %v2381_v23 = vadd.f32 %v7086_v41, %v2380_v36 }
 0x2e5   :  { %v2506_v46 = vadd.f32 %v7086_v41, %v2505_v37  ;;  %v4963_v29 = vpop.f32.mrb[18].mxu1  ;;  %v2587_v21 = vmax.f32 %v2389_v27, 0.0 }
 0x2e6   :  { %v2618_v3 = vmax.f32 %v2514_v20, 0.0  ;;  %v2517_v2 = vadd.f32 %v7086_v41, %v4963_v29  ;;  %v2508_v8 = vpop.f32.mrb[19].mxu1  ;;  %v2640_v26 = vmax.f32 %v2584_v32, %v2586_v17  ;;  %v2585_v31 = vmax.f32 %v2381_v23, 0.0 }
 0x2e7   :  { %v2616_v14 = vmax.f32 %v2506_v46, 0.0  ;;  %v2509_v10 = vadd.f32 %v7086_v41, %v2508_v8 }
 0x2e8   :  { %v2619_v44 = vmax.f32 %v2517_v2, 0.0  ;;  %v2832_v51 = vcombine.high %v2640_v26, %v2640_v26  ;;  %v2839_v24 = vrot.slane %v2640_v26, %v6727_v22  ;;  %v2641_v18 = vmax.f32 %v2585_v31, %v2587_v21 }
 0x2e9   :  { %v2656_v12 = vmax.f32 %v2616_v14, %v2618_v3  ;;  %v2617_v59 = vmax.f32 %v2509_v10, 0.0 }
 0x2ea   :  { %v2846_v30 = vrot.slane %v2832_v51, %v6727_v22  ;;  %v2847_v11 = vcombine.high %v2839_v24, %v2839_v24  ;;  %v4775_v38 = vrot.slane %v2839_v24, 9  ;;  %v2849_v52 = vcombine.high %v2641_v18, %v2641_v18 }
 0x2eb   :  { %v3104_v39 = vcombine.high %v2656_v12, %v2656_v12  ;;  %v3111_v60 = vrot.slane %v2656_v12, %v6727_v22  ;;  %v2856_v47 = vrot.slane %v2641_v18, %v6727_v22  ;;  %v2657_v40 = vmax.f32 %v2617_v59, %v2619_v44 }
 0x2ec   :  { %v2848_v53 = vcombine.high %v2846_v30, %v2846_v30  ;;  %v4776_v43 = vrot.slane %v2847_v11, 9  ;;  %v4777_v54 = vrot.slane %v2846_v30, 9  ;;  %v3784_v28 = vmax.f32 %v2839_v24, %v4775_v38 }
 0x2ed   :  { %v3118_v45 = vrot.slane %v3104_v39, %v6727_v22  ;;  %v3119_v50 = vcombine.high %v3111_v60, %v3111_v60  ;;  %v4839_v55 = vrot.slane %v3111_v60, 9  ;;  %v2863_v42 = vrot.slane %v2849_v52, %v6727_v22 }
 0x2ee   :  { %v4778_v57 = vrot.slane %v2848_v53, 9  ;;  %v3785_v6 = vmax.f32 %v2847_v11, %v4776_v43  ;;  %v3786_v25 = vmax.f32 %v2846_v30, %v4777_v54  ;;  %v4139_v56 = vrot.slane %v3784_v28, %v6729_v61 }
 0x2ef   :  { %v3120_v62 = vcombine.high %v3118_v45, %v3118_v45  ;;  %v4840_v16 = vrot.slane %v3119_v50, 9  ;;  %v4841_v63 = vrot.slane %v3118_v45, 9  ;;  %v3848_v0 = vmax.f32 %v3111_v60, %v4839_v55 }
 0x2f0   :  { %v3787_v13 = vmax.f32 %v2848_v53, %v4778_v57  ;;  %v4143_v19 = vrot.slane %v3785_v6, %v6729_v61  ;;  %v4147_v49 = vrot.slane %v3786_v25, %v6729_v61  ;;  %v2864_v48 = vcombine.high %v2856_v47, %v2856_v47 }
 0x2f1   :  { %v4842_v4 = vrot.slane %v3120_v62, 9  ;;  %v3849_v1 = vmax.f32 %v3119_v50, %v4840_v16  ;;  %v3850_v34 = vmax.f32 %v3118_v45, %v4841_v63  ;;  %v4395_v33 = vrot.slane %v3848_v0, %v6729_v61 }
 0x2f2   :  { %v4151_v7 = vrot.slane %v3787_v13, %v6729_v61  ;;  %v4555_v5 = vsel %vm4520_vm15, %v4143_v19, %v4139_v56  ;;  %v2865_v35 = vcombine.high %v2863_v42, %v2863_v42  ;;  %v4779_v9 = vrot.slane %v2856_v47, 9 }
 0x2f3   :  { %v4556_v58 = vsel %vm4522_vm0, %v4147_v49, %v4555_v5  ;;  %v3851_v15 = vmax.f32 %v3120_v62, %v4842_v4  ;;  %v4399_v17 = vrot.slane %v3849_v1, %v6729_v61  ;;  %v4403_v20 = vrot.slane %v3850_v34, %v6729_v61 }
 0x2f4   :  { %v4780_v37 = vrot.slane %v2864_v48, 9  ;;  %v4781_v27 = vrot.slane %v2863_v42, 9  ;;  %v4782_v36 = vrot.slane %v2865_v35, 9  ;;  %v3788_v32 = vmax.f32 %v2856_v47, %v4779_v9 }
 0x2f5   :  { %v4611_v46 = vsel %vm4520_vm15, %v4399_v17, %v4395_v33  ;;  %v3121_v29 = vcombine.high %v2657_v40, %v2657_v40  ;;  %v4557_v2 = vsel %vm4524_vm1, %v4151_v7, %v4556_v58  ;;  %v3128_v26 = vrot.slane %v2657_v40, %v6727_v22 }
 0x2f6   :  { %v3789_v23 = vmax.f32 %v2864_v48, %v4780_v37  ;;  %v3790_v3 = vmax.f32 %v2863_v42, %v4781_v27  ;;  %v3791_v21 = vmax.f32 %v2865_v35, %v4782_v36  ;;  %v4155_v8 = vrot.slane %v3788_v32, %v6729_v61 }
 0x2f7   :  { %v3135_v14 = vrot.slane %v3121_v29, %v6727_v22  ;;  %v4407_v31 = vrot.slane %v3851_v15, %v6729_v61  ;;  %v4612_v10 = vsel %vm4522_vm0, %v4403_v20, %v4611_v46  ;;  %v3136_v12 = vcombine.high %v3128_v26, %v3128_v26 }
 0x2f8   :  { %v4159_v44 = vrot.slane %v3789_v23, %v6729_v61  ;;  %v4163_v51 = vrot.slane %v3790_v3, %v6729_v61  ;;  %v4558_v24 = vsel %vm4526_vm2, %v4155_v8, %v4557_v2  ;;  %v4843_v59 = vrot.slane %v3128_v26, 9 }
 0x2f9   :  { %v3137_v18 = vcombine.high %v3135_v14, %v3135_v14  ;;  %v4167_v30 = vrot.slane %v3791_v21, %v6729_v61  ;;  %v4845_v38 = vrot.slane %v3135_v14, 9  ;;  %v4844_v60 = vrot.slane %v3136_v12, 9 }
 0x2fa   :  { %v4559_v11 = vsel %vm4528_vm3, %v4159_v44, %v4558_v24  ;;  %v3852_v47 = vmax.f32 %v3128_v26, %v4843_v59  ;;  %v4613_v43 = vsel %vm4524_vm1, %v4407_v31, %v4612_v10 }
 0x2fb   :  { %v4560_v39 = vsel %vm4530_vm4, %v4163_v51, %v4559_v11  ;;  %v4846_v52 = vrot.slane %v3137_v18, 9  ;;  %v3854_v53 = vmax.f32 %v3135_v14, %v4845_v38  ;;  %v3853_v54 = vmax.f32 %v3136_v12, %v4844_v60 }
 0x2fc   :  { %v4561_v40 = vsel %vm4532_vm5, %v4167_v30, %v4560_v39  ;;  %v4411_v45 = vrot.slane %v3852_v47, %v6729_v61 }
 0x2fd   :  { %4659 = vst [vmem:[%s7347_s3 + $0x20] sm:$0xff] %v4561_v40  ;;  %v3855_v28 = vmax.f32 %v3137_v18, %v4846_v52  ;;  %v4415_v50 = vrot.slane %v3853_v54, %v6729_v61  ;;  %v4419_v42 = vrot.slane %v3854_v53, %v6729_v61 }
 0x2fe   :  { %v4614_v55 = vsel %vm4526_vm2, %v4411_v45, %v4613_v43 }
 0x2ff   :  { %v4423_v57 = vrot.slane %v3855_v28, %v6729_v61  ;;  %v4615_v6 = vsel %vm4528_vm3, %v4415_v50, %v4614_v55 }
 0x300   :  { %v4616_v25 = vsel %vm4530_vm4, %v4419_v42, %v4615_v6 }
 0x301   :  { %v4617_v56 = vsel %vm4532_vm5, %v4423_v57, %v4616_v25 }
 0x302   :  { %4667 = vst [vmem:[%s7347_s3 + $0x60] sm:$0xff] %v4617_v56 }
 0x31d   :  { %v4934_v62 = vpop.f32.mrb[20].mxu0 }
 0x31e   :  { %v2402_v16 = vadd.f32 %v7086_v41, %v4934_v62  ;;  %v2393_v63 = vpop.f32.mrb[21].mxu0 }
 0x31f   :  { %v2394_v0 = vadd.f32 %v7086_v41, %v2393_v63  ;;  %v4935_v13 = vpop.f32.mrb[22].mxu0  ;;  %v4966_v19 = vpop.f32.mrb[20].mxu1 }
 0x320   :  { %v2590_v49 = vmax.f32 %v2402_v16, 0.0  ;;  %v2405_v48 = vadd.f32 %v7086_v41, %v4935_v13  ;;  %v2396_v4 = vpop.f32.mrb[23].mxu0  ;;  %v2530_v1 = vadd.f32 %v7086_v41, %v4966_v19  ;;  %v2521_v34 = vpop.f32.mrb[21].mxu1 }
 0x321   :  { %v2588_v33 = vmax.f32 %v2394_v0, 0.0  ;;  %v2397_v7 = vadd.f32 %v7086_v41, %v2396_v4  ;;  %v2522_v5 = vadd.f32 %v7086_v41, %v2521_v34  ;;  %v4967_v35 = vpop.f32.mrb[22].mxu1 }
 0x322   :  { %v2591_v9 = vmax.f32 %v2405_v48, 0.0  ;;  %v2622_v58 = vmax.f32 %v2530_v1, 0.0  ;;  %v2533_v15 = vadd.f32 %v7086_v41, %v4967_v35  ;;  %v2524_v17 = vpop.f32.mrb[23].mxu1 }
 0x323   :  { %v2642_v20 = vmax.f32 %v2588_v33, %v2590_v49  ;;  %v2589_v37 = vmax.f32 %v2397_v7, 0.0  ;;  %v2620_v27 = vmax.f32 %v2522_v5, 0.0  ;;  %v2525_v36 = vadd.f32 %v7086_v41, %v2524_v17 }
 0x324   :  { %v2623_v32 = vmax.f32 %v2533_v15, 0.0 }
 0x325   :  { %v2866_v46 = vcombine.high %v2642_v20, %v2642_v20  ;;  %v2873_v29 = vrot.slane %v2642_v20, %v6727_v22  ;;  %v2643_v23 = vmax.f32 %v2589_v37, %v2591_v9  ;;  %v2658_v3 = vmax.f32 %v2620_v27, %v2622_v58 }
 0x326   :  { %v2621_v21 = vmax.f32 %v2525_v36, 0.0 }
 0x327   :  { %v2880_v2 = vrot.slane %v2866_v46, %v6727_v22  ;;  %v2881_v8 = vcombine.high %v2873_v29, %v2873_v29  ;;  %v4783_v26 = vrot.slane %v2873_v29, 9  ;;  %v2883_v14 = vcombine.high %v2643_v23, %v2643_v23 }
 0x328   :  { %v2890_v31 = vrot.slane %v2643_v23, %v6727_v22  ;;  %v3138_v10 = vcombine.high %v2658_v3, %v2658_v3  ;;  %v3145_v44 = vrot.slane %v2658_v3, %v6727_v22  ;;  %v2659_v51 = vmax.f32 %v2621_v21, %v2623_v32 }
 0x329   :  { %v2882_v24 = vcombine.high %v2880_v2, %v2880_v2  ;;  %v4784_v12 = vrot.slane %v2881_v8, 9  ;;  %v4785_v18 = vrot.slane %v2880_v2, 9  ;;  %v3792_v59 = vmax.f32 %v2873_v29, %v4783_v26 }
 0x32a   :  { %v2897_v30 = vrot.slane %v2883_v14, %v6727_v22  ;;  %v2898_v11 = vcombine.high %v2890_v31, %v2890_v31  ;;  %v4787_v38 = vrot.slane %v2890_v31, 9  ;;  %v3152_v39 = vrot.slane %v3138_v10, %v6727_v22 }
 0x32b   :  { %v4786_v60 = vrot.slane %v2882_v24, 9  ;;  %v3793_v52 = vmax.f32 %v2881_v8, %v4784_v12  ;;  %v3794_v47 = vmax.f32 %v2880_v2, %v4785_v18  ;;  %v4171_v40 = vrot.slane %v3792_v59, %v6729_v61 }
 0x32c   :  { %v2899_v53 = vcombine.high %v2897_v30, %v2897_v30  ;;  %v4788_v43 = vrot.slane %v2898_v11, 9  ;;  %v4789_v54 = vrot.slane %v2897_v30, 9  ;;  %v3796_v28 = vmax.f32 %v2890_v31, %v4787_v38 }
 0x32d   :  { %v3795_v45 = vmax.f32 %v2882_v24, %v4786_v60  ;;  %v4175_v50 = vrot.slane %v3793_v52, %v6729_v61  ;;  %v4179_v55 = vrot.slane %v3794_v47, %v6729_v61  ;;  %v3153_v42 = vcombine.high %v3145_v44, %v3145_v44 }
 0x32e   :  { %v4790_v57 = vrot.slane %v2899_v53, 9  ;;  %v3797_v6 = vmax.f32 %v2898_v11, %v4788_v43  ;;  %v3798_v25 = vmax.f32 %v2897_v30, %v4789_v54  ;;  %v4187_v56 = vrot.slane %v3796_v28, %v6729_v61 }
 0x32f   :  { %v4183_v62 = vrot.slane %v3795_v45, %v6729_v61  ;;  %v4562_v16 = vsel %vm4520_vm15, %v4175_v50, %v4171_v40  ;;  %v3154_v63 = vcombine.high %v3152_v39, %v3152_v39  ;;  %v4847_v0 = vrot.slane %v3145_v44, 9 }
 0x330   :  { %v4563_v13 = vsel %vm4522_vm0, %v4179_v55, %v4562_v16  ;;  %v3799_v19 = vmax.f32 %v2899_v53, %v4790_v57  ;;  %v4191_v49 = vrot.slane %v3797_v6, %v6729_v61  ;;  %v4195_v48 = vrot.slane %v3798_v25, %v6729_v61 }
 0x331   :  { %v4564_v4 = vsel %vm4524_vm1, %v4183_v62, %v4563_v13  ;;  %v4848_v1 = vrot.slane %v3153_v42, 9  ;;  %v4849_v34 = vrot.slane %v3152_v39, 9  ;;  %v4850_v33 = vrot.slane %v3154_v63, 9 }
 0x332   :  { %v4199_v7 = vrot.slane %v3799_v19, %v6729_v61  ;;  %v4565_v5 = vsel %vm4526_vm2, %v4187_v56, %v4564_v4  ;;  %v3856_v35 = vmax.f32 %v3145_v44, %v4847_v0  ;;  %v3155_v9 = vcombine.high %v2659_v51, %v2659_v51 }
 0x333   :  { %v4566_v58 = vsel %vm4528_vm3, %v4191_v49, %v4565_v5  ;;  %v3857_v15 = vmax.f32 %v3153_v42, %v4848_v1  ;;  %v3858_v17 = vmax.f32 %v3152_v39, %v4849_v34  ;;  %v3859_v20 = vmax.f32 %v3154_v63, %v4850_v33 }
 0x334   :  { %v4567_v37 = vsel %vm4530_vm4, %v4195_v48, %v4566_v58  ;;  %v4427_v27 = vrot.slane %v3856_v35, %v6729_v61  ;;  %v3162_v36 = vrot.slane %v2659_v51, %v6727_v22  ;;  %v3169_v32 = vrot.slane %v3155_v9, %v6727_v22 }
 0x335   :  { %v4568_v46 = vsel %vm4532_vm5, %v4199_v7, %v4567_v37  ;;  %v4431_v29 = vrot.slane %v3857_v15, %v6729_v61  ;;  %v4435_v23 = vrot.slane %v3858_v17, %v6729_v61  ;;  %v4439_v3 = vrot.slane %v3859_v20, %v6729_v61 }
 0x336   :  { %4660 = vst [vmem:[%s7347_s3 + $0x28] sm:$0xff] %v4568_v46  ;;  %v3170_v21 = vcombine.high %v3162_v36, %v3162_v36  ;;  %v3171_v2 = vcombine.high %v3169_v32, %v3169_v32  ;;  %v4851_v8 = vrot.slane %v3162_v36, 9  ;;  %v4853_v26 = vrot.slane %v3169_v32, 9 }
 0x337   :  { %v4618_v14 = vsel %vm4520_vm15, %v4431_v29, %v4427_v27 }
 0x338   :  { %v4619_v31 = vsel %vm4522_vm0, %v4435_v23, %v4618_v14  ;;  %v4852_v10 = vrot.slane %v3170_v21, 9  ;;  %v4854_v44 = vrot.slane %v3171_v2, 9  ;;  %v3860_v51 = vmax.f32 %v3162_v36, %v4851_v8 }
 0x339   :  { %v3862_v24 = vmax.f32 %v3169_v32, %v4853_v26  ;;  %v4620_v12 = vsel %vm4524_vm1, %v4439_v3, %v4619_v31 }
 0x33a   :  { %v3861_v18 = vmax.f32 %v3170_v21, %v4852_v10  ;;  %v3863_v59 = vmax.f32 %v3171_v2, %v4854_v44  ;;  %v4443_v30 = vrot.slane %v3860_v51, %v6729_v61 }
 0x33b   :  { %v4451_v39 = vrot.slane %v3862_v24, %v6729_v61 }
 0x33c   :  { %v4447_v11 = vrot.slane %v3861_v18, %v6729_v61  ;;  %v4621_v38 = vsel %vm4526_vm2, %v4443_v30, %v4620_v12  ;;  %v4455_v60 = vrot.slane %v3863_v59, %v6729_v61 }
 0x33e   :  { %v4622_v52 = vsel %vm4528_vm3, %v4447_v11, %v4621_v38 }
 0x33f   :  { %v4623_v47 = vsel %vm4530_vm4, %v4451_v39, %v4622_v52 }
 0x340   :  { %v4624_v40 = vsel %vm4532_vm5, %v4455_v60, %v4623_v47 }
 0x341   :  { %4668 = vst [vmem:[%s7347_s3 + $0x68] sm:$0xff] %v4624_v40 }
 0x34b   :  { %v4938_v53 = vpop.f32.mrb[24].mxu0 }
 0x34c   :  { %v2418_v43 = vadd.f32 %v7086_v41, %v4938_v53  ;;  %v2409_v54 = vpop.f32.mrb[25].mxu0 }
 0x34d   :  { %v2410_v28 = vadd.f32 %v7086_v41, %v2409_v54  ;;  %v4939_v45 = vpop.f32.mrb[26].mxu0  ;;  %v4970_v50 = vpop.f32.mrb[24].mxu1 }
 0x34e   :  { %v2594_v55 = vmax.f32 %v2418_v43, 0.0  ;;  %v2421_v42 = vadd.f32 %v7086_v41, %v4939_v45  ;;  %v2412_v57 = vpop.f32.mrb[27].mxu0  ;;  %v2546_v6 = vadd.f32 %v7086_v41, %v4970_v50  ;;  %v2537_v25 = vpop.f32.mrb[25].mxu1 }
 0x34f   :  { %v2592_v56 = vmax.f32 %v2410_v28, 0.0  ;;  %v2413_v62 = vadd.f32 %v7086_v41, %v2412_v57  ;;  %v2538_v16 = vadd.f32 %v7086_v41, %v2537_v25  ;;  %v4971_v63 = vpop.f32.mrb[26].mxu1 }
 0x350   :  { %v2595_v0 = vmax.f32 %v2421_v42, 0.0  ;;  %v2626_v13 = vmax.f32 %v2546_v6, 0.0  ;;  %v2549_v19 = vadd.f32 %v7086_v41, %v4971_v63  ;;  %v2540_v49 = vpop.f32.mrb[27].mxu1 }
 0x351   :  { %v2644_v48 = vmax.f32 %v2592_v56, %v2594_v55  ;;  %v2593_v4 = vmax.f32 %v2413_v62, 0.0  ;;  %v2624_v1 = vmax.f32 %v2538_v16, 0.0  ;;  %v2541_v34 = vadd.f32 %v7086_v41, %v2540_v49 }
 0x352   :  { %v2627_v33 = vmax.f32 %v2549_v19, 0.0 }
 0x353   :  { %v2900_v7 = vcombine.high %v2644_v48, %v2644_v48  ;;  %v2907_v5 = vrot.slane %v2644_v48, %v6727_v22  ;;  %v2645_v35 = vmax.f32 %v2593_v4, %v2595_v0  ;;  %v2660_v9 = vmax.f32 %v2624_v1, %v2626_v13 }
 0x354   :  { %v2625_v58 = vmax.f32 %v2541_v34, 0.0 }
 0x355   :  { %v2914_v15 = vrot.slane %v2900_v7, %v6727_v22  ;;  %v2915_v17 = vcombine.high %v2907_v5, %v2907_v5  ;;  %v4791_v20 = vrot.slane %v2907_v5, 9  ;;  %v2917_v37 = vcombine.high %v2645_v35, %v2645_v35 }
 0x356   :  { %v2924_v27 = vrot.slane %v2645_v35, %v6727_v22  ;;  %v3172_v36 = vcombine.high %v2660_v9, %v2660_v9  ;;  %v3179_v32 = vrot.slane %v2660_v9, %v6727_v22  ;;  %v2661_v46 = vmax.f32 %v2625_v58, %v2627_v33 }
 0x357   :  { %v2916_v29 = vcombine.high %v2914_v15, %v2914_v15  ;;  %v4792_v23 = vrot.slane %v2915_v17, 9  ;;  %v4793_v3 = vrot.slane %v2914_v15, 9  ;;  %v3800_v21 = vmax.f32 %v2907_v5, %v4791_v20 }
 0x358   :  { %v2931_v2 = vrot.slane %v2917_v37, %v6727_v22  ;;  %v2932_v8 = vcombine.high %v2924_v27, %v2924_v27  ;;  %v4795_v26 = vrot.slane %v2924_v27, 9  ;;  %v3186_v14 = vrot.slane %v3172_v36, %v6727_v22 }
 0x359   :  { %v4794_v31 = vrot.slane %v2916_v29, 9  ;;  %v3801_v10 = vmax.f32 %v2915_v17, %v4792_v23  ;;  %v3802_v44 = vmax.f32 %v2914_v15, %v4793_v3  ;;  %v4203_v51 = vrot.slane %v3800_v21, %v6729_v61 }
 0x35a   :  { %v2933_v24 = vcombine.high %v2931_v2, %v2931_v2  ;;  %v4796_v12 = vrot.slane %v2932_v8, 9  ;;  %v4797_v18 = vrot.slane %v2931_v2, 9  ;;  %v3804_v59 = vmax.f32 %v2924_v27, %v4795_v26 }
 0x35b   :  { %v3803_v30 = vmax.f32 %v2916_v29, %v4794_v31  ;;  %v4207_v11 = vrot.slane %v3801_v10, %v6729_v61  ;;  %v4211_v38 = vrot.slane %v3802_v44, %v6729_v61  ;;  %v3187_v39 = vcombine.high %v3179_v32, %v3179_v32 }
 0x35c   :  { %v4798_v60 = vrot.slane %v2933_v24, 9  ;;  %v3805_v52 = vmax.f32 %v2932_v8, %v4796_v12  ;;  %v3806_v47 = vmax.f32 %v2931_v2, %v4797_v18  ;;  %v4219_v40 = vrot.slane %v3804_v59, %v6729_v61 }
 0x35d   :  { %v4215_v53 = vrot.slane %v3803_v30, %v6729_v61  ;;  %v4569_v43 = vsel %vm4520_vm15, %v4207_v11, %v4203_v51  ;;  %v3188_v54 = vcombine.high %v3186_v14, %v3186_v14  ;;  %v4855_v28 = vrot.slane %v3179_v32, 9 }
 0x35e   :  { %v4570_v45 = vsel %vm4522_vm0, %v4211_v38, %v4569_v43  ;;  %v3807_v50 = vmax.f32 %v2933_v24, %v4798_v60  ;;  %v4223_v55 = vrot.slane %v3805_v52, %v6729_v61  ;;  %v4227_v42 = vrot.slane %v3806_v47, %v6729_v61 }
 0x35f   :  { %v4571_v57 = vsel %vm4524_vm1, %v4215_v53, %v4570_v45  ;;  %v4856_v6 = vrot.slane %v3187_v39, 9  ;;  %v4857_v25 = vrot.slane %v3186_v14, 9  ;;  %v4858_v56 = vrot.slane %v3188_v54, 9 }
 0x360   :  { %v4231_v62 = vrot.slane %v3807_v50, %v6729_v61  ;;  %v4572_v16 = vsel %vm4526_vm2, %v4219_v40, %v4571_v57  ;;  %v3864_v63 = vmax.f32 %v3179_v32, %v4855_v28  ;;  %v3189_v0 = vcombine.high %v2661_v46, %v2661_v46 }
 0x361   :  { %v4573_v13 = vsel %vm4528_vm3, %v4223_v55, %v4572_v16  ;;  %v3865_v19 = vmax.f32 %v3187_v39, %v4856_v6  ;;  %v3866_v49 = vmax.f32 %v3186_v14, %v4857_v25  ;;  %v3867_v48 = vmax.f32 %v3188_v54, %v4858_v56 }
 0x362   :  { %v4574_v4 = vsel %vm4530_vm4, %v4227_v42, %v4573_v13  ;;  %v4459_v1 = vrot.slane %v3864_v63, %v6729_v61  ;;  %v3196_v34 = vrot.slane %v2661_v46, %v6727_v22  ;;  %v3203_v33 = vrot.slane %v3189_v0, %v6727_v22 }
 0x363   :  { %v4575_v7 = vsel %vm4532_vm5, %v4231_v62, %v4574_v4  ;;  %v4463_v5 = vrot.slane %v3865_v19, %v6729_v61  ;;  %v4467_v35 = vrot.slane %v3866_v49, %v6729_v61  ;;  %v4471_v9 = vrot.slane %v3867_v48, %v6729_v61 }
 0x364   :  { %4661 = vst [vmem:[%s7347_s3 + $0x30] sm:$0xff] %v4575_v7  ;;  %v3204_v58 = vcombine.high %v3196_v34, %v3196_v34  ;;  %v3205_v15 = vcombine.high %v3203_v33, %v3203_v33  ;;  %v4859_v17 = vrot.slane %v3196_v34, 9  ;;  %v4861_v20 = vrot.slane %v3203_v33, 9 }
 0x365   :  { %v4625_v37 = vsel %vm4520_vm15, %v4463_v5, %v4459_v1 }
 0x366   :  { %v4626_v27 = vsel %vm4522_vm0, %v4467_v35, %v4625_v37  ;;  %v4860_v36 = vrot.slane %v3204_v58, 9  ;;  %v4862_v32 = vrot.slane %v3205_v15, 9  ;;  %v3868_v46 = vmax.f32 %v3196_v34, %v4859_v17 }
 0x367   :  { %v3870_v29 = vmax.f32 %v3203_v33, %v4861_v20  ;;  %v4627_v23 = vsel %vm4524_vm1, %v4471_v9, %v4626_v27 }
 0x368   :  { %v3869_v3 = vmax.f32 %v3204_v58, %v4860_v36  ;;  %v3871_v21 = vmax.f32 %v3205_v15, %v4862_v32  ;;  %v4475_v2 = vrot.slane %v3868_v46, %v6729_v61 }
 0x369   :  { %v4483_v14 = vrot.slane %v3870_v29, %v6729_v61 }
 0x36a   :  { %v4479_v8 = vrot.slane %v3869_v3, %v6729_v61  ;;  %v4628_v26 = vsel %vm4526_vm2, %v4475_v2, %v4627_v23  ;;  %v4487_v31 = vrot.slane %v3871_v21, %v6729_v61 }
 0x36c   :  { %v4629_v10 = vsel %vm4528_vm3, %v4479_v8, %v4628_v26 }
 0x36d   :  { %v4630_v44 = vsel %vm4530_vm4, %v4483_v14, %v4629_v10 }
 0x36e   :  { %v4631_v51 = vsel %vm4532_vm5, %v4487_v31, %v4630_v44 }
 0x36f   :  { %4669 = vst [vmem:[%s7347_s3 + $0x70] sm:$0xff] %v4631_v51 }
 0x376   :  { %v4942_v24 = vpop.f32.mrb[28].mxu0 }
 0x377   :  { %v2434_v12 = vadd.f32 %v7086_v41, %v4942_v24  ;;  %v2425_v18 = vpop.f32.mrb[29].mxu0 }
 0x378   :  { %v2426_v59 = vadd.f32 %v7086_v41, %v2425_v18  ;;  %v4974_v30 = vpop.f32.mrb[28].mxu1  ;;  %v4943_v11 = vpop.f32.mrb[30].mxu0 }
 0x379   :  { %v2598_v38 = vmax.f32 %v2434_v12, 0.0  ;;  %v2562_v39 = vadd.f32 %v7086_v41, %v4974_v30  ;;  %v2437_v60 = vadd.f32 %v7086_v41, %v4943_v11  ;;  %v2553_v52 = vpop.f32.mrb[29].mxu1  ;;  %v2428_v47 = vpop.f32.mrb[31].mxu0 }
 0x37a   :  { %v2596_v40 = vmax.f32 %v2426_v59, 0.0  ;;  %v2554_v53 = vadd.f32 %v7086_v41, %v2553_v52  ;;  %v2429_v43 = vadd.f32 %v7086_v41, %v2428_v47  ;;  %v4975_v54 = vpop.f32.mrb[30].mxu1 }
 0x37b   :  { %v2630_v28 = vmax.f32 %v2562_v39, 0.0  ;;  %v2599_v45 = vmax.f32 %v2437_v60, 0.0  ;;  %v2565_v50 = vadd.f32 %v7086_v41, %v4975_v54  ;;  %v2556_v55 = vpop.f32.mrb[31].mxu1 }
 0x37c   :  { %v2646_v42 = vmax.f32 %v2596_v40, %v2598_v38  ;;  %v2628_v57 = vmax.f32 %v2554_v53, 0.0  ;;  %v2597_v6 = vmax.f32 %v2429_v43, 0.0  ;;  %v2557_v25 = vadd.f32 %v7086_v41, %v2556_v55 }
 0x37d   :  { %v2631_v56 = vmax.f32 %v2565_v50, 0.0 }
 0x37e   :  { %v2934_v62 = vcombine.high %v2646_v42, %v2646_v42  ;;  %v2941_v16 = vrot.slane %v2646_v42, %v6727_v22  ;;  %v2662_v63 = vmax.f32 %v2628_v57, %v2630_v28  ;;  %v2647_v0 = vmax.f32 %v2597_v6, %v2599_v45 }
 0x37f   :  { %v2629_v13 = vmax.f32 %v2557_v25, 0.0 }
 0x380   :  { %v2948_v19 = vrot.slane %v2934_v62, %v6727_v22  ;;  %v2949_v49 = vcombine.high %v2941_v16, %v2941_v16  ;;  %v4799_v48 = vrot.slane %v2941_v16, 9  ;;  %v3206_v4 = vcombine.high %v2662_v63, %v2662_v63 }
 0x381   :  { %v3213_v1 = vrot.slane %v2662_v63, %v6727_v22  ;;  %v2951_v34 = vcombine.high %v2647_v0, %v2647_v0  ;;  %v2958_v33 = vrot.slane %v2647_v0, %v6727_v22  ;;  %v2663_v7 = vmax.f32 %v2629_v13, %v2631_v56 }
 0x382   :  { %v2950_v5 = vcombine.high %v2948_v19, %v2948_v19  ;;  %v4800_v41 = vrot.slane %v2949_v49, 9  ;;  %v4801_v35 = vrot.slane %v2948_v19, 9  ;;  %v3808_v9 = vmax.f32 %v2941_v16, %v4799_v48 }
 0x383   :  { %v3220_v58 = vrot.slane %v3206_v4, %v6727_v22  ;;  %v3221_v15 = vcombine.high %v3213_v1, %v3213_v1  ;;  %v4863_v17 = vrot.slane %v3213_v1, 9  ;;  %v2965_v20 = vrot.slane %v2951_v34, %v6727_v22 }
 0x384   :  { %v4802_v37 = vrot.slane %v2950_v5, 9  ;;  %v3809_v27 = vmax.f32 %v2949_v49, %v4800_v41  ;;  %v3810_v36 = vmax.f32 %v2948_v19, %v4801_v35  ;;  %v4235_v32 = vrot.slane %v3808_v9, %v6729_v61 }
 0x385   :  { %v3222_v46 = vcombine.high %v3220_v58, %v3220_v58  ;;  %v4864_v29 = vrot.slane %v3221_v15, 9  ;;  %v4865_v23 = vrot.slane %v3220_v58, 9  ;;  %v3872_v3 = vmax.f32 %v3213_v1, %v4863_v17 }
 0x386   :  { %v3811_v21 = vmax.f32 %v2950_v5, %v4802_v37  ;;  %v4239_v2 = vrot.slane %v3809_v27, %v6729_v61  ;;  %v4243_v8 = vrot.slane %v3810_v36, %v6729_v61  ;;  %v2966_v26 = vcombine.high %v2958_v33, %v2958_v33 }
 0x387   :  { %v4866_v14 = vrot.slane %v3222_v46, 9  ;;  %v3873_v31 = vmax.f32 %v3221_v15, %v4864_v29  ;;  %v3874_v10 = vmax.f32 %v3220_v58, %v4865_v23  ;;  %v4491_v44 = vrot.slane %v3872_v3, %v6729_v61 }
 0x388   :  { %v4247_v51 = vrot.slane %v3811_v21, %v6729_v61  ;;  %v4576_v24 = vsel %vm4520_vm15, %v4239_v2, %v4235_v32  ;;  %v2967_v12 = vcombine.high %v2965_v20, %v2965_v20  ;;  %v4803_v18 = vrot.slane %v2958_v33, 9 }
 0x389   :  { %v4577_v59 = vsel %vm4522_vm0, %v4243_v8, %v4576_v24  ;;  %v3875_v30 = vmax.f32 %v3222_v46, %v4866_v14  ;;  %v4495_v11 = vrot.slane %v3873_v31, %v6729_v61  ;;  %v4499_v38 = vrot.slane %v3874_v10, %v6729_v61 }
 0x38a   :  { %v4804_v39 = vrot.slane %v2966_v26, 9  ;;  %v4805_v60 = vrot.slane %v2965_v20, 9  ;;  %v4806_v52 = vrot.slane %v2967_v12, 9  ;;  %v3812_v47 = vmax.f32 %v2958_v33, %v4803_v18 }
 0x38b   :  { %v4632_v40 = vsel %vm4520_vm15, %v4495_v11, %v4491_v44  ;;  %v3223_v53 = vcombine.high %v2663_v7, %v2663_v7  ;;  %v4578_v45 = vsel %vm4524_vm1, %v4247_v51, %v4577_v59  ;;  %v3230_v55 = vrot.slane %v2663_v7, %v6727_v22 }
 0x38c   :  { %v3813_v43 = vmax.f32 %v2966_v26, %v4804_v39  ;;  %v3814_v54 = vmax.f32 %v2965_v20, %v4805_v60  ;;  %v3815_v28 = vmax.f32 %v2967_v12, %v4806_v52  ;;  %v4251_v50 = vrot.slane %v3812_v47, %v6729_v61 }
 0x38d   :  { %v3237_v42 = vrot.slane %v3223_v53, %v6727_v22  ;;  %v4503_v57 = vrot.slane %v3875_v30, %v6729_v61  ;;  %v4633_v6 = vsel %vm4522_vm0, %v4499_v38, %v4632_v40  ;;  %v3238_v16 = vcombine.high %v3230_v55, %v3230_v55 }
 0x38e   :  { %v4255_v25 = vrot.slane %v3813_v43, %v6729_v61  ;;  %v4259_v56 = vrot.slane %v3814_v54, %v6729_v61  ;;  %v4579_v62 = vsel %vm4526_vm2, %v4251_v50, %v4578_v45  ;;  %v4867_v0 = vrot.slane %v3230_v55, 9 }
 0x38f   :  { %v3239_v63 = vcombine.high %v3237_v42, %v3237_v42  ;;  %v4263_v13 = vrot.slane %v3815_v28, %v6729_v61  ;;  %v4869_v49 = vrot.slane %v3237_v42, 9  ;;  %v4868_v48 = vrot.slane %v3238_v16, 9 }
 0x390   :  { %v4580_v19 = vsel %vm4528_vm3, %v4255_v25, %v4579_v62  ;;  %v3876_v1 = vmax.f32 %v3230_v55, %v4867_v0  ;;  %v4634_v7 = vsel %vm4524_vm1, %v4503_v57, %v4633_v6 }
 0x391   :  { %v4581_v22 = vsel %vm4530_vm4, %v4259_v56, %v4580_v19  ;;  %v4870_v4 = vrot.slane %v3239_v63, 9  ;;  %v3878_v33 = vmax.f32 %v3237_v42, %v4869_v49  ;;  %v3877_v5 = vmax.f32 %v3238_v16, %v4868_v48 }
 0x392   :  { %v4582_v34 = vsel %vm4532_vm5, %v4263_v13, %v4581_v22  ;;  %v4507_v35 = vrot.slane %v3876_v1, %v6729_v61 }
 0x393   :  { %4662 = vst [vmem:[%s7347_s3 + $0x38] sm:$0xff] %v4582_v34  ;;  %v3879_v41 = vmax.f32 %v3239_v63, %v4870_v4  ;;  %v4511_v9 = vrot.slane %v3877_v5, %v6729_v61  ;;  %v4515_v15 = vrot.slane %v3878_v33, %v6729_v61 }
 0x394   :  { %v4635_v58 = vsel %vm4526_vm2, %v4507_v35, %v4634_v7 }
 0x395   :  { %v4519_v17 = vrot.slane %v3879_v41, %v6729_v61  ;;  %v4636_v20 = vsel %vm4528_vm3, %v4511_v9, %v4635_v58 }
 0x396   :  { %v4637_v37 = vsel %vm4530_vm4, %v4515_v15, %v4636_v20 }
 0x397   :  { %v4638_v27 = vsel %vm4532_vm5, %v4519_v17, %v4637_v37 }
 0x398   :  { %4670 = vst [vmem:[%s7347_s3 + $0x78] sm:$0xff] %v4638_v27 }

</bundles_post_ra>
